<compile_context>
chip_gen: v7x
topology: tpu7x:2x2x1
jax: 0.10.0
libtpu: 0.0.40
codegen_flags: <defaults>
</compile_context>

<pallas_src>
import functools

import jax
import jax.numpy as jnp
from jax import lax
from jax.experimental import pallas as pl
from jax.experimental.pallas import tpu as pltpu

# Module hyperparameters (from the PyTorch source)
EMB_DIM = 100
HIDDEN = 300
FC1_DIM = 256
OUT_DIM = 3
VOCAB = 50          # synthetic stand-in for len(TEXT.vocab.stoi)

# Lane / sublane padded sizes
VOCAB_PAD = 128     # 50  -> 128 lanes (one-hot matmul embedding lookup)
EMB_PAD = 128       # 100 -> 128 lanes
HID_PAD = 384       # 300 -> 384 lanes
OUT_PAD = 128       # 3   -> 128 lanes (lane-dense output store)
SUBLANE = 8


def _round_up(x, m):
    return (x + m - 1) // m * m


def _pad2(a, rows, cols):
    return jnp.pad(a, ((0, rows - a.shape[0]), (0, cols - a.shape[1])))


def _net_kernel(tok_ref, emb_ref, wih_ref, whh_ref, b_ref, w1_ref, b1_ref,
                w2_ref, b2_ref, out_ref, xproj_ref, *, seq, bpad):
    rows = seq * bpad

    # Embedding lookup as one-hot @ table (exact: one-hot entries are 0/1).
    # TODO(synk): for a realistic (10k+) vocab keep the gather outside the kernel (or
    # use a manual DMA gather); the one-hot matmul only makes sense for a VMEM table.
    vocab_iota = lax.broadcasted_iota(jnp.int32, (rows, VOCAB_PAD), 1)
    onehot = (tok_ref[...] == vocab_iota).astype(jnp.float32)
    xemb = jnp.dot(onehot, emb_ref[...], preferred_element_type=jnp.float32)

    # Input projection for ALL timesteps as one MXU matmul, with the pre-summed RNN
    # biases hoisted out of the recurrence (added once, not per step).
    xproj_ref[...] = (
        jnp.dot(xemb, wih_ref[...], preferred_element_type=jnp.float32)
        + b_ref[...])

    whh = whh_ref[...]  # recurrent weights stay live across the (unrolled) loop

    def step(t, h):
        start = pl.multiple_of(t * bpad, bpad)        # sublane-aligned slice start
        xt = xproj_ref[pl.ds(start, bpad), :]         # (bpad, HID_PAD)
        return jnp.tanh(
            xt + jnp.dot(h, whh, preferred_element_type=jnp.float32))

    # Serial recurrence; seq is small & static so fully unroll (LLO sees the chain).
    h = lax.fori_loop(0, seq, step,
                      jnp.zeros((bpad, HID_PAD), jnp.float32),
                      unroll=True)

    z1 = jnp.maximum(
        jnp.dot(h, w1_ref[...], preferred_element_type=jnp.float32) + b1_ref[...],
        0.0)
    out_ref[...] = (
        jnp.dot(z1, w2_ref[...], preferred_element_type=jnp.float32) + b2_ref[...])


def net_forward(tokens, params):
    """tokens: (seq, batch) int32 token ids. Returns (batch, OUT_DIM) f32 logits."""
    seq, batch = tokens.shape
    bpad = _round_up(batch, SUBLANE)

    # Pad batch -> sublane multiple; flatten to a (seq*bpad, 1) id column for the
    # in-kernel one-hot lookup. Padded rows use token 0; their outputs are sliced off.
    tok = jnp.pad(tokens.astype(jnp.int32), ((0, 0), (0, bpad - batch)))
    tok = tok.reshape(seq * bpad, 1)

    # Zero-padded weights. Padding is exact:
    #   - padded vocab rows of the table are never selected (ids < VOCAB),
    #   - padded emb cols of the table are 0 and padded emb rows of W_ih are 0,
    #   - padded hidden cols of W_ih/W_hh/bias are 0 => tanh(0)=0 keeps them 0,
    #   - padded hidden rows of fc1_w are 0, padded out cols of fc2 are 0.
    emb   = _pad2(params["emb"], VOCAB_PAD, EMB_PAD)
    w_ih  = _pad2(params["w_ih"], EMB_PAD, HID_PAD)
    w_hh  = _pad2(params["w_hh"], HID_PAD, HID_PAD)
    b_rnn = _pad2(params["b_ih"] + params["b_hh"], 1, HID_PAD)  # biases pre-summed
    fc1_w = _pad2(params["fc1_w"], HID_PAD, FC1_DIM)
    fc1_b = params["fc1_b"]                                     # (1, 256) already lane-dense
    fc2_w = _pad2(params["fc2_w"], FC1_DIM, OUT_PAD)
    fc2_b = _pad2(params["fc2_b"], 1, OUT_PAD)

    vmem = pl.BlockSpec(memory_space=pltpu.MemorySpace.VMEM)
    out = pl.pallas_call(
        functools.partial(_net_kernel, seq=seq, bpad=bpad),
        out_shape=jax.ShapeDtypeStruct((bpad, OUT_PAD), jnp.float32),
        in_specs=[vmem] * 9,          # no grid: every operand is one VMEM-resident block
        out_specs=vmem,
        scratch_shapes=[pltpu.VMEM((seq * bpad, HID_PAD), jnp.float32)],  # xproj slab
    )(tok, emb, w_ih, w_hh, b_rnn, fc1_w, fc1_b, fc2_w, fc2_b)

    return out[:batch, :OUT_DIM]


def init_params(key):
    ks = jax.random.split(key, 9)
    s = 0.05
    return {
        "emb":   jax.random.normal(ks[0], (VOCAB, EMB_DIM), jnp.float32) * s,
        "w_ih":  jax.random.normal(ks[1], (EMB_DIM, HIDDEN), jnp.float32) * s,
        "w_hh":  jax.random.normal(ks[2], (HIDDEN, HIDDEN), jnp.float32) * s,
        "b_ih":  jax.random.normal(ks[3], (1, HIDDEN), jnp.float32) * s,
        "b_hh":  jax.random.normal(ks[4], (1, HIDDEN), jnp.float32) * s,
        "fc1_w": jax.random.normal(ks[5], (HIDDEN, FC1_DIM), jnp.float32) * s,
        "fc1_b": jax.random.normal(ks[6], (1, FC1_DIM), jnp.float32) * s,
        "fc2_w": jax.random.normal(ks[7], (FC1_DIM, OUT_DIM), jnp.float32) * s,
        "fc2_b": jax.random.normal(ks[8], (1, OUT_DIM), jnp.float32) * s,
    }


def net_reference(tokens, p):
    """Pure-JAX reference for sanity checking."""
    x = jnp.take(p["emb"], tokens, axis=0)          # (seq, batch, emb)
    h = jnp.zeros((tokens.shape[1], HIDDEN), jnp.float32)
    for t in range(tokens.shape[0]):
        h = jnp.tanh(x[t] @ p["w_ih"] + p["b_ih"] + h @ p["w_hh"] + p["b_hh"])
    z1 = jnp.maximum(h @ p["fc1_w"] + p["fc1_b"], 0.0)
    return z1 @ p["fc2_w"] + p["fc2_b"]


if __name__ == "__main__":
    key = jax.random.PRNGKey(0)
    kp, kx = jax.random.split(key)
    params = init_params(kp)

    SEQ, BATCH = 8, 2
    tokens = jax.random.randint(kx, (SEQ, BATCH), 0, VOCAB, dtype=jnp.int32)

    out = jax.block_until_ready(net_forward(tokens, params))

    ref = net_reference(tokens, params)
    assert out.shape == (BATCH, OUT_DIM)
    assert jnp.allclose(out, ref, atol=1e-4, rtol=1e-4)
    print("KERNEL_OK")
</pallas_src>

<mosaic_0001>
module attributes {stable_mosaic.version = 11 : i64} {
  func.func @_net_kernel(%arg0: memref<64x1xi32, #tpu.memory_space<vmem>>, %arg1: memref<128x128xf32, #tpu.memory_space<vmem>>, %arg2: memref<128x384xf32, #tpu.memory_space<vmem>>, %arg3: memref<384x384xf32, #tpu.memory_space<vmem>>, %arg4: memref<1x384xf32, #tpu.memory_space<vmem>>, %arg5: memref<384x256xf32, #tpu.memory_space<vmem>>, %arg6: memref<1x256xf32, #tpu.memory_space<vmem>>, %arg7: memref<256x128xf32, #tpu.memory_space<vmem>>, %arg8: memref<1x128xf32, #tpu.memory_space<vmem>>, %arg9: memref<8x128xf32, #tpu.memory_space<vmem>>, %arg10: memref<64x384xf32, #tpu.memory_space<vmem>>) attributes {dimension_semantics = [], scalar_prefetch = 0 : i64, scratch_operands = 1 : i64, tpu.core_type = #tpu.core_type<tc>} {
    %0 = tpu.iota {dimensions = array<i32: 1>} : vector<64x128xi32>
    %c0 = arith.constant 0 : index
    %c0_0 = arith.constant 0 : index
    %1 = vector.load %arg0[%c0, %c0_0] : memref<64x1xi32, #tpu.memory_space<vmem>>, vector<64x1xi32>
    %2 = vector.broadcast %1 : vector<64x1xi32> to vector<64x128xi32>
    %3 = arith.cmpi eq, %2, %0 : vector<64x128xi32>
    %4 = arith.extui %3 : vector<64x128xi1> to vector<64x128xi32>
    %5 = arith.sitofp %4 : vector<64x128xi32> to vector<64x128xf32>
    %c0_1 = arith.constant 0 : index
    %c0_2 = arith.constant 0 : index
    %6 = vector.load %arg1[%c0_1, %c0_2] : memref<128x128xf32, #tpu.memory_space<vmem>>, vector<128x128xf32>
    %cst = arith.constant dense<0.000000e+00> : vector<64x128xf32>
    %7 = tpu.matmul %5, %6, %cst {dimension_numbers = #tpu.dot_dimension_numbers<[1], [0], [0], [1], [0, 0, 1, 1], [], []>} : vector<64x128xf32>, vector<128x128xf32>, vector<64x128xf32> -> vector<64x128xf32>
    %c0_3 = arith.constant 0 : index
    %c0_4 = arith.constant 0 : index
    %8 = vector.load %arg2[%c0_3, %c0_4] : memref<128x384xf32, #tpu.memory_space<vmem>>, vector<128x384xf32>
    %cst_5 = arith.constant dense<0.000000e+00> : vector<64x384xf32>
    %9 = tpu.matmul %7, %8, %cst_5 {dimension_numbers = #tpu.dot_dimension_numbers<[1], [0], [0], [1], [0, 0, 1, 1], [], []>} : vector<64x128xf32>, vector<128x384xf32>, vector<64x384xf32> -> vector<64x384xf32>
    %c0_6 = arith.constant 0 : index
    %c0_7 = arith.constant 0 : index
    %10 = vector.load %arg4[%c0_6, %c0_7] : memref<1x384xf32, #tpu.memory_space<vmem>>, vector<1x384xf32>
    %11 = vector.broadcast %10 : vector<1x384xf32> to vector<64x384xf32>
    %12 = arith.addf %9, %11 : vector<64x384xf32>
    %c0_8 = arith.constant 0 : index
    %c0_9 = arith.constant 0 : index
    %13 = vector.load %arg10[%c0_8, %c0_9] : memref<64x384xf32, #tpu.memory_space<vmem>>, vector<64x384xf32>
    tpu.vector_store %arg10[%c0_8, %c0_9], %12 {strides = array<i32>} : memref<64x384xf32, #tpu.memory_space<vmem>>, vector<64x384xf32>,
    %c0_10 = arith.constant 0 : index
    %c0_11 = arith.constant 0 : index
    %14 = vector.load %arg3[%c0_10, %c0_11] : memref<384x384xf32, #tpu.memory_space<vmem>>, vector<384x384xf32>
    %cst_12 = arith.constant 0.000000e+00 : f32
    %15 = vector.broadcast %cst_12 : f32 to vector<8x384xf32>
    %c0_i32 = arith.constant 0 : i32
    %c8_i32 = arith.constant 8 : i32
    %16 = arith.muli %c0_i32, %c8_i32 : i32
    %17 = tpu.assume_multiple %16, 8 : i32
    %18 = arith.index_cast %17 : i32 to index
    %c0_13 = arith.constant 0 : index
    %19 = vector.load %arg10[%18, %c0_13] : memref<64x384xf32, #tpu.memory_space<vmem>>, vector<8x384xf32>
    %cst_14 = arith.constant dense<0.000000e+00> : vector<8x384xf32>
    %20 = tpu.matmul %15, %14, %cst_14 {dimension_numbers = #tpu.dot_dimension_numbers<[1], [0], [0], [1], [0, 0, 1, 1], [], []>} : vector<8x384xf32>, vector<384x384xf32>, vector<8x384xf32> -> vector<8x384xf32>
    %21 = arith.addf %19, %20 : vector<8x384xf32>
    %22 = math.tanh %21 : vector<8x384xf32>
    %c1_i32 = arith.constant 1 : i32
    %c8_i32_15 = arith.constant 8 : i32
    %23 = arith.muli %c1_i32, %c8_i32_15 : i32
    %24 = tpu.assume_multiple %23, 8 : i32
    %25 = arith.index_cast %24 : i32 to index
    %c0_16 = arith.constant 0 : index
    %26 = vector.load %arg10[%25, %c0_16] : memref<64x384xf32, #tpu.memory_space<vmem>>, vector<8x384xf32>
    %cst_17 = arith.constant dense<0.000000e+00> : vector<8x384xf32>
    %27 = tpu.matmul %22, %14, %cst_17 {dimension_numbers = #tpu.dot_dimension_numbers<[1], [0], [0], [1], [0, 0, 1, 1], [], []>} : vector<8x384xf32>, vector<384x384xf32>, vector<8x384xf32> -> vector<8x384xf32>
    %28 = arith.addf %26, %27 : vector<8x384xf32>
    %29 = math.tanh %28 : vector<8x384xf32>
    %c2_i32 = arith.constant 2 : i32
    %c8_i32_18 = arith.constant 8 : i32
    %30 = arith.muli %c2_i32, %c8_i32_18 : i32
    %31 = tpu.assume_multiple %30, 8 : i32
    %32 = arith.index_cast %31 : i32 to index
    %c0_19 = arith.constant 0 : index
    %33 = vector.load %arg10[%32, %c0_19] : memref<64x384xf32, #tpu.memory_space<vmem>>, vector<8x384xf32>
    %cst_20 = arith.constant dense<0.000000e+00> : vector<8x384xf32>
    %34 = tpu.matmul %29, %14, %cst_20 {dimension_numbers = #tpu.dot_dimension_numbers<[1], [0], [0], [1], [0, 0, 1, 1], [], []>} : vector<8x384xf32>, vector<384x384xf32>, vector<8x384xf32> -> vector<8x384xf32>
    %35 = arith.addf %33, %34 : vector<8x384xf32>
    %36 = math.tanh %35 : vector<8x384xf32>
    %c3_i32 = arith.constant 3 : i32
    %c8_i32_21 = arith.constant 8 : i32
    %37 = arith.muli %c3_i32, %c8_i32_21 : i32
    %38 = tpu.assume_multiple %37, 8 : i32
    %39 = arith.index_cast %38 : i32 to index
    %c0_22 = arith.constant 0 : index
    %40 = vector.load %arg10[%39, %c0_22] : memref<64x384xf32, #tpu.memory_space<vmem>>, vector<8x384xf32>
    %cst_23 = arith.constant dense<0.000000e+00> : vector<8x384xf32>
    %41 = tpu.matmul %36, %14, %cst_23 {dimension_numbers = #tpu.dot_dimension_numbers<[1], [0], [0], [1], [0, 0, 1, 1], [], []>} : vector<8x384xf32>, vector<384x384xf32>, vector<8x384xf32> -> vector<8x384xf32>
    %42 = arith.addf %40, %41 : vector<8x384xf32>
    %43 = math.tanh %42 : vector<8x384xf32>
    %c4_i32 = arith.constant 4 : i32
    %c8_i32_24 = arith.constant 8 : i32
    %44 = arith.muli %c4_i32, %c8_i32_24 : i32
    %45 = tpu.assume_multiple %44, 8 : i32
    %46 = arith.index_cast %45 : i32 to index
    %c0_25 = arith.constant 0 : index
    %47 = vector.load %arg10[%46, %c0_25] : memref<64x384xf32, #tpu.memory_space<vmem>>, vector<8x384xf32>
    %cst_26 = arith.constant dense<0.000000e+00> : vector<8x384xf32>
    %48 = tpu.matmul %43, %14, %cst_26 {dimension_numbers = #tpu.dot_dimension_numbers<[1], [0], [0], [1], [0, 0, 1, 1], [], []>} : vector<8x384xf32>, vector<384x384xf32>, vector<8x384xf32> -> vector<8x384xf32>
    %49 = arith.addf %47, %48 : vector<8x384xf32>
    %50 = math.tanh %49 : vector<8x384xf32>
    %c5_i32 = arith.constant 5 : i32
    %c8_i32_27 = arith.constant 8 : i32
    %51 = arith.muli %c5_i32, %c8_i32_27 : i32
    %52 = tpu.assume_multiple %51, 8 : i32
    %53 = arith.index_cast %52 : i32 to index
    %c0_28 = arith.constant 0 : index
    %54 = vector.load %arg10[%53, %c0_28] : memref<64x384xf32, #tpu.memory_space<vmem>>, vector<8x384xf32>
    %cst_29 = arith.constant dense<0.000000e+00> : vector<8x384xf32>
    %55 = tpu.matmul %50, %14, %cst_29 {dimension_numbers = #tpu.dot_dimension_numbers<[1], [0], [0], [1], [0, 0, 1, 1], [], []>} : vector<8x384xf32>, vector<384x384xf32>, vector<8x384xf32> -> vector<8x384xf32>
    %56 = arith.addf %54, %55 : vector<8x384xf32>
    %57 = math.tanh %56 : vector<8x384xf32>
    %c6_i32 = arith.constant 6 : i32
    %c8_i32_30 = arith.constant 8 : i32
    %58 = arith.muli %c6_i32, %c8_i32_30 : i32
    %59 = tpu.assume_multiple %58, 8 : i32
    %60 = arith.index_cast %59 : i32 to index
    %c0_31 = arith.constant 0 : index
    %61 = vector.load %arg10[%60, %c0_31] : memref<64x384xf32, #tpu.memory_space<vmem>>, vector<8x384xf32>
    %cst_32 = arith.constant dense<0.000000e+00> : vector<8x384xf32>
    %62 = tpu.matmul %57, %14, %cst_32 {dimension_numbers = #tpu.dot_dimension_numbers<[1], [0], [0], [1], [0, 0, 1, 1], [], []>} : vector<8x384xf32>, vector<384x384xf32>, vector<8x384xf32> -> vector<8x384xf32>
    %63 = arith.addf %61, %62 : vector<8x384xf32>
    %64 = math.tanh %63 : vector<8x384xf32>
    %c7_i32 = arith.constant 7 : i32
    %c8_i32_33 = arith.constant 8 : i32
    %65 = arith.muli %c7_i32, %c8_i32_33 : i32
    %66 = tpu.assume_multiple %65, 8 : i32
    %67 = arith.index_cast %66 : i32 to index
    %c0_34 = arith.constant 0 : index
    %68 = vector.load %arg10[%67, %c0_34] : memref<64x384xf32, #tpu.memory_space<vmem>>, vector<8x384xf32>
    %cst_35 = arith.constant dense<0.000000e+00> : vector<8x384xf32>
    %69 = tpu.matmul %64, %14, %cst_35 {dimension_numbers = #tpu.dot_dimension_numbers<[1], [0], [0], [1], [0, 0, 1, 1], [], []>} : vector<8x384xf32>, vector<384x384xf32>, vector<8x384xf32> -> vector<8x384xf32>
    %70 = arith.addf %68, %69 : vector<8x384xf32>
    %71 = math.tanh %70 : vector<8x384xf32>
    %c8_i32_36 = arith.constant 8 : i32
    %c0_37 = arith.constant 0 : index
    %c0_38 = arith.constant 0 : index
    %72 = vector.load %arg5[%c0_37, %c0_38] : memref<384x256xf32, #tpu.memory_space<vmem>>, vector<384x256xf32>
    %cst_39 = arith.constant dense<0.000000e+00> : vector<8x256xf32>
    %73 = tpu.matmul %71, %72, %cst_39 {dimension_numbers = #tpu.dot_dimension_numbers<[1], [0], [0], [1], [0, 0, 1, 1], [], []>} : vector<8x384xf32>, vector<384x256xf32>, vector<8x256xf32> -> vector<8x256xf32>
    %c0_40 = arith.constant 0 : index
    %c0_41 = arith.constant 0 : index
    %74 = vector.load %arg6[%c0_40, %c0_41] : memref<1x256xf32, #tpu.memory_space<vmem>>, vector<1x256xf32>
    %75 = vector.broadcast %74 : vector<1x256xf32> to vector<8x256xf32>
    %76 = arith.addf %73, %75 : vector<8x256xf32>
    %cst_42 = arith.constant 0.000000e+00 : f32
    %77 = vector.broadcast %cst_42 : f32 to vector<8x256xf32>
    %78 = arith.maximumf %76, %77 : vector<8x256xf32>
    %c0_43 = arith.constant 0 : index
    %c0_44 = arith.constant 0 : index
    %79 = vector.load %arg7[%c0_43, %c0_44] : memref<256x128xf32, #tpu.memory_space<vmem>>, vector<256x128xf32>
    %cst_45 = arith.constant dense<0.000000e+00> : vector<8x128xf32>
    %80 = tpu.matmul %78, %79, %cst_45 {dimension_numbers = #tpu.dot_dimension_numbers<[1], [0], [0], [1], [0, 0, 1, 1], [], []>} : vector<8x256xf32>, vector<256x128xf32>, vector<8x128xf32> -> vector<8x128xf32>
    %c0_46 = arith.constant 0 : index
    %c0_47 = arith.constant 0 : index
    %81 = vector.load %arg8[%c0_46, %c0_47] : memref<1x128xf32, #tpu.memory_space<vmem>>, vector<1x128xf32>
    %82 = vector.broadcast %81 : vector<1x128xf32> to vector<8x128xf32>
    %83 = arith.addf %80, %82 : vector<8x128xf32>
    %c0_48 = arith.constant 0 : index
    %c0_49 = arith.constant 0 : index
    %84 = vector.load %arg9[%c0_48, %c0_49] : memref<8x128xf32, #tpu.memory_space<vmem>>, vector<8x128xf32>
    tpu.vector_store %arg9[%c0_48, %c0_49], %83 {strides = array<i32>} : memref<8x128xf32, #tpu.memory_space<vmem>>, vector<8x128xf32>,
    return
  }
}

</mosaic_0001>

<bundles_post_ra>
// kernel: tpu_custom_call.1
= control target key start
LH: loop header
LB: loop body
LE: loop exit
PB: predicated region body
PF: predicated region fallthrough
CT: control target
= control target key end

     0   :  { %14 = vsyncpa [#allocation4], 0  ;;  %s7161_s0 = inlined_call_operand.vmem [shape: s32[64,1], index: 0, kind: input, shape index: {}]   ;;  %s7162_s1 = inlined_call_operand.hbm [shape: f32[128,128], index: 1, kind: input, shape index: {}]   ;;  %s7163_s2 = inlined_call_operand.hbm [shape: f32[128,384], index: 2, kind: input, shape index: {}]   ;;  %s7164_s3 = inlined_call_operand.hbm [shape: f32[384,384], index: 3, kind: input, shape index: {}]   ;;  %s7165_s4 = inlined_call_operand.vmem [shape: f32[1,384], index: 4, kind: input, shape index: {}]   ;;  %s7166_s5 = inlined_call_operand.hbm [shape: f32[384,256], index: 5, kind: input, shape index: {}]   ;;  %s7167_s6 = inlined_call_operand.vmem [shape: f32[1,256], index: 6, kind: input, shape index: {}]   ;;  %s7168_s7 = inlined_call_operand.hbm [shape: f32[256,128], index: 7, kind: input, shape index: {}]   ;;  %s7169_s8 = inlined_call_operand.vmem [shape: f32[1,128], index: 8, kind: input, shape index: {}]   ;;  %s7170_s9 = inlined_call_operand.hbm [shape: f32[8,128], index: 9, kind: output, shape index: {}]  }
   0x1   :  { %15 = vsyncpa [#allocation7], 0 }
   0x2   :  { %16 = vsyncpa [#allocation10], 0 }
   0x3   :  { %17 = vsyncpa [#allocation5], 0  ;;  %s6052_s30 = smov [#allocation6]   ;;  %s5912_s13 = scalar_lea.hbm %s7163_s2, 6144 }
   0x4   :  { %s37_s10 = sshll.u32 %s6052_s30, 4  ;;  %p5913_p0 = scmp.ne.s32.totalorder %s7163_s2, %s5912_s13  ;;  %s38_s10 = int_to_ptr.vmem [resolvable:$true] %s37_s10 }
   0x5   :  { %p5916_p1 = scmp.lt.u32.totalorder %s5912_s13, %s7163_s2 }
   0x7   :  { %p5918_p2 = pnand %p5916_p1, %p5913_p0 }
   0x9   :  { %5921 = shalt.err (!%p5918_p2)
}
   0xa   :  { %s5922_s18 = scalar_lea.vmem %s38_s10, 6144  ;;  %p5927_p4 = scmp.lt.s32.totalorder %s38_s10, %s38_s10 }
   0xb   :  { %p5923_p3 = scmp.ne.s32.totalorder %s38_s10, %s5922_s18  ;;  %p5928_p5 = scmp.lt.s32.totalorder %s5922_s18, %s5922_s18 }
   0xd   :  { %p5929_p6 = por %p5928_p5, %p5927_p4 }
   0xf   :  { %p5930_p7 = pnand %p5929_p6, %p5923_p3 }
  0x11   :  { %5933 = shalt.err (!%p5930_p7)
}
  0x12   :  { %s6053_s19 = smov 384   ;;  %s6054_s20 = smov 24  }
  0x13   :  { %43 = dma.hbm_to_vmem [thread:$0]  %s7163_s2, 6144, %s38_s10, [#allocation7], %s6053_s19, %s6053_s19, %s6054_s20  }
  0x14   :  { %s6055_s23 = smov [#allocation9]   ;;  %s5934_s27 = scalar_lea.hbm %s7166_s5, 12288 }
  0x15   :  { %s63_s24 = sshll.u32 %s6055_s23, 4  ;;  %p5935_p8 = scmp.ne.s32.totalorder %s7166_s5, %s5934_s27  ;;  %s64_s24 = int_to_ptr.vmem [resolvable:$true] %s63_s24 }
  0x16   :  { %p5938_p9 = scmp.lt.u32.totalorder %s5934_s27, %s7166_s5 }
  0x18   :  { %p5940_p10 = pnand %p5938_p9, %p5935_p8 }
  0x1a   :  { %5943 = shalt.err (!%p5940_p10)
}
  0x1b   :  { %s5944_s12 = scalar_lea.vmem %s64_s24, 12288  ;;  %p5949_p12 = scmp.lt.s32.totalorder %s64_s24, %s64_s24 }
  0x1c   :  { %p5945_p11 = scmp.ne.s32.totalorder %s64_s24, %s5944_s12  ;;  %p5950_p13 = scmp.lt.s32.totalorder %s5944_s12, %s5944_s12 }
  0x1e   :  { %p5951_p0 = por %p5950_p13, %p5949_p12 }
  0x20   :  { %p5952_p1 = pnand %p5951_p0, %p5945_p11 }
  0x22   :  { %5955 = shalt.err (!%p5952_p1)
}
  0x23   :  { %s6056_s2 = smov 256   ;;  %s6057_s10 = smov 16  }
  0x24   :  { %69 = dma.hbm_to_vmem [thread:$0]  %s7166_s5, 12288, %s64_s24, [#allocation10], %s6056_s2, %s6056_s2, %s6057_s10  }
  0x25   :  { %s6058_s15 = smov [#allocation3]   ;;  %s5956_s21 = scalar_lea.hbm %s7162_s1, 2048 }
  0x26   :  { %s25_s16 = sshll.u32 %s6058_s15, 4  ;;  %p5957_p2 = scmp.ne.s32.totalorder %s7162_s1, %s5956_s21  ;;  %s26_s16 = int_to_ptr.vmem [resolvable:$true] %s25_s16 }
  0x27   :  { %p5960_p3 = scmp.lt.u32.totalorder %s5956_s21, %s7162_s1 }
  0x29   :  { %p5962_p4 = pnand %p5960_p3, %p5957_p2 }
  0x2b   :  { %5965 = shalt.err (!%p5962_p4)
}
  0x2c   :  { %s5966_s27 = scalar_lea.vmem %s26_s16, 2048  ;;  %p5971_p6 = scmp.lt.s32.totalorder %s26_s16, %s26_s16 }
  0x2d   :  { %p5967_p5 = scmp.ne.s32.totalorder %s26_s16, %s5966_s27  ;;  %p5972_p7 = scmp.lt.s32.totalorder %s5966_s27, %s5966_s27 }
  0x2f   :  { %p5973_p8 = por %p5972_p7, %p5971_p6 }
  0x31   :  { %p5974_p9 = pnand %p5973_p8, %p5967_p5 }
  0x33   :  { %5977 = shalt.err (!%p5974_p9)
}
  0x34   :  { %s6059_s5 = smov 128   ;;  %s6060_s24 = smov 8  }
  0x35   :  { %31 = dma.hbm_to_vmem [thread:$0]  %s7162_s1, 2048, %s26_s16, [#allocation4], %s6059_s5, %s6059_s5, %s6060_s24  }
  0x36   :  { %s6061_s30 = smov [#allocation8]   ;;  %s6062_s12 = smov [#allocation11]  }
  0x37   :  { %s49_s11 = sshll.u32 %s6061_s30, 4  ;;  %s77_s2 = sshll.u32 %s6062_s12, 4  ;;  %s50_s11 = int_to_ptr.vmem [resolvable:$true] %s49_s11  ;;  %s78_s2 = int_to_ptr.vmem [resolvable:$true] %s77_s2 }
  0x38   :  { %s5978_s14 = scalar_lea.hbm %s7164_s3, 18432 }
  0x39   :  { %p5979_p10 = scmp.ne.s32.totalorder %s7164_s3, %s5978_s14  ;;  %p5982_p11 = scmp.lt.u32.totalorder %s5978_s14, %s7164_s3 }
  0x3b   :  { %p5984_p12 = pnand %p5982_p11, %p5979_p10 }
  0x3d   :  { %5987 = shalt.err (!%p5984_p12)
}
  0x3e   :  { %s5988_s1 = scalar_lea.vmem %s50_s11, 18432  ;;  %p5993_p0 = scmp.lt.s32.totalorder %s50_s11, %s50_s11 }
  0x3f   :  { %p5989_p13 = scmp.ne.s32.totalorder %s50_s11, %s5988_s1  ;;  %p5994_p1 = scmp.lt.s32.totalorder %s5988_s1, %s5988_s1 }
  0x41   :  { %p5995_p2 = por %p5994_p1, %p5993_p0 }
  0x43   :  { %p5996_p3 = pnand %p5995_p2, %p5989_p13 }
  0x45   :  { %5999 = shalt.err (!%p5996_p3)
}
  0x46   :  { %55 = dma.hbm_to_vmem [thread:$0]  %s7164_s3, 18432, %s50_s11, [#allocation7], %s6053_s19, %s6053_s19, %s6054_s20  }
  0x47   :  { %s6000_s26 = scalar_lea.hbm %s7168_s7, 4096 }
  0x48   :  { %p6001_p4 = scmp.ne.s32.totalorder %s7168_s7, %s6000_s26  ;;  %p6004_p5 = scmp.lt.u32.totalorder %s6000_s26, %s7168_s7 }
  0x4a   :  { %p6006_p6 = pnand %p6004_p5, %p6001_p4 }
  0x4c   :  { %6009 = shalt.err (!%p6006_p6)
}
  0x4d   :  { %s6010_s12 = scalar_lea.vmem %s78_s2, 4096  ;;  %p6015_p8 = scmp.lt.s32.totalorder %s78_s2, %s78_s2 }
  0x4e   :  { %p6011_p7 = scmp.ne.s32.totalorder %s78_s2, %s6010_s12  ;;  %p6016_p9 = scmp.lt.s32.totalorder %s6010_s12, %s6010_s12 }
  0x50   :  { %p6017_p10 = por %p6016_p9, %p6015_p8 }
  0x52   :  { %p6018_p11 = pnand %p6017_p10, %p6011_p7 }
  0x54   :  { %6021 = shalt.err (!%p6018_p11)
}
  0x55   :  { %83 = dma.hbm_to_vmem [thread:$0]  %s7168_s7, 4096, %s78_s2, [#allocation10], %s6059_s5, %s6059_s5, %s6060_s24  }
  0x56   :  { %6044 = dma.done.wait [#allocation4], 2048  }
  0x57   :  { %6045 = vsyncadd [#allocation4], 4294965248 }
  0x58   :  { %6046 = dma.done.wait [#allocation7], 24576  }
  0x59   :  { %6047 = vsyncadd [#allocation7], 4294942720 }
  0x5a   :  { %6048 = dma.done.wait [#allocation10], 16384  }
  0x5b   :  { %6049 = vsyncadd [#allocation10], 4294950912  ;;  %v6063_v0 = vmov 0   ;;  %v105_v1 = vld [vmem:[%s7161_s0 + $0x10] sm:$0xff]  ;;  %v103_v2 = vld [vmem:[%s7161_s0] sm:$0xff]  ;;  %v7172_v33 = vmov 0.0  }
  0x5c   :  { %5863 = vset.pattern.permute.xlu1 %v6063_v0  ;;  %5862 = vset.pattern.permute.xlu0 %v6063_v0  ;;  %v106_v3 = vld [vmem:[%s7161_s0 + $0x18] sm:$0xff]  ;;  %v104_v4 = vld [vmem:[%s7161_s0 + $0x8] sm:$0xff]  ;;  %v159_v5 = vld [vmem:[#allocation3] sm:$0xff]  ;;  %vm6067_vm8 = vmmov 0  }
  0x5d   :  { %118 = vperm.xlu1 %5863, %v105_v1   ;;  %112 = vperm.xlu0 %5862, %v103_v2   ;;  %v160_v6 = vld [vmem:[#allocation3 + $0x8] sm:$0xff]  ;;  %v161_v7 = vld [vmem:[#allocation3 + $0x10] sm:$0xff]  ;;  %v162_v8 = vld [vmem:[#allocation3 + $0x18] sm:$0xff] }
  0x5e   :  { %v4353_v9 = vpack.c.bf16 %v160_v6, %v159_v5  ;;  %v4357_v10 = vpack.c.bf16 %v162_v8, %v161_v7  ;;  %v163_v11 = vld [vmem:[#allocation3 + $0x20] sm:$0xff]  ;;  %v164_v12 = vld [vmem:[#allocation3 + $0x28] sm:$0xff]  ;;  %v108_v13 = vld [vmem:[%s7161_s0 + $0x28] sm:$0xff]  ;;  %801 = vmatprep.mubr.f32.mxu1 %v7172_v33 }
  0x5f   :  { %v107_v14 = vld [vmem:[%s7161_s0 + $0x20] sm:$0xff]  ;;  %v4361_v15 = vpack.c.bf16 %v164_v12, %v163_v11  ;;  %v166_v17 = vld [vmem:[#allocation3 + $0x38] sm:$0xff]  ;;  %v110_v18 = vld [vmem:[%s7161_s0 + $0x38] sm:$0xff] }
  0x60   :  { %4354 = vmatprep.subr.bf16.mxu0 %v4353_v9  ;;  %v165_v16 = vld [vmem:[#allocation3 + $0x30] sm:$0xff]  ;;  %v109_v19 = vld [vmem:[%s7161_s0 + $0x30] sm:$0xff]  ;;  %v168_v22 = vld [vmem:[#allocation3 + $0x48] sm:$0xff] }
  0x61   :  { %121 = vperm.xlu1 %5863, %v106_v3   ;;  %115 = vperm.xlu0 %5862, %v104_v4   ;;  %v4365_v20 = vpack.c.bf16 %v166_v17, %v165_v16  ;;  %v167_v21 = vld [vmem:[#allocation3 + $0x40] sm:$0xff]  ;;  %v169_v24 = vld [vmem:[#allocation3 + $0x50] sm:$0xff]  ;;  %v170_v25 = vld [vmem:[#allocation3 + $0x58] sm:$0xff] }
  0x62   :  { %4356 = vmatpush3.bf16.msra.mxu0 %v4353_v9  ;;  %v4369_v23 = vpack.c.bf16 %v168_v22, %v167_v21  ;;  %v588_v26 = vld [vmem:[#allocation8 + $0x8] sm:$0xff]  ;;  %v591_v27 = vld [vmem:[#allocation8 + $0x20] sm:$0xff]  ;;  %v590_v30 = vld [vmem:[#allocation8 + $0x18] sm:$0xff]  ;;  %v4373_v34 = vpack.c.bf16 %v170_v25, %v169_v24 }
  0x63   :  { %4358 = vmatprep.subr.bf16.mxu0 %v4357_v10  ;;  %v587_v28 = vld [vmem:[#allocation8] sm:$0xff]  ;;  %v6215_v29 = vpack.c.bf16 %v591_v27, %v588_v26  ;;  %v594_v31 = vld [vmem:[#allocation8 + $0x38] sm:$0xff]  ;;  %v597_v32 = vld [vmem:[#allocation8 + $0x50] sm:$0xff] }
  0x64   :  { %v6218_v35 = vpack.c.bf16 %v590_v30, %v587_v28  ;;  %v6220_v36 = vpack.c.bf16 %v597_v32, %v594_v31  ;;  %v593_v37 = vld [vmem:[#allocation8 + $0x30] sm:$0xff]  ;;  %v596_v38 = vld [vmem:[#allocation8 + $0x48] sm:$0xff]  ;;  %v171_v40 = vld [vmem:[#allocation3 + $0x60] sm:$0xff] }
  0x65   :  { %127 = vperm.xlu1 %5863, %v108_v13   ;;  %124 = vperm.xlu0 %5862, %v107_v14   ;;  %v600_v39 = vld [vmem:[#allocation8 + $0x68] sm:$0xff]  ;;  %v603_v42 = vld [vmem:[#allocation8 + $0x80] sm:$0xff]  ;;  %v6224_v43 = vpack.c.bf16 %v596_v38, %v593_v37  ;;  %v602_v46 = vld [vmem:[#allocation8 + $0x78] sm:$0xff] }
  0x66   :  { %4360 = vmatpush3.bf16.msra.mxu0 %v4357_v10  ;;  %v172_v41 = vld [vmem:[#allocation3 + $0x68] sm:$0xff]  ;;  %4450 = vmatprep.subr.bf16.mxu1 %v6215_v29  ;;  %v6227_v44 = vpack.c.bf16 %v603_v42, %v600_v39  ;;  %v599_v45 = vld [vmem:[#allocation8 + $0x60] sm:$0xff]  ;;  %v606_v48 = vld [vmem:[#allocation8 + $0x98] sm:$0xff] }
  0x67   :  { %4362 = vmatprep.subr.bf16.mxu0 %v4361_v15  ;;  %4452 = vmatpush1.bf16.msra.mxu1 %v6218_v35  ;;  %v4377_v47 = vpack.c.bf16 %v172_v41, %v171_v40  ;;  %v609_v49 = vld [vmem:[#allocation8 + $0xb0] sm:$0xff]  ;;  %v174_v51 = vld [vmem:[#allocation3 + $0x78] sm:$0xff]  ;;  %v6230_v52 = vpack.c.bf16 %v602_v46, %v599_v45  ;;  %v608_v55 = vld [vmem:[#allocation8 + $0xa8] sm:$0xff] }
  0x68   :  { %4454 = vmatprep.subr.bf16.mxu1 %v6220_v36  ;;  %v173_v50 = vld [vmem:[#allocation3 + $0x70] sm:$0xff]  ;;  %v6233_v53 = vpack.c.bf16 %v609_v49, %v606_v48  ;;  %v612_v57 = vld [vmem:[#allocation8 + $0xc8] sm:$0xff]  ;;  %v615_v58 = vld [vmem:[#allocation8 + $0xe0] sm:$0xff] }
  0x69   :  { %133 = vperm.xlu1 %5863, %v110_v18   ;;  %130 = vperm.xlu0 %5862, %v109_v19   ;;  %v605_v54 = vld [vmem:[#allocation8 + $0x90] sm:$0xff]  ;;  %v4381_v56 = vpack.c.bf16 %v174_v51, %v173_v50  ;;  %v6239_v60 = vpack.c.bf16 %v615_v58, %v612_v57  ;;  %v611_v61 = vld [vmem:[#allocation8 + $0xc0] sm:$0xff]  ;;  %v614_v62 = vld [vmem:[#allocation8 + $0xd8] sm:$0xff] }
  0x6a   :  { %4364 = vmatpush3.bf16.msra.mxu0 %v4361_v15  ;;  %v6236_v59 = vpack.c.bf16 %v608_v55, %v605_v54  ;;  %v618_v63 = vld [vmem:[#allocation8 + $0xf8] sm:$0xff]  ;;  %v621_v0 = vld [vmem:[#allocation8 + $0x110] sm:$0xff]  ;;  %v6242_v1 = vpack.c.bf16 %v614_v62, %v611_v61  ;;  %v620_v4 = vld [vmem:[#allocation8 + $0x108] sm:$0xff] }
  0x6b   :  { %4366 = vmatprep.subr.bf16.mxu0 %v4365_v20  ;;  %4456 = vmatpush1.bf16.msra.mxu1 %v6224_v43  ;;  %v6245_v2 = vpack.c.bf16 %v621_v0, %v618_v63  ;;  %v617_v3 = vld [vmem:[#allocation8 + $0xf0] sm:$0xff]  ;;  %v624_v5 = vld [vmem:[#allocation8 + $0x128] sm:$0xff]  ;;  %v627_v6 = vld [vmem:[#allocation8 + $0x140] sm:$0xff] }
  0x6c   :  { %4458 = vmatprep.subr.bf16.mxu1 %v6227_v44  ;;  %v6248_v7 = vpack.c.bf16 %v620_v4, %v617_v3  ;;  %v281_v8 = vld [vmem:[#allocation6 + $0x8] sm:$0xff]  ;;  %v6251_v9 = vpack.c.bf16 %v627_v6, %v624_v5  ;;  %v623_v10 = vld [vmem:[#allocation8 + $0x120] sm:$0xff]  ;;  %v626_v11 = vld [vmem:[#allocation8 + $0x138] sm:$0xff] }
  0x6d   :  { %v284_v12 = vld [vmem:[#allocation6 + $0x20] sm:$0xff]  ;;  %v630_v13 = vld [vmem:[#allocation8 + $0x158] sm:$0xff]  ;;  %v633_v14 = vld [vmem:[#allocation8 + $0x170] sm:$0xff]  ;;  %v6254_v16 = vpack.c.bf16 %v626_v11, %v623_v10 }
  0x6e   :  { %4368 = vmatpush3.bf16.msra.mxu0 %v4365_v20  ;;  %7242 = vst [vmem:[#allocation17_spill] sm:$0xff] %v6248_v7  ;;  %7243 = vst [vmem:[#allocation18_spill] sm:$0xff] %v6251_v9  ;;  %v4385_v15 = vpack.c.bf16 %v284_v12, %v281_v8  ;;  %v6257_v17 = vpack.c.bf16 %v633_v14, %v630_v13  ;;  %v629_v18 = vld [vmem:[#allocation8 + $0x150] sm:$0xff]  ;;  %v632_v19 = vld [vmem:[#allocation8 + $0x168] sm:$0xff] }
  0x6f   :  { %4370 = vmatprep.subr.bf16.mxu0 %v4369_v23  ;;  %4460 = vmatpush1.bf16.msra.mxu1 %v6230_v52  ;;  %7244 = vst [vmem:[#allocation19_spill] sm:$0xff] %v6254_v16  ;;  %v636_v20 = vld [vmem:[#allocation8 + $0x188] sm:$0xff]  ;;  %v639_v21 = vld [vmem:[#allocation8 + $0x1a0] sm:$0xff]  ;;  %v6260_v22 = vpack.c.bf16 %v632_v19, %v629_v18  ;;  %v638_v25 = vld [vmem:[#allocation8 + $0x198] sm:$0xff] }
  0x70   :  { %4462 = vmatprep.subr.bf16.mxu1 %v6233_v53  ;;  %7245 = vst [vmem:[#allocation20_spill] sm:$0xff] %v6257_v17  ;;  %v635_v24 = vld [vmem:[#allocation8 + $0x180] sm:$0xff]  ;;  %v642_v26 = vld [vmem:[#allocation8 + $0x1b8] sm:$0xff]  ;;  %v645_v27 = vld [vmem:[#allocation8 + $0x1d0] sm:$0xff] }
  0x71   :  { %7246 = vst [vmem:[#allocation21_spill] sm:$0xff] %v6260_v22  ;;  %v6266_v28 = vpack.c.bf16 %v638_v25, %v635_v24  ;;  %v6269_v30 = vpack.c.bf16 %v645_v27, %v642_v26  ;;  %v641_v31 = vld [vmem:[#allocation8 + $0x1b0] sm:$0xff]  ;;  %v644_v32 = vld [vmem:[#allocation8 + $0x1c8] sm:$0xff]  ;;  %v651_v37 = vld [vmem:[#allocation8 + $0x200] sm:$0xff] }
  0x72   :  { %4372 = vmatpush3.bf16.msra.mxu0 %v4369_v23  ;;  %v6263_v23 = vpack.c.bf16 %v639_v21, %v636_v20  ;;  %v6272_v38 = vpack.c.bf16 %v644_v32, %v641_v31  ;;  %v647_v40 = vld [vmem:[#allocation8 + $0x1e0] sm:$0xff]  ;;  %v650_v41 = vld [vmem:[#allocation8 + $0x1f8] sm:$0xff]  ;;  %v657_v45 = vld [vmem:[#allocation8 + $0x230] sm:$0xff] }
  0x73   :  { %4374 = vmatprep.subr.bf16.mxu0 %v4373_v34  ;;  %4464 = vmatpush1.bf16.msra.mxu1 %v6236_v59  ;;  %7248 = vst [vmem:[#allocation23_spill] sm:$0xff] %v6266_v28  ;;  %7249 = vst [vmem:[#allocation24_spill] sm:$0xff] %v6269_v30  ;;  %v654_v42 = vld [vmem:[#allocation8 + $0x218] sm:$0xff]  ;;  %v6278_v46 = vpack.c.bf16 %v650_v41, %v647_v40  ;;  %v653_v48 = vld [vmem:[#allocation8 + $0x210] sm:$0xff] }
  0x74   :  { %4466 = vmatprep.subr.bf16.mxu1 %v6239_v60  ;;  %7247 = vst [vmem:[#allocation22_spill] sm:$0xff] %v6263_v23  ;;  %7250 = vst [vmem:[#allocation25_spill] sm:$0xff] %v6272_v38  ;;  %v656_v49 = vld [vmem:[#allocation8 + $0x228] sm:$0xff]  ;;  %v663_v51 = vld [vmem:[#allocation8 + $0x260] sm:$0xff] }
  0x75   :  { %7252 = vst [vmem:[#allocation27_spill] sm:$0xff] %v6278_v46  ;;  %v660_v50 = vld [vmem:[#allocation8 + $0x248] sm:$0xff]  ;;  %v6284_v54 = vpack.c.bf16 %v656_v49, %v653_v48  ;;  %v662_v57 = vld [vmem:[#allocation8 + $0x258] sm:$0xff]  ;;  %v669_v61 = vld [vmem:[#allocation8 + $0x290] sm:$0xff] }
  0x76   :  { %4376 = vmatpush3.bf16.msra.mxu0 %v4373_v34  ;;  %v648_v34 = vld [vmem:[#allocation8 + $0x1e8] sm:$0xff]  ;;  %v6287_v55 = vpack.c.bf16 %v663_v51, %v660_v50  ;;  %v666_v58 = vld [vmem:[#allocation8 + $0x278] sm:$0xff]  ;;  %v665_v0 = vld [vmem:[#allocation8 + $0x270] sm:$0xff] }
  0x77   :  { %4378 = vmatprep.subr.bf16.mxu0 %v4377_v47  ;;  %4468 = vmatpush1.bf16.msra.mxu1 %v6242_v1  ;;  %v6275_v39 = vpack.c.bf16 %v651_v37, %v648_v34  ;;  %7254 = vst [vmem:[#allocation29_spill] sm:$0xff] %v6284_v54  ;;  %v6293_v63 = vpack.c.bf16 %v669_v61, %v666_v58  ;;  %v668_v3 = vld [vmem:[#allocation8 + $0x288] sm:$0xff]  ;;  %v675_v5 = vld [vmem:[#allocation8 + $0x2c0] sm:$0xff]  ;;  %v674_v11 = vld [vmem:[#allocation8 + $0x2b8] sm:$0xff] }
  0x78   :  { %4470 = vmatprep.subr.bf16.mxu1 %v6245_v2  ;;  %7255 = vst [vmem:[#allocation30_spill] sm:$0xff] %v6287_v55  ;;  %v672_v4 = vld [vmem:[#allocation8 + $0x2a8] sm:$0xff]  ;;  %v6296_v6 = vpack.c.bf16 %v668_v3, %v665_v0  ;;  %v671_v10 = vld [vmem:[#allocation8 + $0x2a0] sm:$0xff]  ;;  %v678_v12 = vld [vmem:[#allocation8 + $0x2d8] sm:$0xff] }
  0x79   :  { %7251 = vst [vmem:[#allocation26_spill] sm:$0xff] %v6275_v39  ;;  %7257 = vst [vmem:[#allocation32_spill] sm:$0xff] %v6293_v63  ;;  %v6299_v8 = vpack.c.bf16 %v675_v5, %v672_v4  ;;  %v681_v13 = vld [vmem:[#allocation8 + $0x2f0] sm:$0xff]  ;;  %v6302_v14 = vpack.c.bf16 %v674_v11, %v671_v10  ;;  %v680_v19 = vld [vmem:[#allocation8 + $0x2e8] sm:$0xff] }
  0x7a   :  { %4380 = vmatpush3.bf16.msra.mxu0 %v4377_v47  ;;  %v6281_v47 = vpack.c.bf16 %v657_v45, %v654_v42  ;;  %7258 = vst [vmem:[#allocation33_spill] sm:$0xff] %v6296_v6  ;;  %v677_v18 = vld [vmem:[#allocation8 + $0x2d0] sm:$0xff]  ;;  %v684_v20 = vld [vmem:[#allocation8 + $0x308] sm:$0xff]  ;;  %v687_v21 = vld [vmem:[#allocation8 + $0x320] sm:$0xff] }
  0x7b   :  { %4382 = vmatprep.subr.bf16.mxu0 %v4381_v56  ;;  %4472 = vmatpush1.bf16.msra.mxu1 %v6248_v7  ;;  %7259 = vst [vmem:[#allocation34_spill] sm:$0xff] %v6299_v8  ;;  %7260 = vst [vmem:[#allocation35_spill] sm:$0xff] %v6302_v14  ;;  %v6308_v24 = vpack.c.bf16 %v680_v19, %v677_v18  ;;  %v6311_v25 = vpack.c.bf16 %v687_v21, %v684_v20  ;;  %v683_v26 = vld [vmem:[#allocation8 + $0x300] sm:$0xff]  ;;  %v686_v27 = vld [vmem:[#allocation8 + $0x318] sm:$0xff] }
  0x7c   :  { %4474 = vmatprep.subr.bf16.mxu1 %v6251_v9  ;;  %7253 = vst [vmem:[#allocation28_spill] sm:$0xff] %v6281_v47  ;;  %v690_v31 = vld [vmem:[#allocation8 + $0x338] sm:$0xff]  ;;  %v693_v32 = vld [vmem:[#allocation8 + $0x350] sm:$0xff]  ;;  %v6314_v34 = vpack.c.bf16 %v686_v27, %v683_v26  ;;  %v692_v41 = vld [vmem:[#allocation8 + $0x348] sm:$0xff] }
  0x7d   :  { %7262 = vst [vmem:[#allocation37_spill] sm:$0xff] %v6308_v24  ;;  %7263 = vst [vmem:[#allocation38_spill] sm:$0xff] %v6311_v25  ;;  %v6317_v37 = vpack.c.bf16 %v693_v32, %v690_v31  ;;  %v689_v40 = vld [vmem:[#allocation8 + $0x330] sm:$0xff]  ;;  %v696_v42 = vld [vmem:[#allocation8 + $0x368] sm:$0xff] }
  0x7e   :  { %4384 = vmatpush3.bf16.msra.mxu0 %v4381_v56  ;;  %v659_v56 = vld [vmem:[#allocation8 + $0x240] sm:$0xff]  ;;  %v6321_v48 = vpack.c.bf16 %v692_v41, %v689_v40  ;;  %v698_v51 = vld [vmem:[#allocation8 + $0x378] sm:$0xff]  ;;  %v701_v0 = vld [vmem:[#allocation8 + $0x390] sm:$0xff] }
  0x7f   :  { %4386 = vmatprep.subr.bf16.mxu0 %v4385_v15  ;;  %4476 = vmatpush1.bf16.msra.mxu1 %v6254_v16  ;;  %v6290_v62 = vpack.c.bf16 %v662_v57, %v659_v56  ;;  %v6305_v15 = vpack.c.bf16 %v681_v13, %v678_v12  ;;  %v699_v45 = vld [vmem:[#allocation8 + $0x380] sm:$0xff]  ;;  %v702_v56 = vld [vmem:[#allocation8 + $0x398] sm:$0xff]  ;;  %v705_v57 = vld [vmem:[#allocation8 + $0x3b0] sm:$0xff] }
  0x80   :  { %4478 = vmatprep.subr.bf16.mxu1 %v6257_v17  ;;  %v6325_v49 = vpack.c.bf16 %v699_v45, %v696_v42  ;;  %v695_v50 = vld [vmem:[#allocation8 + $0x360] sm:$0xff]  ;;  %v6331_v61 = vpack.c.bf16 %v705_v57, %v702_v56  ;;  %v704_v3 = vld [vmem:[#allocation8 + $0x3a8] sm:$0xff]  ;;  %v710_v13 = vld [vmem:[#allocation8 + $0x3d8] sm:$0xff] }
  0x81   :  { %7256 = vst [vmem:[#allocation31_spill] sm:$0xff] %v6290_v62  ;;  %7261 = vst [vmem:[#allocation36_spill] sm:$0xff] %v6305_v15  ;;  %v6328_v58 = vpack.c.bf16 %v698_v51, %v695_v50  ;;  %v708_v4 = vld [vmem:[#allocation8 + $0x3c8] sm:$0xff]  ;;  %v711_v5 = vld [vmem:[#allocation8 + $0x3e0] sm:$0xff]  ;;  %v6334_v10 = vpack.c.bf16 %v704_v3, %v701_v0  ;;  %v7171_v51 = vlaneseq }
  0x82   :  { %v6337_v11 = vpack.c.bf16 %v711_v5, %v708_v4  ;;  %v707_v12 = vld [vmem:[#allocation8 + $0x3c0] sm:$0xff]  ;;  %v714_v18 = vld [vmem:[#allocation8 + $0x3f8] sm:$0xff]  ;;  %v717_v19 = vld [vmem:[#allocation8 + $0x410] sm:$0xff] }
  0x83   :  { %4480 = vmatpush1.bf16.msra.mxu1 %v6260_v22  ;;  %v6340_v20 = vpack.c.bf16 %v710_v13, %v707_v12  ;;  %v6343_v21 = vpack.c.bf16 %v717_v19, %v714_v18  ;;  %v713_v26 = vld [vmem:[#allocation8 + $0x3f0] sm:$0xff]  ;;  %v716_v27 = vld [vmem:[#allocation8 + $0x408] sm:$0xff]  ;;  %v723_v32 = vld [vmem:[#allocation8 + $0x440] sm:$0xff]  ;;  %v102_v56 = vand.u32 127, %v7171_v51  ;;  %v6065_v13 = vmov 1.0  }
  0x84   :  { %4482 = vmatprep.subr.bf16.mxu1 %v6263_v23  ;;  %v720_v31 = vld [vmem:[#allocation8 + $0x428] sm:$0xff]  ;;  %v6346_v40 = vpack.c.bf16 %v716_v27, %v713_v26  ;;  %v719_v42 = vld [vmem:[#allocation8 + $0x420] sm:$0xff]  ;;  %v722_v45 = vld [vmem:[#allocation8 + $0x438] sm:$0xff] }
  0x85   :  { %7264 = vst [vmem:[#allocation39_spill] sm:$0xff] %v6343_v21  ;;  %v6349_v41 = vpack.c.bf16 %v723_v32, %v720_v31  ;;  %v6352_v50 = vpack.c.bf16 %v722_v45, %v719_v42  ;;  %v280_v3 = vld [vmem:[#allocation6] sm:$0xff]  ;;  %v283_v4 = vld [vmem:[#allocation6 + $0x18] sm:$0xff]  ;;  %v290_v12 = vld [vmem:[#allocation6 + $0x50] sm:$0xff] }
  0x86   :  { %7265 = vst [vmem:[#allocation40_spill] sm:$0xff] %v6346_v40  ;;  %v287_v5 = vld [vmem:[#allocation6 + $0x38] sm:$0xff]  ;;  %v4387_v18 = vpack.c.bf16 %v283_v4, %v280_v3  ;;  %v286_v31 = vld [vmem:[#allocation6 + $0x30] sm:$0xff]  ;;  %v289_v32 = vld [vmem:[#allocation6 + $0x48] sm:$0xff] }
  0x87   :  { %4484 = vmatpush1.bf16.msra.mxu1 %v6266_v28  ;;  %7266 = vst [vmem:[#allocation41_spill] sm:$0xff] %v6349_v41  ;;  %7267 = vst [vmem:[#allocation42_spill] sm:$0xff] %v6352_v50  ;;  %v4389_v27 = vpack.c.bf16 %v290_v12, %v287_v5  ;;  %v293_v42 = vld [vmem:[#allocation6 + $0x68] sm:$0xff]  ;;  %v296_v45 = vld [vmem:[#allocation6 + $0x80] sm:$0xff]  ;;  %v4391_v51 = vpack.c.bf16 %v289_v32, %v286_v31 }
  0x88   :  { %4486 = vmatprep.subr.bf16.mxu1 %v6269_v30  ;;  %v295_v3 = vld [vmem:[#allocation6 + $0x78] sm:$0xff]  ;;  %v302_v4 = vld [vmem:[#allocation6 + $0xb0] sm:$0xff]  ;;  %v308_v31 = vld [vmem:[#allocation6 + $0xe0] sm:$0xff] }
  0x8b   :  { %4488 = vmatpush1.bf16.msra.mxu1 %v6272_v38 }
  0x8c   :  { %4490 = vmatprep.subr.bf16.mxu1 %v6275_v39 }
  0x8f   :  { %4492 = vmatpush1.bf16.msra.mxu1 %v6278_v46 }
  0x90   :  { %4494 = vmatprep.subr.bf16.mxu1 %v6281_v47 }
  0x93   :  { %4496 = vmatpush1.bf16.msra.mxu1 %v6284_v54 }
  0x94   :  { %4498 = vmatprep.subr.bf16.mxu1 %v6287_v55 }
  0x97   :  { %4500 = vmatpush1.bf16.msra.mxu1 %v6290_v62 }
  0x98   :  { %4502 = vmatprep.subr.bf16.mxu1 %v6293_v63 }
  0x9b   :  { %4504 = vmatpush1.bf16.msra.mxu1 %v6296_v6 }
  0x9c   :  { %4506 = vmatprep.subr.bf16.mxu1 %v6299_v8 }
  0x9f   :  { %4508 = vmatpush1.bf16.msra.mxu1 %v6302_v14 }
  0xa0   :  { %4510 = vmatprep.subr.bf16.mxu1 %v6305_v15 }
  0xa3   :  { %4512 = vmatpush1.bf16.msra.mxu1 %v6308_v24 }
  0xa4   :  { %4514 = vmatprep.subr.bf16.mxu1 %v6311_v25 }
  0xa6   :  { %802 = vmatmul.mubr.f32.vlgmr.msra.gmra.mrb[0].mxu1 %v7172_v33 }
  0xa7   :  { %4516 = vmatpush1.bf16.msra.mxu1 %v6314_v34  ;;  %872 = vmatprep.mubr.f32.mxu1 %v7172_v33 }
  0xa8   :  { %4518 = vmatprep.subr.bf16.mxu1 %v6317_v37 }
  0xab   :  { %4520 = vmatpush1.bf16.msra.mxu1 %v6321_v48 }
  0xac   :  { %4522 = vmatprep.subr.bf16.mxu1 %v6325_v49 }
  0xaf   :  { %4524 = vmatpush1.bf16.msra.mxu1 %v6328_v58 }
  0xb0   :  { %4526 = vmatprep.subr.bf16.mxu1 %v6331_v61 }
  0xb3   :  { %4528 = vmatpush1.bf16.msra.mxu1 %v6334_v10 }
  0xb4   :  { %4530 = vmatprep.subr.bf16.mxu1 %v6337_v11 }
  0xb7   :  { %4532 = vmatpush1.bf16.msra.mxu1 %v6340_v20 }
  0xb8   :  { %4534 = vmatprep.subr.bf16.mxu1 %v6343_v21  ;;  %v320_v21 = vld [vmem:[#allocation6 + $0x140] sm:$0xff] }
  0xbb   :  { %4536 = vmatpush1.bf16.msra.mxu1 %v6346_v40  ;;  %v301_v40 = vld [vmem:[#allocation6 + $0xa8] sm:$0xff] }
  0xbc   :  { %4538 = vmatprep.subr.bf16.mxu1 %v6349_v41  ;;  %v292_v41 = vld [vmem:[#allocation6 + $0x60] sm:$0xff] }
  0xbd   :  { %v4395_v5 = vpack.c.bf16 %v295_v3, %v292_v41  ;;  %v311_v41 = vld [vmem:[#allocation6 + $0xf8] sm:$0xff]  ;;  %v7268_v3 = vmov 0.0  }
  0xbf   :  { %4540 = vmatpush1.bf16.msra.mxu1 %v6352_v50  ;;  %v4393_v50 = vpack.c.bf16 %v296_v45, %v293_v42  ;;  %v304_v42 = vld [vmem:[#allocation6 + $0xc0] sm:$0xff]  ;;  %v307_v45 = vld [vmem:[#allocation6 + $0xd8] sm:$0xff] }
  0xdc   :  { %v119_v57 = vpop.permute.xlu1 %118  ;;  %v113_v0 = vpop.permute.xlu0 %112 }
  0xdd   :  { %vm135_vm0 = vcmp.eq.s32.totalorder %v113_v0, %v102_v56  ;;  %vm137_vm1 = vcmp.eq.s32.totalorder %v119_v57, %v102_v56  ;;  %v299_v57 = vld [vmem:[#allocation6 + $0x98] sm:$0xff] }
  0xde   :  { %4017 = vmatprep.mubr.msk.f32.mxu0 %vm135_vm0, %v6065_v13 }
  0xe0   :  { %v122_v19 = vpop.permute.xlu1 %121  ;;  %v116_v26 = vpop.permute.xlu0 %115 }
  0xe1   :  { %vm136_vm2 = vcmp.eq.s32.totalorder %v116_v26, %v102_v56  ;;  %vm138_vm3 = vcmp.eq.s32.totalorder %v122_v19, %v102_v56  ;;  %v4397_v26 = vpack.c.bf16 %v302_v4, %v299_v57  ;;  %v298_v19 = vld [vmem:[#allocation6 + $0x90] sm:$0xff]  ;;  %v313_v4 = vld [vmem:[#allocation6 + $0x108] sm:$0xff] }
  0xe2   :  { %4018 = vmatmul.mubr.msk.f32.vlgmr.msra.gmra.mrb[0].mxu0 %vm136_vm2, %v6065_v13  ;;  %v310_v57 = vld [vmem:[#allocation6 + $0xf0] sm:$0xff] }
  0xe3   :  { %4020 = vmatprep.mubr.msk.f32.mxu0 %vm137_vm1, %v6065_v13  ;;  %4388 = vmatpush1.bf16.msra.mxu0 %v4387_v18  ;;  %v305_v18 = vld [vmem:[#allocation6 + $0xc8] sm:$0xff] }
  0xe4   :  { %v128_v0 = vpop.permute.xlu1 %127  ;;  %v125_v33 = vpop.permute.xlu0 %124  ;;  %4390 = vmatprep.subr.bf16.mxu0 %v4389_v27  ;;  %v4401_v32 = vpack.c.bf16 %v308_v31, %v305_v18  ;;  %v326_v18 = vld [vmem:[#allocation6 + $0x170] sm:$0xff] }
  0xe5   :  { %vm139_vm4 = vcmp.eq.s32.totalorder %v125_v33, %v102_v56  ;;  %vm140_vm5 = vcmp.eq.s32.totalorder %v128_v0, %v102_v56  ;;  %v4399_v33 = vpack.c.bf16 %v301_v40, %v298_v19  ;;  %v4407_v40 = vpack.c.bf16 %v313_v4, %v310_v57  ;;  %v319_v19 = vld [vmem:[#allocation6 + $0x138] sm:$0xff]  ;;  %v728_v57 = vld [vmem:[#allocation8 + $0x468] sm:$0xff] }
  0xe6   :  { %4021 = vmatmul.mubr.msk.f32.gmra.mrb[2].mxu0 %vm138_vm3, %v6065_v13 }
  0xe7   :  { %4023 = vmatprep.mubr.msk.f32.mxu0 %vm139_vm4, %v6065_v13  ;;  %4392 = vmatpush1.bf16.msra.mxu0 %v4391_v51  ;;  %v314_v51 = vld [vmem:[#allocation6 + $0x110] sm:$0xff] }
  0xe8   :  { %v131_v12 = vpop.permute.xlu0 %130  ;;  %4394 = vmatprep.subr.bf16.mxu0 %v4393_v50  ;;  %v134_v27 = vpop.permute.xlu1 %133  ;;  %v4403_v50 = vpack.c.bf16 %v307_v45, %v304_v42  ;;  %v4405_v0 = vpack.c.bf16 %v314_v51, %v311_v41  ;;  %v726_v42 = vld [vmem:[#allocation8 + $0x458] sm:$0xff]  ;;  %v729_v45 = vld [vmem:[#allocation8 + $0x470] sm:$0xff] }
  0xe9   :  { %vm141_vm6 = vcmp.eq.s32.totalorder %v131_v12, %v102_v56  ;;  %vm142_vm7 = vcmp.eq.s32.totalorder %v134_v27, %v102_v56  ;;  %v317_v12 = vld [vmem:[#allocation6 + $0x128] sm:$0xff]  ;;  %v323_v56 = vld [vmem:[#allocation6 + $0x158] sm:$0xff]  ;;  %v322_v27 = vld [vmem:[#allocation6 + $0x150] sm:$0xff]  ;;  %v6358_v41 = vpack.c.bf16 %v729_v45, %v726_v42 }
  0xea   :  { %4024 = vmatmul.mubr.msk.f32.gmra.mrb[4].mxu0 %vm140_vm5, %v6065_v13  ;;  %v4413_v31 = vpack.c.bf16 %v326_v18, %v323_v56  ;;  %v282_v51 = vld [vmem:[#allocation6 + $0x10] sm:$0xff]  ;;  %v297_v18 = vld [vmem:[#allocation6 + $0x88] sm:$0xff] }
  0xeb   :  { %4026 = vmatprep.mubr.msk.f32.mxu0 %vm141_vm6, %v6065_v13  ;;  %4396 = vmatpush1.bf16.msra.mxu0 %v4395_v5  ;;  %v4409_v5 = vpack.c.bf16 %v320_v21, %v317_v12  ;;  %v285_v21 = vld [vmem:[#allocation6 + $0x28] sm:$0xff]  ;;  %v288_v12 = vld [vmem:[#allocation6 + $0x40] sm:$0xff]  ;;  %v294_v56 = vld [vmem:[#allocation6 + $0x70] sm:$0xff] }
  0xec   :  { %4398 = vmatprep.subr.bf16.mxu0 %v4397_v26  ;;  %v316_v26 = vld [vmem:[#allocation6 + $0x120] sm:$0xff]  ;;  %4542 = vmatprep.subr.bf16.mxu1 %v6358_v41 }
  0xee   :  { %4027 = vmatmul.mubr.msk.f32.gmra.mrb[6].mxu0 %vm142_vm7, %v6065_v13  ;;  %v4411_v13 = vpack.c.bf16 %v319_v19, %v316_v26 }
  0xef   :  { %4400 = vmatpush1.bf16.msra.mxu0 %v4399_v33  ;;  %409 = vmatprep.mubr.f32.mxu0 %v7268_v3  ;;  %v325_v33 = vld [vmem:[#allocation6 + $0x168] sm:$0xff] }
  0xf0   :  { %4402 = vmatprep.subr.bf16.mxu0 %v4401_v32  ;;  %v4415_v32 = vpack.c.bf16 %v325_v33, %v322_v27  ;;  %v300_v33 = vld [vmem:[#allocation6 + $0xa0] sm:$0xff] }
  0xf3   :  { %4404 = vmatpush1.bf16.msra.mxu0 %v4403_v50  ;;  %v725_v50 = vld [vmem:[#allocation8 + $0x450] sm:$0xff] }
  0xf4   :  { %4406 = vmatprep.subr.bf16.mxu0 %v4405_v0  ;;  %v4417_v0 = vpack.c.bf16 %v285_v21, %v282_v51  ;;  %v6361_v4 = vpack.c.bf16 %v728_v57, %v725_v50  ;;  %v306_v21 = vld [vmem:[#allocation6 + $0xd0] sm:$0xff]  ;;  %v309_v50 = vld [vmem:[#allocation6 + $0xe8] sm:$0xff] }
  0xf5   :  { %v4433_v57 = vpack.c.bf16 %v309_v50, %v306_v21  ;;  %v327_v21 = vld [vmem:[#allocation6 + $0x178] sm:$0xff]  ;;  %v637_v50 = vld [vmem:[#allocation8 + $0x190] sm:$0xff] }
  0xf6   :  { %4544 = vmatpush1.bf16.msra.mxu1 %v6361_v4 }
  0xf7   :  { %4408 = vmatpush1.bf16.msra.mxu0 %v4407_v40  ;;  %4602 = vmatprep.subr.bf16.mxu1 %v6215_v29  ;;  %v291_v40 = vld [vmem:[#allocation6 + $0x58] sm:$0xff] }
  0xf8   :  { %4410 = vmatprep.subr.bf16.mxu0 %v4409_v5  ;;  %v4421_v26 = vpack.c.bf16 %v291_v40, %v288_v12  ;;  %v312_v40 = vld [vmem:[#allocation6 + $0x100] sm:$0xff] }
  0xf9   :  { %873 = vmatmul.mubr.f32.vlgmr.msra.gmra.mrb[0].mxu1 %v7268_v3 }
  0xfa   :  { %4604 = vmatpush1.bf16.msra.mxu1 %v6218_v35 }
  0xfb   :  { %4412 = vmatpush1.bf16.msra.mxu0 %v4411_v13  ;;  %4606 = vmatprep.subr.bf16.mxu1 %v6220_v36 }
  0xfc   :  { %4414 = vmatprep.subr.bf16.mxu0 %v4413_v31  ;;  %v4425_v31 = vpack.c.bf16 %v297_v18, %v294_v56  ;;  %v318_v18 = vld [vmem:[#allocation6 + $0x130] sm:$0xff] }
  0xfe   :  { %4608 = vmatpush1.bf16.msra.mxu1 %v6224_v43 }
  0xff   :  { %4416 = vmatpush1.bf16.msra.mxu0 %v4415_v32  ;;  %4610 = vmatprep.subr.bf16.mxu1 %v6227_v44  ;;  %v303_v32 = vld [vmem:[#allocation6 + $0xb8] sm:$0xff] }
 0x100   :  { %4418 = vmatprep.subr.bf16.mxu0 %v4417_v0  ;;  %v4429_v45 = vpack.c.bf16 %v303_v32, %v300_v33  ;;  %v321_v33 = vld [vmem:[#allocation6 + $0x148] sm:$0xff]  ;;  %v324_v32 = vld [vmem:[#allocation6 + $0x160] sm:$0xff] }
 0x102   :  { %4612 = vmatpush1.bf16.msra.mxu1 %v6230_v52 }
 0x103   :  { %4614 = vmatprep.subr.bf16.mxu1 %v6233_v53 }
 0x106   :  { %4616 = vmatpush1.bf16.msra.mxu1 %v6236_v59 }
 0x107   :  { %4618 = vmatprep.subr.bf16.mxu1 %v6239_v60 }
 0x10a   :  { %4620 = vmatpush1.bf16.msra.mxu1 %v6242_v1 }
 0x10b   :  { %4622 = vmatprep.subr.bf16.mxu1 %v6245_v2 }
 0x10e   :  { %4624 = vmatpush1.bf16.msra.mxu1 %v6248_v7 }
 0x10f   :  { %4626 = vmatprep.subr.bf16.mxu1 %v6251_v9 }
 0x112   :  { %4628 = vmatpush1.bf16.msra.mxu1 %v6254_v16 }
 0x113   :  { %4630 = vmatprep.subr.bf16.mxu1 %v6257_v17 }
 0x116   :  { %4632 = vmatpush1.bf16.msra.mxu1 %v6260_v22 }
 0x117   :  { %4634 = vmatprep.subr.bf16.mxu1 %v6263_v23 }
 0x11a   :  { %4636 = vmatpush1.bf16.msra.mxu1 %v6266_v28 }
 0x11b   :  { %4638 = vmatprep.subr.bf16.mxu1 %v6269_v30 }
 0x11e   :  { %4640 = vmatpush1.bf16.msra.mxu1 %v6272_v38 }
 0x11f   :  { %4642 = vmatprep.subr.bf16.mxu1 %v6275_v39 }
 0x122   :  { %4644 = vmatpush1.bf16.msra.mxu1 %v6278_v46 }
 0x123   :  { %4646 = vmatprep.subr.bf16.mxu1 %v6281_v47 }
 0x126   :  { %4648 = vmatpush1.bf16.msra.mxu1 %v6284_v54 }
 0x127   :  { %4650 = vmatprep.subr.bf16.mxu1 %v6287_v55 }
 0x12a   :  { %4652 = vmatpush1.bf16.msra.mxu1 %v6290_v62  ;;  %v712_v62 = vld [vmem:[#allocation8 + $0x3e8] sm:$0xff] }
 0x12b   :  { %4654 = vmatprep.subr.bf16.mxu1 %v6293_v63  ;;  %v706_v63 = vld [vmem:[#allocation8 + $0x3b8] sm:$0xff] }
 0x12e   :  { %4656 = vmatpush1.bf16.msra.mxu1 %v6296_v6  ;;  %v634_v6 = vld [vmem:[#allocation8 + $0x178] sm:$0xff] }
 0x12f   :  { %4658 = vmatprep.subr.bf16.mxu1 %v6299_v8  ;;  %v631_v8 = vld [vmem:[#allocation8 + $0x160] sm:$0xff] }
 0x132   :  { %4660 = vmatpush1.bf16.msra.mxu1 %v6302_v14  ;;  %v682_v14 = vld [vmem:[#allocation8 + $0x2f8] sm:$0xff] }
 0x133   :  { %4662 = vmatprep.subr.bf16.mxu1 %v6305_v15  ;;  %v652_v15 = vld [vmem:[#allocation8 + $0x208] sm:$0xff] }
 0x136   :  { %4664 = vmatpush1.bf16.msra.mxu1 %v6308_v24  ;;  %v649_v24 = vld [vmem:[#allocation8 + $0x1f0] sm:$0xff] }
 0x137   :  { %4666 = vmatprep.subr.bf16.mxu1 %v6311_v25  ;;  %v646_v25 = vld [vmem:[#allocation8 + $0x1d8] sm:$0xff] }
 0x1b5   :  { %v6398_v5 = vpop.f32.mrb[0].mxu0 }
 0x1b6   :  { %v241_v19 = vpop.f32.mrb[1].mxu0 }
 0x1b7   :  { %410 = vmatmul.mubr.f32.vlgmr.msra.gmra.mrb[8].mxu0 %v241_v19 }
 0x1b8   :  { %4420 = vmatpush3.bf16.msra.mxu0 %v4417_v0  ;;  %415 = vmatprep.mubr.f32.mxu0 %v7268_v3 }
 0x1b9   :  { %v6401_v13 = vpop.f32.mrb[2].mxu0  ;;  %4422 = vmatprep.subr.bf16.mxu0 %v4421_v26 }
 0x1ba   :  { %v251_v27 = vpop.f32.mrb[3].mxu0 }
 0x1bb   :  { %416 = vmatmul.mubr.f32.gmra.mrb[10].mxu0 %v6398_v5 }
 0x1bc   :  { %4424 = vmatpush3.bf16.msra.mxu0 %v4421_v26  ;;  %421 = vmatprep.mubr.f32.mxu0 %v7268_v3  ;;  %v315_v26 = vld [vmem:[#allocation6 + $0x118] sm:$0xff] }
 0x1bd   :  { %v6405_v42 = vpop.f32.mrb[4].mxu0  ;;  %4426 = vmatprep.subr.bf16.mxu0 %v4425_v31  ;;  %v4437_v56 = vpack.c.bf16 %v315_v26, %v312_v40  ;;  %v640_v40 = vld [vmem:[#allocation8 + $0x1a8] sm:$0xff]  ;;  %v589_v26 = vld [vmem:[#allocation8 + $0x10] sm:$0xff] }
 0x1be   :  { %v6407_v51 = vpop.f32.mrb[5].mxu0 }
 0x1bf   :  { %422 = vmatmul.mubr.f32.gmra.mrb[12].mxu0 %v251_v27 }
 0x1c0   :  { %4428 = vmatpush3.bf16.msra.mxu0 %v4425_v31  ;;  %427 = vmatprep.mubr.f32.mxu0 %v7268_v3  ;;  %v4441_v31 = vpack.c.bf16 %v321_v33, %v318_v18  ;;  %v592_v18 = vld [vmem:[#allocation8 + $0x28] sm:$0xff]  ;;  %v643_v33 = vld [vmem:[#allocation8 + $0x1c0] sm:$0xff] }
 0x1c1   :  { %v6410_v0 = vpop.f32.mrb[6].mxu0  ;;  %4430 = vmatprep.subr.bf16.mxu0 %v4429_v45 }
 0x1c2   :  { %v6412_v12 = vpop.f32.mrb[7].mxu0 }
 0x1c3   :  { %428 = vmatmul.mubr.f32.gmra.mrb[14].mxu0 %v6401_v13 }
 0x1c4   :  { %4432 = vmatpush3.bf16.msra.mxu0 %v4429_v45  ;;  %433 = vmatprep.mubr.f32.mxu0 %v7268_v3  ;;  %v4445_v45 = vpack.c.bf16 %v327_v21, %v324_v32  ;;  %v6428_v32 = vpack.c.bf16 %v646_v25, %v643_v33  ;;  %v598_v21 = vld [vmem:[#allocation8 + $0x58] sm:$0xff] }
 0x1c5   :  { %4434 = vmatprep.subr.bf16.mxu0 %v4433_v57  ;;  %v658_v25 = vld [vmem:[#allocation8 + $0x238] sm:$0xff] }
 0x1c6   :  { %v610_v33 = vld [vmem:[#allocation8 + $0xb8] sm:$0xff] }
 0x1c7   :  { %434 = vmatmul.mubr.f32.gmra.mrb[16].mxu0 %v6407_v51 }
 0x1c8   :  { %4436 = vmatpush3.bf16.msra.mxu0 %v4433_v57  ;;  %439 = vmatprep.mubr.f32.mxu0 %v7268_v3  ;;  %v6422_v57 = vpack.c.bf16 %v640_v40, %v637_v50  ;;  %v604_v40 = vld [vmem:[#allocation8 + $0x88] sm:$0xff] }
 0x1c9   :  { %4438 = vmatprep.subr.bf16.mxu0 %v4437_v56 }
 0x1cb   :  { %440 = vmatmul.mubr.f32.gmra.mrb[18].mxu0 %v6405_v42 }
 0x1cc   :  { %4440 = vmatpush3.bf16.msra.mxu0 %v4437_v56  ;;  %445 = vmatprep.mubr.f32.mxu0 %v7268_v3  ;;  %v6425_v56 = vpack.c.bf16 %v592_v18, %v589_v26  ;;  %v655_v26 = vld [vmem:[#allocation8 + $0x220] sm:$0xff]  ;;  %v874_v46 = vpop.f32.mrb[0].mxu1 }
 0x1cd   :  { %4442 = vmatprep.subr.bf16.mxu0 %v4441_v31  ;;  %v607_v18 = vld [vmem:[#allocation8 + $0xa0] sm:$0xff]  ;;  %v876_v39 = vpop.f32.mrb[1].mxu1 }
 0x1cf   :  { %446 = vmatmul.mubr.f32.gmra.mrb[20].mxu0 %v6412_v12 }
 0x1d0   :  { %4444 = vmatpush3.bf16.msra.mxu0 %v4441_v31  ;;  %451 = vmatprep.mubr.f32.mxu0 %v7268_v3  ;;  %v595_v31 = vld [vmem:[#allocation8 + $0x40] sm:$0xff] }
 0x1d1   :  { %4446 = vmatprep.subr.bf16.mxu0 %v4445_v45  ;;  %v6432_v50 = vpack.c.bf16 %v598_v21, %v595_v31  ;;  %v613_v31 = vld [vmem:[#allocation8 + $0xd0] sm:$0xff]  ;;  %v616_v21 = vld [vmem:[#allocation8 + $0xe8] sm:$0xff] }
 0x1d3   :  { %452 = vmatmul.mubr.f32.gmra.mrb[22].mxu0 %v6410_v0 }
 0x1d4   :  { %4448 = vmatpush3.bf16.msra.mxu0 %v4445_v45  ;;  %4061 = vmatprep.mubr.f32.mxu0 %v241_v19  ;;  %v6435_v19 = vpack.c.bf16 %v652_v15, %v649_v24  ;;  %v601_v45 = vld [vmem:[#allocation8 + $0x70] sm:$0xff]  ;;  %v664_v24 = vld [vmem:[#allocation8 + $0x268] sm:$0xff] }
 0x1d5   :  { %4546 = vmatprep.subr.bf16.mxu0 %v6422_v57  ;;  %v661_v15 = vld [vmem:[#allocation8 + $0x250] sm:$0xff] }
 0x1d7   :  { %4062 = vmatmul.mubr.f32.vlgmr.msra.gmra.mrb[24].mxu0 %v6398_v5  ;;  %v6440_v5 = vpack.c.bf16 %v604_v40, %v601_v45  ;;  %v667_v45 = vld [vmem:[#allocation8 + $0x280] sm:$0xff]  ;;  %v670_v40 = vld [vmem:[#allocation8 + $0x298] sm:$0xff] }
 0x1d8   :  { %4548 = vmatpush3.bf16.msra.mxu0 %v6425_v56  ;;  %4064 = vmatprep.mubr.f32.mxu0 %v251_v27  ;;  %v6443_v27 = vpack.c.bf16 %v658_v25, %v655_v26  ;;  %v6455_v26 = vpack.c.bf16 %v616_v21, %v613_v31  ;;  %v622_v25 = vld [vmem:[#allocation8 + $0x118] sm:$0xff]  ;;  %v628_v31 = vld [vmem:[#allocation8 + $0x148] sm:$0xff]  ;;  %v679_v21 = vld [vmem:[#allocation8 + $0x2e0] sm:$0xff] }
 0x1d9   :  { %4550 = vmatprep.subr.bf16.mxu0 %v6428_v32 }
 0x1db   :  { %4065 = vmatmul.mubr.f32.gmra.mrb[26].mxu0 %v6401_v13  ;;  %v6448_v13 = vpack.c.bf16 %v610_v33, %v607_v18  ;;  %v673_v18 = vld [vmem:[#allocation8 + $0x2b0] sm:$0xff]  ;;  %v676_v33 = vld [vmem:[#allocation8 + $0x2c8] sm:$0xff] }
 0x1dc   :  { %4552 = vmatpush3.bf16.msra.mxu0 %v6432_v50  ;;  %4067 = vmatprep.mubr.f32.mxu0 %v6407_v51  ;;  %v6451_v51 = vpack.c.bf16 %v664_v24, %v661_v15  ;;  %v625_v24 = vld [vmem:[#allocation8 + $0x130] sm:$0xff] }
 0x1dd   :  { %4554 = vmatprep.subr.bf16.mxu0 %v6435_v19 }
 0x1df   :  { %4068 = vmatmul.mubr.f32.gmra.mrb[28].mxu0 %v6405_v42  ;;  %v6459_v42 = vpack.c.bf16 %v670_v40, %v667_v45  ;;  %v6468_v45 = vpack.c.bf16 %v628_v31, %v625_v24  ;;  %v6471_v40 = vpack.c.bf16 %v682_v14, %v679_v21  ;;  %v7216_v24 = vmov 0.0|0.0   ;;  %v691_v31 = vld [vmem:[#allocation8 + $0x340] sm:$0xff]  ;;  %v694_v14 = vld [vmem:[#allocation8 + $0x358] sm:$0xff] }
 0x1e0   :  { %4556 = vmatpush3.bf16.msra.mxu0 %v6440_v5  ;;  %4070 = vmatprep.mubr.f32.mxu0 %v6412_v12  ;;  %v619_v12 = vld [vmem:[#allocation8 + $0x100] sm:$0xff]  ;;  %v6483_v21 = vpack.c.bf16 %v694_v14, %v691_v31  ;;  %v709_v14 = vld [vmem:[#allocation8 + $0x3d0] sm:$0xff] }
 0x1e1   :  { %4558 = vmatprep.subr.bf16.mxu0 %v6443_v27  ;;  %v6462_v15 = vpack.c.bf16 %v622_v25, %v619_v12  ;;  %7271 = vst [vmem:[#allocation45_spill] sm:$0xff] %v6468_v45  ;;  %7272 = vst [vmem:[#allocation46_spill] sm:$0xff] %v6471_v40  ;;  %v6474_v12 = vpack.c.bf16 %v634_v6, %v631_v8  ;;  %v685_v25 = vld [vmem:[#allocation8 + $0x310] sm:$0xff]  ;;  %v700_v8 = vld [vmem:[#allocation8 + $0x388] sm:$0xff]  ;;  %v6497_v55 = vpack.c.bf16 %v712_v62, %v709_v14 }
 0x1e2   :  { %v697_v6 = vld [vmem:[#allocation8 + $0x370] sm:$0xff]  ;;  %v727_v62 = vld [vmem:[#allocation8 + $0x460] sm:$0xff]  ;;  %v730_v14 = vld [vmem:[#allocation8 + $0x478] sm:$0xff] }
 0x1e3   :  { %4071 = vmatmul.mubr.f32.gmra.mrb[30].mxu0 %v6410_v0  ;;  %7269 = vst [vmem:[#allocation43_spill] sm:$0xff] %v6462_v15  ;;  %v6465_v0 = vpack.c.bf16 %v676_v33, %v673_v18  ;;  %7273 = vst [vmem:[#allocation47_spill] sm:$0xff] %v6474_v12  ;;  %v688_v18 = vld [vmem:[#allocation8 + $0x328] sm:$0xff]  ;;  %v6509_v38 = vpack.c.bf16 %v730_v14, %v727_v62 }
 0x1e4   :  { %4560 = vmatpush3.bf16.msra.mxu0 %v6448_v13  ;;  %943 = vmatprep.mubr.f32.mxu0 %v7268_v3  ;;  %v6478_v33 = vpack.c.bf16 %v688_v18, %v685_v25  ;;  %v6489_v25 = vpack.c.bf16 %v700_v8, %v697_v6  ;;  %v703_v18 = vld [vmem:[#allocation8 + $0x3a0] sm:$0xff]  ;;  %v718_v8 = vld [vmem:[#allocation8 + $0x418] sm:$0xff] }
 0x1e5   :  { %4562 = vmatprep.subr.bf16.mxu0 %v6451_v51  ;;  %7270 = vst [vmem:[#allocation44_spill] sm:$0xff] %v6465_v0  ;;  %v6493_v31 = vpack.c.bf16 %v706_v63, %v703_v18  ;;  %v715_v6 = vld [vmem:[#allocation8 + $0x400] sm:$0xff]  ;;  %v721_v63 = vld [vmem:[#allocation8 + $0x430] sm:$0xff]  ;;  %v724_v18 = vld [vmem:[#allocation8 + $0x448] sm:$0xff] }
 0x1e6   :  { %v6501_v54 = vpack.c.bf16 %v718_v8, %v715_v6  ;;  %v6505_v47 = vpack.c.bf16 %v724_v18, %v721_v63  ;;  %v7274_v6 = vlaneseq  ;;  %v328_v18 = vld [vmem:[%s7165_s4] sm:$0x7] }
 0x1e8   :  { %4564 = vmatpush3.bf16.msra.mxu0 %v6455_v26  ;;  %v6532_v8 = vshrl.u32 %v7274_v6, 7 }
 0x1e9   :  { %4566 = vmatprep.subr.bf16.mxu0 %v6459_v42 }
 0x1ea   :  { %7275 = vst [vmem:[#allocation48_spill] sm:$0xff] %v6532_v8  ;;  %v7234_v63 = vsub.s32 0, %v6532_v8  ;;  %v7237_v62 = vsub.s32 1, %v6532_v8 }
 0x1ec   :  { %4568 = vmatpush3.bf16.msra.mxu0 %v6462_v15  ;;  %v333_v14 = vrot.slane %v328_v18, %v7234_v63  ;;  %v337_v30 = vrot.slane %v328_v18, %v7237_v62 }
 0x1ed   :  { %4570 = vmatprep.subr.bf16.mxu0 %v6465_v0 }
 0x1f0   :  { %4572 = vmatpush3.bf16.msra.mxu0 %v6468_v45 }
 0x1f1   :  { %4574 = vmatprep.subr.bf16.mxu0 %v6471_v40 }
 0x1f4   :  { %4576 = vmatpush3.bf16.msra.mxu0 %v6474_v12 }
 0x1f5   :  { %4577 = vmatprep.subr.bf16.mxu0 %v7216_v24 }
 0x1f7   :  { %944 = vmatmul.mubr.f32.vlgmr.msra.gmra.mrb[32].mxu0 %v7268_v3 }
 0x1f8   :  { %4579 = vmatpush3.bf16.msra.mxu0 %v6478_v33  ;;  %4105 = vmatprep.mubr.msk.f32.mxu0 %vm6067_vm8, %v7268_v3 }
 0x1f9   :  { %4580 = vmatprep.subr.bf16.mxu0 %v7216_v24 }
 0x1fc   :  { %4582 = vmatpush3.bf16.msra.mxu0 %v6483_v21 }
 0x1fd   :  { %4583 = vmatprep.subr.bf16.mxu0 %v7216_v24 }
 0x200   :  { %4585 = vmatpush3.bf16.msra.mxu0 %v6489_v25 }
 0x201   :  { %4586 = vmatprep.subr.bf16.mxu0 %v7216_v24 }
 0x204   :  { %4588 = vmatpush3.bf16.msra.mxu0 %v6493_v31 }
 0x205   :  { %4589 = vmatprep.subr.bf16.mxu0 %v7216_v24 }
 0x208   :  { %4591 = vmatpush3.bf16.msra.mxu0 %v6497_v55 }
 0x209   :  { %4592 = vmatprep.subr.bf16.mxu0 %v7216_v24 }
 0x20c   :  { %4594 = vmatpush3.bf16.msra.mxu0 %v6501_v54 }
 0x20d   :  { %4595 = vmatprep.subr.bf16.mxu0 %v7216_v24 }
 0x210   :  { %4597 = vmatpush3.bf16.msra.mxu0 %v6505_v47 }
 0x211   :  { %4598 = vmatprep.subr.bf16.mxu0 %v7216_v24 }
 0x214   :  { %4600 = vmatpush3.bf16.msra.mxu0 %v6509_v38 }
 0x215   :  { %4698 = vmatprep.subr.bf16.mxu0 %v6422_v57 }
 0x217   :  { %4106 = vmatmul.mubr.f32.vlgmr.msra.gmra.mrb[34].mxu0 %v7268_v3 }
 0x218   :  { %4700 = vmatpush3.bf16.msra.mxu0 %v6425_v56 }
 0x219   :  { %4702 = vmatprep.subr.bf16.mxu0 %v6428_v32 }
 0x21c   :  { %4704 = vmatpush3.bf16.msra.mxu0 %v6432_v50 }
 0x21d   :  { %4706 = vmatprep.subr.bf16.mxu0 %v6435_v19 }
 0x220   :  { %4708 = vmatpush3.bf16.msra.mxu0 %v6440_v5 }
 0x221   :  { %4710 = vmatprep.subr.bf16.mxu0 %v6443_v27 }
 0x224   :  { %4712 = vmatpush3.bf16.msra.mxu0 %v6448_v13 }
 0x225   :  { %4714 = vmatprep.subr.bf16.mxu0 %v6451_v51 }
 0x228   :  { %4716 = vmatpush3.bf16.msra.mxu0 %v6455_v26 }
 0x229   :  { %4718 = vmatprep.subr.bf16.mxu0 %v6459_v42 }
 0x22c   :  { %4720 = vmatpush3.bf16.msra.mxu0 %v6462_v15 }
 0x22d   :  { %4722 = vmatprep.subr.bf16.mxu0 %v6465_v0 }
 0x230   :  { %4724 = vmatpush3.bf16.msra.mxu0 %v6468_v45 }
 0x231   :  { %4726 = vmatprep.subr.bf16.mxu0 %v6471_v40 }
 0x234   :  { %4728 = vmatpush3.bf16.msra.mxu0 %v6474_v12 }
 0x235   :  { %4729 = vmatprep.subr.bf16.mxu0 %v7216_v24 }
 0x28a   :  { %v411_v28 = vpop.f32.mrb[8].mxu0 }
 0x28b   :  { %v412_v23 = vadd.f32 %v411_v28, %v333_v14  ;;  %v413_v24 = vpop.f32.mrb[9].mxu0 }
 0x28c   :  { %v414_v12 = vadd.f32 %v413_v24, %v337_v30 }
 0x28d   :  { %v5794_v6 = vadd.f32 %v874_v46, %v412_v23 }
 0x28e   :  { %v5796_v22 = vadd.f32 %v876_v39, %v414_v12  ;;  %v417_v40 = vpop.f32.mrb[10].mxu0 }
 0x28f   :  { %v6543_v17 = vadd.f32 %v417_v40, %v333_v14  ;;  %v419_v45 = vpop.f32.mrb[11].mxu0 }
 0x290   :  { %5864 = vtanh.f32 %v5796_v22  ;;  %v6545_v16 = vadd.f32 %v419_v45, %v337_v30 }
 0x291   :  { %5866 = vtanh.f32 %v5794_v6 }
 0x292   :  { %v423_v0 = vpop.f32.mrb[12].mxu0 }
 0x293   :  { %v6547_v9 = vadd.f32 %v423_v0, %v333_v14  ;;  %v425_v63 = vpop.f32.mrb[13].mxu0 }
 0x294   :  { %v6549_v15 = vadd.f32 %v425_v63, %v337_v30  ;;  %v7282_v63 = vmov 0.0|0.0  }
 0x295   :  { %7276 = vst [vmem:[#allocation49_spill] sm:$0xff] %v6547_v9 }
 0x296   :  { %7277 = vst [vmem:[#allocation50_spill] sm:$0xff] %v6549_v15  ;;  %v429_v62 = vpop.f32.mrb[14].mxu0 }
 0x297   :  { %v6551_v28 = vadd.f32 %v429_v62, %v333_v14  ;;  %v431_v24 = vpop.f32.mrb[15].mxu0 }
 0x298   :  { %v6553_v23 = vadd.f32 %v431_v24, %v337_v30 }
 0x299   :  { %7278 = vst [vmem:[#allocation51_spill] sm:$0xff] %v6551_v28 }
 0x29a   :  { %7279 = vst [vmem:[#allocation52_spill] sm:$0xff] %v6553_v23  ;;  %v5865_v39 = vpop.eup %5864  ;;  %v435_v46 = vpop.f32.mrb[16].mxu0  ;;  %v7296_v23 = vld [vmem:[#allocation42_spill] sm:$0xff] }
 0x29b   :  { %v5867_v40 = vpop.eup %5866  ;;  %v6555_v12 = vadd.f32 %v435_v46, %v333_v14  ;;  %v437_v22 = vpop.f32.mrb[17].mxu0  ;;  %1095 = vmatprep.mubr.f32.mxu1 %v5865_v39  ;;  %1237 = vmatprep.mubr.f32.mxu0 %v5865_v39 }
 0x29c   :  { %v6557_v45 = vadd.f32 %v437_v22, %v337_v30  ;;  %1096 = vmatmul.mubr.f32.vlgmr.msra.gmra.mrb[2].mxu1 %v5867_v40  ;;  %1238 = vmatmul.mubr.f32.vlgmr.msra.gmra.mrb[36].mxu0 %v5867_v40  ;;  %v340_v22 = vsub.s32 2, %v6532_v8 }
 0x29d   :  { %7280 = vst [vmem:[#allocation53_spill] sm:$0xff] %v6555_v12  ;;  %4668 = vmatpush1.bf16.msra.mxu1 %v6314_v34  ;;  %4731 = vmatpush3.bf16.msra.mxu0 %v6478_v33 }
 0x29e   :  { %7281 = vst [vmem:[#allocation54_spill] sm:$0xff] %v6557_v45  ;;  %v441_v0 = vpop.f32.mrb[18].mxu0  ;;  %4670 = vmatprep.subr.bf16.mxu1 %v6317_v37  ;;  %4732 = vmatprep.subr.bf16.mxu0 %v7282_v63  ;;  %v341_v45 = vrot.slane %v328_v18, %v340_v22  ;;  %v7289_v18 = vld [vmem:[#allocation39_spill] sm:$0xff] }
 0x29f   :  { %v6563_v62 = vadd.f32 %v441_v0, %v333_v14  ;;  %v443_v6 = vpop.f32.mrb[19].mxu0  ;;  %1166 = vmatprep.mubr.f32.mxu1 %v7268_v3  ;;  %4140 = vmatprep.mubr.msk.f32.mxu0 %vm6067_vm8, %v7268_v3 }
 0x2a0   :  { %v6568_v24 = vadd.f32 %v443_v6, %v337_v30 }
 0x2a1   :  { %7283 = vst [vmem:[#allocation55_spill] sm:$0xff] %v6563_v62  ;;  %4672 = vmatpush1.bf16.msra.mxu1 %v6321_v48  ;;  %4734 = vmatpush3.bf16.msra.mxu0 %v6483_v21 }
 0x2a2   :  { %7284 = vst [vmem:[#allocation56_spill] sm:$0xff] %v6568_v24  ;;  %v447_v39 = vpop.f32.mrb[20].mxu0  ;;  %4674 = vmatprep.subr.bf16.mxu1 %v6325_v49  ;;  %4735 = vmatprep.subr.bf16.mxu0 %v7282_v63 }
 0x2a3   :  { %v6574_v46 = vadd.f32 %v447_v39, %v333_v14  ;;  %v449_v40 = vpop.f32.mrb[21].mxu0 }
 0x2a4   :  { %v6577_v0 = vadd.f32 %v449_v40, %v337_v30 }
 0x2a5   :  { %7285 = vst [vmem:[#allocation57_spill] sm:$0xff] %v6574_v46  ;;  %4676 = vmatpush1.bf16.msra.mxu1 %v6328_v58  ;;  %4737 = vmatpush3.bf16.msra.mxu0 %v6489_v25 }
 0x2a6   :  { %7286 = vst [vmem:[#allocation58_spill] sm:$0xff] %v6577_v0  ;;  %v453_v6 = vpop.f32.mrb[22].mxu0  ;;  %4678 = vmatprep.subr.bf16.mxu1 %v6331_v61  ;;  %4738 = vmatprep.subr.bf16.mxu0 %v7282_v63 }
 0x2a7   :  { %v6583_v24 = vadd.f32 %v453_v6, %v333_v14  ;;  %v455_v62 = vpop.f32.mrb[23].mxu0  ;;  %v7292_v6 = vld [vmem:[#allocation40_spill] sm:$0xff] }
 0x2a8   :  { %v6585_v39 = vadd.f32 %v455_v62, %v337_v30 }
 0x2a9   :  { %7287 = vst [vmem:[#allocation59_spill] sm:$0xff] %v6583_v24  ;;  %4680 = vmatpush1.bf16.msra.mxu1 %v6334_v10  ;;  %4740 = vmatpush3.bf16.msra.mxu0 %v6493_v31 }
 0x2aa   :  { %7288 = vst [vmem:[#allocation60_spill] sm:$0xff] %v6585_v39  ;;  %v4063_v40 = vpop.f32.mrb[24].mxu0  ;;  %4682 = vmatprep.subr.bf16.mxu1 %v6337_v11  ;;  %4741 = vmatprep.subr.bf16.mxu0 %v7282_v63  ;;  %v7293_v39 = vld [vmem:[#allocation41_spill] sm:$0xff] }
 0x2ab   :  { %v6591_v8 = vadd.f32 %v4063_v40, %v341_v45  ;;  %v524_v0 = vpop.f32.mrb[25].mxu0 }
 0x2ad   :  { %4684 = vmatpush1.bf16.msra.mxu1 %v6340_v20  ;;  %4743 = vmatpush3.bf16.msra.mxu0 %v6497_v55 }
 0x2ae   :  { %v4066_v14 = vpop.f32.mrb[26].mxu0  ;;  %4686 = vmatprep.subr.bf16.mxu1 %v7289_v18  ;;  %4744 = vmatprep.subr.bf16.mxu0 %v7282_v63 }
 0x2af   :  { %v6597_v30 = vadd.f32 %v4066_v14, %v341_v45  ;;  %v534_v62 = vpop.f32.mrb[27].mxu0 }
 0x2b0   :  { %v6599_v22 = vadd.f32 %v534_v62, %v341_v45 }
 0x2b1   :  { %7290 = vst [vmem:[#allocation39_spill] sm:$0xff] %v6597_v30  ;;  %4688 = vmatpush1.bf16.msra.mxu1 %v7292_v6  ;;  %4746 = vmatpush3.bf16.msra.mxu0 %v6501_v54 }
 0x2b2   :  { %7291 = vst [vmem:[#allocation61_spill] sm:$0xff] %v6599_v22  ;;  %v4069_v40 = vpop.f32.mrb[28].mxu0  ;;  %4690 = vmatprep.subr.bf16.mxu1 %v7293_v39  ;;  %4747 = vmatprep.subr.bf16.mxu0 %v7282_v63  ;;  %v525_v22 = vadd.f32 %v524_v0, %v341_v45  ;;  %v7304_v0 = vld [vmem:[#allocation20_spill] sm:$0xff] }
 0x2b3   :  { %v6605_v24 = vadd.f32 %v4069_v40, %v341_v45  ;;  %v544_v46 = vpop.f32.mrb[29].mxu0 }
 0x2b4   :  { %v6607_v12 = vadd.f32 %v544_v46, %v341_v45 }
 0x2b5   :  { %7294 = vst [vmem:[#allocation40_spill] sm:$0xff] %v6605_v24  ;;  %4692 = vmatpush1.bf16.msra.mxu1 %v7296_v23  ;;  %4749 = vmatpush3.bf16.msra.mxu0 %v6505_v47 }
 0x2b6   :  { %7295 = vst [vmem:[#allocation41_spill] sm:$0xff] %v6607_v12  ;;  %v4072_v14 = vpop.f32.mrb[30].mxu0  ;;  %4694 = vmatprep.subr.bf16.mxu1 %v6358_v41  ;;  %4750 = vmatprep.subr.bf16.mxu0 %v7282_v63 }
 0x2b7   :  { %v6613_v62 = vadd.f32 %v4072_v14, %v341_v45  ;;  %v554_v30 = vpop.f32.mrb[31].mxu0 }
 0x2b8   :  { %v6615_v28 = vadd.f32 %v554_v30, %v341_v45  ;;  %v7302_v45 = vld [vmem:[#allocation19_spill] sm:$0xff]  ;;  %v7305_v30 = vld [vmem:[#allocation46_spill] sm:$0xff] }
 0x2b9   :  { %7297 = vst [vmem:[#allocation42_spill] sm:$0xff] %v6613_v62  ;;  %4696 = vmatpush1.bf16.msra.mxu1 %v6361_v4  ;;  %4752 = vmatpush3.bf16.msra.mxu0 %v6509_v38 }
 0x2ba   :  { %7298 = vst [vmem:[#allocation62_spill] sm:$0xff] %v6615_v28  ;;  %4754 = vmatprep.subr.bf16.mxu1 %v6215_v29  ;;  %4850 = vmatprep.subr.bf16.mxu0 %v6422_v57  ;;  %v7311_v28 = vld [vmem:[#allocation25_spill] sm:$0xff] }
 0x2ca   :  { %v3566_v46 = vpop.f32.mrb[32].mxu0 }
 0x2cb   :  { %v3567_v40 = vpop.f32.mrb[33].mxu0 }
 0x2cc   :  { %v3568_v24 = vadd.f32 %v3567_v40, %v3566_v46  ;;  %v7308_v46 = vld [vmem:[#allocation22_spill] sm:$0xff]  ;;  %v7309_v40 = vld [vmem:[#allocation23_spill] sm:$0xff] }
 0x2ea   :  { %v1015_v12 = vpop.f32.mrb[34].mxu0 }
 0x2eb   :  { %v1016_v15 = vadd.f32 %v3568_v24, %v1015_v12  ;;  %v4107_v9 = vpop.f32.mrb[35].mxu0  ;;  %v7301_v12 = vld [vmem:[#allocation44_spill] sm:$0xff]  ;;  %v7303_v24 = vld [vmem:[#allocation45_spill] sm:$0xff] }
 0x2ec   :  { %v7299_v9 = vld [vmem:[#allocation43_spill] sm:$0xff] }
 0x2ed   :  { %v1021_v14 = vadd.f32 %v1016_v15, %v525_v22  ;;  %v7300_v15 = vld [vmem:[#allocation18_spill] sm:$0xff]  ;;  %v7306_v22 = vld [vmem:[#allocation21_spill] sm:$0xff] }
 0x2ef   :  { %5868 = vtanh.f32 %v1021_v14  ;;  %v7310_v14 = vld [vmem:[#allocation24_spill] sm:$0xff] }
 0x2f9   :  { %v5869_v62 = vpop.eup %5868 }
 0x2fa   :  { %1167 = vmatmul.mubr.f32.vlgmr.msra.gmra.mrb[2].mxu1 %v5869_v62  ;;  %4141 = vmatmul.mubr.f32.vlgmr.msra.gmra.mrb[38].mxu0 %v5869_v62  ;;  %v7307_v62 = vld [vmem:[#allocation47_spill] sm:$0xff] }
 0x2fb   :  { %4756 = vmatpush1.bf16.msra.mxu1 %v6218_v35  ;;  %4852 = vmatpush3.bf16.msra.mxu0 %v6425_v56 }
 0x2fc   :  { %4758 = vmatprep.subr.bf16.mxu1 %v6220_v36  ;;  %4854 = vmatprep.subr.bf16.mxu0 %v6428_v32 }
 0x2ff   :  { %4760 = vmatpush1.bf16.msra.mxu1 %v6224_v43  ;;  %4856 = vmatpush3.bf16.msra.mxu0 %v6432_v50 }
 0x300   :  { %4762 = vmatprep.subr.bf16.mxu1 %v6227_v44  ;;  %4858 = vmatprep.subr.bf16.mxu0 %v6435_v19 }
 0x303   :  { %4764 = vmatpush1.bf16.msra.mxu1 %v6230_v52  ;;  %4860 = vmatpush3.bf16.msra.mxu0 %v6440_v5 }
 0x304   :  { %4766 = vmatprep.subr.bf16.mxu1 %v6233_v53  ;;  %4862 = vmatprep.subr.bf16.mxu0 %v6443_v27 }
 0x307   :  { %4768 = vmatpush1.bf16.msra.mxu1 %v6236_v59  ;;  %4864 = vmatpush3.bf16.msra.mxu0 %v6448_v13 }
 0x308   :  { %4770 = vmatprep.subr.bf16.mxu1 %v6239_v60  ;;  %4866 = vmatprep.subr.bf16.mxu0 %v6451_v51 }
 0x30b   :  { %4772 = vmatpush1.bf16.msra.mxu1 %v6242_v1  ;;  %4868 = vmatpush3.bf16.msra.mxu0 %v6455_v26 }
 0x30c   :  { %4774 = vmatprep.subr.bf16.mxu1 %v6245_v2  ;;  %4870 = vmatprep.subr.bf16.mxu0 %v6459_v42 }
 0x30f   :  { %4776 = vmatpush1.bf16.msra.mxu1 %v6248_v7  ;;  %4872 = vmatpush3.bf16.msra.mxu0 %v7299_v9 }
 0x310   :  { %4778 = vmatprep.subr.bf16.mxu1 %v7300_v15  ;;  %4874 = vmatprep.subr.bf16.mxu0 %v7301_v12  ;;  %v7319_v12 = vld [vmem:[#allocation33_spill] sm:$0xff] }
 0x313   :  { %4780 = vmatpush1.bf16.msra.mxu1 %v7302_v45  ;;  %4876 = vmatpush3.bf16.msra.mxu0 %v7303_v24  ;;  %v7312_v45 = vld [vmem:[#allocation26_spill] sm:$0xff]  ;;  %v7313_v24 = vld [vmem:[#allocation27_spill] sm:$0xff] }
 0x314   :  { %4782 = vmatprep.subr.bf16.mxu1 %v7304_v0  ;;  %4878 = vmatprep.subr.bf16.mxu0 %v7305_v30  ;;  %v7314_v0 = vld [vmem:[#allocation28_spill] sm:$0xff]  ;;  %v7315_v30 = vld [vmem:[#allocation29_spill] sm:$0xff] }
 0x317   :  { %4784 = vmatpush1.bf16.msra.mxu1 %v7306_v22  ;;  %4880 = vmatpush3.bf16.msra.mxu0 %v7307_v62  ;;  %v7316_v22 = vld [vmem:[#allocation30_spill] sm:$0xff]  ;;  %v7317_v62 = vld [vmem:[#allocation31_spill] sm:$0xff] }
 0x318   :  { %4786 = vmatprep.subr.bf16.mxu1 %v7308_v46  ;;  %4881 = vmatprep.subr.bf16.mxu0 %v7282_v63  ;;  %v7318_v46 = vld [vmem:[#allocation32_spill] sm:$0xff] }
 0x31b   :  { %4788 = vmatpush1.bf16.msra.mxu1 %v7309_v40  ;;  %v7320_v40 = vld [vmem:[#allocation34_spill] sm:$0xff] }
 0x31c   :  { %4790 = vmatprep.subr.bf16.mxu1 %v7310_v14  ;;  %v7321_v14 = vld [vmem:[#allocation35_spill] sm:$0xff] }
 0x31f   :  { %4792 = vmatpush1.bf16.msra.mxu1 %v7311_v28  ;;  %v7322_v28 = vld [vmem:[#allocation36_spill] sm:$0xff] }
 0x320   :  { %4794 = vmatprep.subr.bf16.mxu1 %v7312_v45  ;;  %v7323_v45 = vld [vmem:[#allocation37_spill] sm:$0xff] }
 0x323   :  { %4796 = vmatpush1.bf16.msra.mxu1 %v7313_v24  ;;  %v7324_v24 = vld [vmem:[#allocation38_spill] sm:$0xff] }
 0x324   :  { %4798 = vmatprep.subr.bf16.mxu1 %v7314_v0 }
 0x327   :  { %4800 = vmatpush1.bf16.msra.mxu1 %v7315_v30 }
 0x328   :  { %4802 = vmatprep.subr.bf16.mxu1 %v7316_v22 }
 0x32b   :  { %4804 = vmatpush1.bf16.msra.mxu1 %v7317_v62 }
 0x32c   :  { %4806 = vmatprep.subr.bf16.mxu1 %v7318_v46 }
 0x32f   :  { %4808 = vmatpush1.bf16.msra.mxu1 %v7319_v12 }
 0x330   :  { %4810 = vmatprep.subr.bf16.mxu1 %v7320_v40 }
 0x333   :  { %4812 = vmatpush1.bf16.msra.mxu1 %v7321_v14 }
 0x334   :  { %4814 = vmatprep.subr.bf16.mxu1 %v7322_v28 }
 0x337   :  { %4816 = vmatpush1.bf16.msra.mxu1 %v7323_v45 }
 0x338   :  { %4818 = vmatprep.subr.bf16.mxu1 %v7324_v24 }
 0x36f   :  { %v3618_v0 = vpop.f32.mrb[36].mxu0 }
 0x370   :  { %v3619_v30 = vpop.f32.mrb[37].mxu0 }
 0x371   :  { %v3620_v15 = vadd.f32 %v3619_v30, %v3618_v0  ;;  %v7333_v0 = vld [vmem:[#allocation21_spill] sm:$0xff]  ;;  %v7334_v30 = vld [vmem:[#allocation47_spill] sm:$0xff] }
 0x3cd   :  { %v1168_v22 = vpop.f32.mrb[2].mxu1  ;;  %v1309_v9 = vpop.f32.mrb[38].mxu0 }
 0x3ce   :  { %v5798_v62 = vadd.f32 %v1168_v22, %v6543_v17  ;;  %v1310_v46 = vadd.f32 %v3620_v15, %v1309_v9  ;;  %v1170_v7 = vpop.f32.mrb[3].mxu1  ;;  %v4142_v12 = vpop.f32.mrb[39].mxu0  ;;  %v7326_v17 = vld [vmem:[#allocation43_spill] sm:$0xff]  ;;  %v7330_v15 = vld [vmem:[#allocation45_spill] sm:$0xff]  ;;  %v7335_v22 = vld [vmem:[#allocation22_spill] sm:$0xff] }
 0x3cf   :  { %v5800_v40 = vadd.f32 %v1170_v7, %v6545_v16  ;;  %v7325_v16 = vld [vmem:[#allocation17_spill] sm:$0xff]  ;;  %v7329_v9 = vld [vmem:[#allocation19_spill] sm:$0xff]  ;;  %v7331_v12 = vld [vmem:[#allocation20_spill] sm:$0xff] }
 0x3d0   :  { %v1315_v14 = vadd.f32 %v1310_v46, %v6591_v8  ;;  %v7327_v8 = vld [vmem:[#allocation18_spill] sm:$0xff]  ;;  %v7337_v46 = vld [vmem:[#allocation24_spill] sm:$0xff] }
 0x3d1   :  { %5870 = vtanh.f32 %v5800_v40  ;;  %v7338_v40 = vld [vmem:[#allocation25_spill] sm:$0xff] }
 0x3d2   :  { %5872 = vtanh.f32 %v5798_v62  ;;  %v7336_v62 = vld [vmem:[#allocation23_spill] sm:$0xff] }
 0x3d3   :  { %5874 = vtanh.f32 %v1315_v14  ;;  %v7339_v14 = vld [vmem:[#allocation26_spill] sm:$0xff] }
 0x3db   :  { %v5871_v28 = vpop.eup %5870 }
 0x3dc   :  { %v5873_v45 = vpop.eup %5872  ;;  %1389 = vmatprep.mubr.f32.mxu1 %v5871_v28  ;;  %1531 = vmatprep.mubr.f32.mxu0 %v5871_v28  ;;  %v7328_v28 = vld [vmem:[#allocation44_spill] sm:$0xff] }
 0x3dd   :  { %1390 = vmatmul.mubr.f32.vlgmr.msra.gmra.mrb[4].mxu1 %v5873_v45  ;;  %1532 = vmatmul.mubr.f32.vlgmr.msra.gmra.mrb[40].mxu0 %v5873_v45  ;;  %v5875_v7 = vpop.eup %5874  ;;  %v7332_v45 = vld [vmem:[#allocation46_spill] sm:$0xff] }
 0x3de   :  { %4820 = vmatpush1.bf16.msra.mxu1 %v6314_v34  ;;  %4883 = vmatpush3.bf16.msra.mxu0 %v6478_v33 }
 0x3df   :  { %4822 = vmatprep.subr.bf16.mxu1 %v6317_v37  ;;  %4884 = vmatprep.subr.bf16.mxu0 %v7282_v63 }
 0x3e0   :  { %1460 = vmatprep.mubr.f32.mxu1 %v7268_v3  ;;  %4175 = vmatprep.mubr.msk.f32.mxu0 %vm6067_vm8, %v7268_v3 }
 0x3e2   :  { %4824 = vmatpush1.bf16.msra.mxu1 %v6321_v48  ;;  %4886 = vmatpush3.bf16.msra.mxu0 %v6483_v21 }
 0x3e3   :  { %4826 = vmatprep.subr.bf16.mxu1 %v6325_v49  ;;  %4887 = vmatprep.subr.bf16.mxu0 %v7282_v63 }
 0x3e6   :  { %4828 = vmatpush1.bf16.msra.mxu1 %v6328_v58  ;;  %4889 = vmatpush3.bf16.msra.mxu0 %v6489_v25 }
 0x3e7   :  { %4830 = vmatprep.subr.bf16.mxu1 %v6331_v61  ;;  %4890 = vmatprep.subr.bf16.mxu0 %v7282_v63 }
 0x3ea   :  { %4832 = vmatpush1.bf16.msra.mxu1 %v6334_v10  ;;  %4892 = vmatpush3.bf16.msra.mxu0 %v6493_v31 }
 0x3eb   :  { %4834 = vmatprep.subr.bf16.mxu1 %v6337_v11  ;;  %4893 = vmatprep.subr.bf16.mxu0 %v7282_v63 }
 0x3ee   :  { %4836 = vmatpush1.bf16.msra.mxu1 %v6340_v20  ;;  %4895 = vmatpush3.bf16.msra.mxu0 %v6497_v55 }
 0x3ef   :  { %4838 = vmatprep.subr.bf16.mxu1 %v7289_v18  ;;  %4896 = vmatprep.subr.bf16.mxu0 %v7282_v63 }
 0x3f2   :  { %4840 = vmatpush1.bf16.msra.mxu1 %v7292_v6  ;;  %4898 = vmatpush3.bf16.msra.mxu0 %v6501_v54 }
 0x3f3   :  { %4842 = vmatprep.subr.bf16.mxu1 %v7293_v39  ;;  %4899 = vmatprep.subr.bf16.mxu0 %v7282_v63 }
 0x3f6   :  { %4844 = vmatpush1.bf16.msra.mxu1 %v7296_v23  ;;  %4901 = vmatpush3.bf16.msra.mxu0 %v6505_v47 }
 0x3f7   :  { %4846 = vmatprep.subr.bf16.mxu1 %v6358_v41  ;;  %4902 = vmatprep.subr.bf16.mxu0 %v7282_v63 }
 0x3fa   :  { %4848 = vmatpush1.bf16.msra.mxu1 %v6361_v4  ;;  %4904 = vmatpush3.bf16.msra.mxu0 %v6509_v38 }
 0x3fb   :  { %4906 = vmatprep.subr.bf16.mxu1 %v6215_v29  ;;  %5002 = vmatprep.subr.bf16.mxu0 %v6422_v57 }
 0x3fd   :  { %1461 = vmatmul.mubr.f32.vlgmr.msra.gmra.mrb[4].mxu1 %v5875_v7  ;;  %4176 = vmatmul.mubr.f32.vlgmr.msra.gmra.mrb[42].mxu0 %v5875_v7  ;;  %v7340_v7 = vld [vmem:[#allocation27_spill] sm:$0xff] }
 0x3fe   :  { %4908 = vmatpush1.bf16.msra.mxu1 %v6218_v35  ;;  %5004 = vmatpush3.bf16.msra.mxu0 %v6425_v56 }
 0x3ff   :  { %4910 = vmatprep.subr.bf16.mxu1 %v6220_v36  ;;  %5006 = vmatprep.subr.bf16.mxu0 %v6428_v32 }
 0x402   :  { %4912 = vmatpush1.bf16.msra.mxu1 %v6224_v43  ;;  %5008 = vmatpush3.bf16.msra.mxu0 %v6432_v50 }
 0x403   :  { %4914 = vmatprep.subr.bf16.mxu1 %v6227_v44  ;;  %5010 = vmatprep.subr.bf16.mxu0 %v6435_v19 }
 0x406   :  { %4916 = vmatpush1.bf16.msra.mxu1 %v6230_v52  ;;  %5012 = vmatpush3.bf16.msra.mxu0 %v6440_v5 }
 0x407   :  { %4918 = vmatprep.subr.bf16.mxu1 %v6233_v53  ;;  %5014 = vmatprep.subr.bf16.mxu0 %v6443_v27 }
 0x40a   :  { %4920 = vmatpush1.bf16.msra.mxu1 %v6236_v59  ;;  %5016 = vmatpush3.bf16.msra.mxu0 %v6448_v13 }
 0x40b   :  { %4922 = vmatprep.subr.bf16.mxu1 %v6239_v60  ;;  %5018 = vmatprep.subr.bf16.mxu0 %v6451_v51 }
 0x40e   :  { %4924 = vmatpush1.bf16.msra.mxu1 %v6242_v1  ;;  %5020 = vmatpush3.bf16.msra.mxu0 %v6455_v26 }
 0x40f   :  { %4926 = vmatprep.subr.bf16.mxu1 %v6245_v2  ;;  %5022 = vmatprep.subr.bf16.mxu0 %v6459_v42 }
 0x412   :  { %4928 = vmatpush1.bf16.msra.mxu1 %v7325_v16  ;;  %5024 = vmatpush3.bf16.msra.mxu0 %v7326_v17  ;;  %v7352_v17 = vld [vmem:[#allocation50_spill] sm:$0xff]  ;;  %v7353_v16 = vld [vmem:[#allocation61_spill] sm:$0xff] }
 0x413   :  { %4930 = vmatprep.subr.bf16.mxu1 %v7327_v8  ;;  %5026 = vmatprep.subr.bf16.mxu0 %v7328_v28 }
 0x416   :  { %4932 = vmatpush1.bf16.msra.mxu1 %v7329_v9  ;;  %5028 = vmatpush3.bf16.msra.mxu0 %v7330_v15  ;;  %v7346_v15 = vld [vmem:[#allocation33_spill] sm:$0xff] }
 0x417   :  { %4934 = vmatprep.subr.bf16.mxu1 %v7331_v12  ;;  %5030 = vmatprep.subr.bf16.mxu0 %v7332_v45  ;;  %v7341_v12 = vld [vmem:[#allocation28_spill] sm:$0xff]  ;;  %v7342_v45 = vld [vmem:[#allocation29_spill] sm:$0xff] }
 0x41a   :  { %4936 = vmatpush1.bf16.msra.mxu1 %v7333_v0  ;;  %5032 = vmatpush3.bf16.msra.mxu0 %v7334_v30  ;;  %v7343_v0 = vld [vmem:[#allocation30_spill] sm:$0xff]  ;;  %v7344_v30 = vld [vmem:[#allocation31_spill] sm:$0xff] }
 0x41b   :  { %4938 = vmatprep.subr.bf16.mxu1 %v7335_v22  ;;  %5033 = vmatprep.subr.bf16.mxu0 %v7282_v63  ;;  %v7345_v22 = vld [vmem:[#allocation32_spill] sm:$0xff] }
 0x41e   :  { %4940 = vmatpush1.bf16.msra.mxu1 %v7336_v62  ;;  %v7347_v62 = vld [vmem:[#allocation34_spill] sm:$0xff] }
 0x41f   :  { %4942 = vmatprep.subr.bf16.mxu1 %v7337_v46  ;;  %v7348_v46 = vld [vmem:[#allocation35_spill] sm:$0xff] }
 0x422   :  { %4944 = vmatpush1.bf16.msra.mxu1 %v7338_v40  ;;  %v7349_v40 = vld [vmem:[#allocation36_spill] sm:$0xff] }
 0x423   :  { %4946 = vmatprep.subr.bf16.mxu1 %v7339_v14  ;;  %v7350_v14 = vld [vmem:[#allocation37_spill] sm:$0xff] }
 0x426   :  { %4948 = vmatpush1.bf16.msra.mxu1 %v7340_v7 }
 0x427   :  { %4950 = vmatprep.subr.bf16.mxu1 %v7341_v12 }
 0x42a   :  { %4952 = vmatpush1.bf16.msra.mxu1 %v7342_v45 }
 0x42b   :  { %4954 = vmatprep.subr.bf16.mxu1 %v7343_v0 }
 0x42e   :  { %4956 = vmatpush1.bf16.msra.mxu1 %v7344_v30  ;;  %v7351_v30 = vld [vmem:[#allocation49_spill] sm:$0xff] }
 0x42f   :  { %4958 = vmatprep.subr.bf16.mxu1 %v7345_v22 }
 0x432   :  { %4960 = vmatpush1.bf16.msra.mxu1 %v7346_v15 }
 0x433   :  { %4962 = vmatprep.subr.bf16.mxu1 %v7347_v62 }
 0x436   :  { %4964 = vmatpush1.bf16.msra.mxu1 %v7348_v46 }
 0x437   :  { %4966 = vmatprep.subr.bf16.mxu1 %v7349_v40 }
 0x43a   :  { %4968 = vmatpush1.bf16.msra.mxu1 %v7350_v14 }
 0x43b   :  { %4970 = vmatprep.subr.bf16.mxu1 %v7324_v24 }
 0x4b0   :  { %v3670_v12 = vpop.f32.mrb[40].mxu0 }
 0x4b1   :  { %v3671_v45 = vpop.f32.mrb[41].mxu0 }
 0x4b2   :  { %v3672_v7 = vadd.f32 %v3671_v45, %v3670_v12  ;;  %v7359_v12 = vld [vmem:[#allocation45_spill] sm:$0xff]  ;;  %v7360_v45 = vld [vmem:[#allocation20_spill] sm:$0xff] }
 0x4d0   :  { %v1462_v0 = vpop.f32.mrb[4].mxu1  ;;  %v1603_v9 = vpop.f32.mrb[42].mxu0 }
 0x4d1   :  { %v5802_v28 = vadd.f32 %v1462_v0, %v7351_v30  ;;  %v1604_v22 = vadd.f32 %v3672_v7, %v1603_v9  ;;  %v1464_v8 = vpop.f32.mrb[5].mxu1  ;;  %v4177_v15 = vpop.f32.mrb[43].mxu0  ;;  %v7357_v9 = vld [vmem:[#allocation44_spill] sm:$0xff]  ;;  %v7361_v0 = vld [vmem:[#allocation46_spill] sm:$0xff]  ;;  %v7362_v30 = vld [vmem:[#allocation21_spill] sm:$0xff] }
 0x4d2   :  { %v5804_v62 = vadd.f32 %v1464_v8, %v7352_v17  ;;  %v7354_v17 = vld [vmem:[#allocation17_spill] sm:$0xff]  ;;  %v7355_v8 = vld [vmem:[#allocation43_spill] sm:$0xff]  ;;  %v7368_v7 = vld [vmem:[#allocation26_spill] sm:$0xff] }
 0x4d3   :  { %v1609_v46 = vadd.f32 %v1604_v22, %v7353_v16  ;;  %v7358_v15 = vld [vmem:[#allocation19_spill] sm:$0xff] }
 0x4d4   :  { %5876 = vtanh.f32 %v5804_v62  ;;  %v7363_v22 = vld [vmem:[#allocation47_spill] sm:$0xff]  ;;  %v7364_v62 = vld [vmem:[#allocation22_spill] sm:$0xff] }
 0x4d5   :  { %5878 = vtanh.f32 %v5802_v28  ;;  %v7356_v28 = vld [vmem:[#allocation18_spill] sm:$0xff] }
 0x4d6   :  { %5880 = vtanh.f32 %v1609_v46  ;;  %v7365_v46 = vld [vmem:[#allocation23_spill] sm:$0xff] }
 0x4de   :  { %v5877_v40 = vpop.eup %5876 }
 0x4df   :  { %v5879_v14 = vpop.eup %5878  ;;  %1683 = vmatprep.mubr.f32.mxu1 %v5877_v40  ;;  %1825 = vmatprep.mubr.f32.mxu0 %v5877_v40  ;;  %v7366_v40 = vld [vmem:[#allocation24_spill] sm:$0xff] }
 0x4e0   :  { %1684 = vmatmul.mubr.f32.vlgmr.msra.gmra.mrb[6].mxu1 %v5879_v14  ;;  %1826 = vmatmul.mubr.f32.vlgmr.msra.gmra.mrb[44].mxu0 %v5879_v14  ;;  %v5881_v16 = vpop.eup %5880  ;;  %v7367_v14 = vld [vmem:[#allocation25_spill] sm:$0xff] }
 0x4e1   :  { %4972 = vmatpush1.bf16.msra.mxu1 %v6314_v34  ;;  %5035 = vmatpush3.bf16.msra.mxu0 %v6478_v33 }
 0x4e2   :  { %4974 = vmatprep.subr.bf16.mxu1 %v6317_v37  ;;  %5036 = vmatprep.subr.bf16.mxu0 %v7282_v63 }
 0x4e3   :  { %1754 = vmatprep.mubr.f32.mxu1 %v7268_v3  ;;  %4210 = vmatprep.mubr.msk.f32.mxu0 %vm6067_vm8, %v7268_v3 }
 0x4e5   :  { %4976 = vmatpush1.bf16.msra.mxu1 %v6321_v48  ;;  %5038 = vmatpush3.bf16.msra.mxu0 %v6483_v21 }
 0x4e6   :  { %4978 = vmatprep.subr.bf16.mxu1 %v6325_v49  ;;  %5039 = vmatprep.subr.bf16.mxu0 %v7282_v63 }
 0x4e9   :  { %4980 = vmatpush1.bf16.msra.mxu1 %v6328_v58  ;;  %5041 = vmatpush3.bf16.msra.mxu0 %v6489_v25 }
 0x4ea   :  { %4982 = vmatprep.subr.bf16.mxu1 %v6331_v61  ;;  %5042 = vmatprep.subr.bf16.mxu0 %v7282_v63 }
 0x4ed   :  { %4984 = vmatpush1.bf16.msra.mxu1 %v6334_v10  ;;  %5044 = vmatpush3.bf16.msra.mxu0 %v6493_v31 }
 0x4ee   :  { %4986 = vmatprep.subr.bf16.mxu1 %v6337_v11  ;;  %5045 = vmatprep.subr.bf16.mxu0 %v7282_v63 }
 0x4f1   :  { %4988 = vmatpush1.bf16.msra.mxu1 %v6340_v20  ;;  %5047 = vmatpush3.bf16.msra.mxu0 %v6497_v55 }
 0x4f2   :  { %4990 = vmatprep.subr.bf16.mxu1 %v7289_v18  ;;  %5048 = vmatprep.subr.bf16.mxu0 %v7282_v63 }
 0x4f5   :  { %4992 = vmatpush1.bf16.msra.mxu1 %v7292_v6  ;;  %5050 = vmatpush3.bf16.msra.mxu0 %v6501_v54 }
 0x4f6   :  { %4994 = vmatprep.subr.bf16.mxu1 %v7293_v39  ;;  %5051 = vmatprep.subr.bf16.mxu0 %v7282_v63 }
 0x4f9   :  { %4996 = vmatpush1.bf16.msra.mxu1 %v7296_v23  ;;  %5053 = vmatpush3.bf16.msra.mxu0 %v6505_v47 }
 0x4fa   :  { %4998 = vmatprep.subr.bf16.mxu1 %v6358_v41  ;;  %5054 = vmatprep.subr.bf16.mxu0 %v7282_v63 }
 0x4fd   :  { %5000 = vmatpush1.bf16.msra.mxu1 %v6361_v4  ;;  %5056 = vmatpush3.bf16.msra.mxu0 %v6509_v38 }
 0x4fe   :  { %5058 = vmatprep.subr.bf16.mxu1 %v6215_v29  ;;  %5154 = vmatprep.subr.bf16.mxu0 %v6422_v57 }
 0x500   :  { %1755 = vmatmul.mubr.f32.vlgmr.msra.gmra.mrb[6].mxu1 %v5881_v16  ;;  %4211 = vmatmul.mubr.f32.vlgmr.msra.gmra.mrb[46].mxu0 %v5881_v16  ;;  %v7369_v16 = vld [vmem:[#allocation27_spill] sm:$0xff] }
 0x501   :  { %5060 = vmatpush1.bf16.msra.mxu1 %v6218_v35  ;;  %5156 = vmatpush3.bf16.msra.mxu0 %v6425_v56 }
 0x502   :  { %5062 = vmatprep.subr.bf16.mxu1 %v6220_v36  ;;  %5158 = vmatprep.subr.bf16.mxu0 %v6428_v32 }
 0x505   :  { %5064 = vmatpush1.bf16.msra.mxu1 %v6224_v43  ;;  %5160 = vmatpush3.bf16.msra.mxu0 %v6432_v50 }
 0x506   :  { %5066 = vmatprep.subr.bf16.mxu1 %v6227_v44  ;;  %5162 = vmatprep.subr.bf16.mxu0 %v6435_v19 }
 0x509   :  { %5068 = vmatpush1.bf16.msra.mxu1 %v6230_v52  ;;  %5164 = vmatpush3.bf16.msra.mxu0 %v6440_v5 }
 0x50a   :  { %5070 = vmatprep.subr.bf16.mxu1 %v6233_v53  ;;  %5166 = vmatprep.subr.bf16.mxu0 %v6443_v27 }
 0x50d   :  { %5072 = vmatpush1.bf16.msra.mxu1 %v6236_v59  ;;  %5168 = vmatpush3.bf16.msra.mxu0 %v6448_v13 }
 0x50e   :  { %5074 = vmatprep.subr.bf16.mxu1 %v6239_v60  ;;  %5170 = vmatprep.subr.bf16.mxu0 %v6451_v51 }
 0x511   :  { %5076 = vmatpush1.bf16.msra.mxu1 %v6242_v1  ;;  %5172 = vmatpush3.bf16.msra.mxu0 %v6455_v26 }
 0x512   :  { %5078 = vmatprep.subr.bf16.mxu1 %v6245_v2  ;;  %5174 = vmatprep.subr.bf16.mxu0 %v6459_v42 }
 0x515   :  { %5080 = vmatpush1.bf16.msra.mxu1 %v7354_v17  ;;  %5176 = vmatpush3.bf16.msra.mxu0 %v7355_v8  ;;  %v7381_v8 = vld [vmem:[#allocation52_spill] sm:$0xff]  ;;  %v7382_v17 = vld [vmem:[#allocation39_spill] sm:$0xff] }
 0x516   :  { %5082 = vmatprep.subr.bf16.mxu1 %v7356_v28  ;;  %5178 = vmatprep.subr.bf16.mxu0 %v7357_v9 }
 0x519   :  { %5084 = vmatpush1.bf16.msra.mxu1 %v7358_v15  ;;  %5180 = vmatpush3.bf16.msra.mxu0 %v7359_v12  ;;  %v7375_v12 = vld [vmem:[#allocation33_spill] sm:$0xff] }
 0x51a   :  { %5086 = vmatprep.subr.bf16.mxu1 %v7360_v45  ;;  %5182 = vmatprep.subr.bf16.mxu0 %v7361_v0  ;;  %v7370_v45 = vld [vmem:[#allocation28_spill] sm:$0xff]  ;;  %v7371_v0 = vld [vmem:[#allocation29_spill] sm:$0xff] }
 0x51d   :  { %5088 = vmatpush1.bf16.msra.mxu1 %v7362_v30  ;;  %5184 = vmatpush3.bf16.msra.mxu0 %v7363_v22  ;;  %v7372_v30 = vld [vmem:[#allocation30_spill] sm:$0xff]  ;;  %v7373_v22 = vld [vmem:[#allocation31_spill] sm:$0xff] }
 0x51e   :  { %5090 = vmatprep.subr.bf16.mxu1 %v7364_v62  ;;  %5185 = vmatprep.subr.bf16.mxu0 %v7282_v63  ;;  %v7374_v62 = vld [vmem:[#allocation32_spill] sm:$0xff] }
 0x521   :  { %5092 = vmatpush1.bf16.msra.mxu1 %v7365_v46  ;;  %v7376_v46 = vld [vmem:[#allocation34_spill] sm:$0xff] }
 0x522   :  { %5094 = vmatprep.subr.bf16.mxu1 %v7366_v40  ;;  %v7377_v40 = vld [vmem:[#allocation35_spill] sm:$0xff] }
 0x525   :  { %5096 = vmatpush1.bf16.msra.mxu1 %v7367_v14  ;;  %v7378_v14 = vld [vmem:[#allocation36_spill] sm:$0xff] }
 0x526   :  { %5098 = vmatprep.subr.bf16.mxu1 %v7368_v7  ;;  %v7379_v7 = vld [vmem:[#allocation37_spill] sm:$0xff] }
 0x529   :  { %5100 = vmatpush1.bf16.msra.mxu1 %v7369_v16 }
 0x52a   :  { %5102 = vmatprep.subr.bf16.mxu1 %v7370_v45 }
 0x52d   :  { %5104 = vmatpush1.bf16.msra.mxu1 %v7371_v0 }
 0x52e   :  { %5106 = vmatprep.subr.bf16.mxu1 %v7372_v30 }
 0x531   :  { %5108 = vmatpush1.bf16.msra.mxu1 %v7373_v22  ;;  %v7380_v22 = vld [vmem:[#allocation51_spill] sm:$0xff] }
 0x532   :  { %5110 = vmatprep.subr.bf16.mxu1 %v7374_v62 }
 0x535   :  { %5112 = vmatpush1.bf16.msra.mxu1 %v7375_v12 }
 0x536   :  { %5114 = vmatprep.subr.bf16.mxu1 %v7376_v46 }
 0x539   :  { %5116 = vmatpush1.bf16.msra.mxu1 %v7377_v40 }
 0x53a   :  { %5118 = vmatprep.subr.bf16.mxu1 %v7378_v14 }
 0x53d   :  { %5120 = vmatpush1.bf16.msra.mxu1 %v7379_v7 }
 0x53e   :  { %5122 = vmatprep.subr.bf16.mxu1 %v7324_v24 }
 0x5b3   :  { %v3722_v45 = vpop.f32.mrb[44].mxu0 }
 0x5b4   :  { %v3723_v0 = vpop.f32.mrb[45].mxu0 }
 0x5b5   :  { %v3724_v16 = vadd.f32 %v3723_v0, %v3722_v45  ;;  %v7388_v45 = vld [vmem:[#allocation45_spill] sm:$0xff]  ;;  %v7389_v0 = vld [vmem:[#allocation20_spill] sm:$0xff] }
 0x5d3   :  { %v1756_v30 = vpop.f32.mrb[6].mxu1  ;;  %v1897_v15 = vpop.f32.mrb[46].mxu0 }
 0x5d4   :  { %v5806_v9 = vadd.f32 %v1756_v30, %v7380_v22  ;;  %v1898_v62 = vadd.f32 %v3724_v16, %v1897_v15  ;;  %v1758_v28 = vpop.f32.mrb[7].mxu1  ;;  %v4212_v12 = vpop.f32.mrb[47].mxu0  ;;  %v7386_v15 = vld [vmem:[#allocation44_spill] sm:$0xff]  ;;  %v7390_v30 = vld [vmem:[#allocation46_spill] sm:$0xff]  ;;  %v7391_v22 = vld [vmem:[#allocation21_spill] sm:$0xff] }
 0x5d5   :  { %v5808_v46 = vadd.f32 %v1758_v28, %v7381_v8  ;;  %v7383_v8 = vld [vmem:[#allocation17_spill] sm:$0xff]  ;;  %v7384_v28 = vld [vmem:[#allocation43_spill] sm:$0xff]  ;;  %v7397_v16 = vld [vmem:[#allocation26_spill] sm:$0xff] }
 0x5d6   :  { %v1903_v40 = vadd.f32 %v1898_v62, %v7382_v17  ;;  %v7387_v12 = vld [vmem:[#allocation19_spill] sm:$0xff] }
 0x5d7   :  { %5882 = vtanh.f32 %v5808_v46  ;;  %v7392_v62 = vld [vmem:[#allocation47_spill] sm:$0xff]  ;;  %v7393_v46 = vld [vmem:[#allocation22_spill] sm:$0xff] }
 0x5d8   :  { %5884 = vtanh.f32 %v5806_v9  ;;  %v7385_v9 = vld [vmem:[#allocation18_spill] sm:$0xff] }
 0x5d9   :  { %5886 = vtanh.f32 %v1903_v40  ;;  %v7394_v40 = vld [vmem:[#allocation23_spill] sm:$0xff] }
 0x5e1   :  { %v5883_v14 = vpop.eup %5882 }
 0x5e2   :  { %v5885_v7 = vpop.eup %5884  ;;  %1977 = vmatprep.mubr.f32.mxu1 %v5883_v14  ;;  %2119 = vmatprep.mubr.f32.mxu0 %v5883_v14  ;;  %v7395_v14 = vld [vmem:[#allocation24_spill] sm:$0xff] }
 0x5e3   :  { %1978 = vmatmul.mubr.f32.vlgmr.msra.gmra.mrb[8].mxu1 %v5885_v7  ;;  %2120 = vmatmul.mubr.f32.vlgmr.msra.gmra.mrb[48].mxu0 %v5885_v7  ;;  %v5887_v17 = vpop.eup %5886  ;;  %v7396_v7 = vld [vmem:[#allocation25_spill] sm:$0xff] }
 0x5e4   :  { %5124 = vmatpush1.bf16.msra.mxu1 %v6314_v34  ;;  %5187 = vmatpush3.bf16.msra.mxu0 %v6478_v33 }
 0x5e5   :  { %5126 = vmatprep.subr.bf16.mxu1 %v6317_v37  ;;  %5188 = vmatprep.subr.bf16.mxu0 %v7282_v63 }
 0x5e6   :  { %2048 = vmatprep.mubr.f32.mxu1 %v7268_v3  ;;  %4245 = vmatprep.mubr.msk.f32.mxu0 %vm6067_vm8, %v7268_v3 }
 0x5e8   :  { %5128 = vmatpush1.bf16.msra.mxu1 %v6321_v48  ;;  %5190 = vmatpush3.bf16.msra.mxu0 %v6483_v21 }
 0x5e9   :  { %5130 = vmatprep.subr.bf16.mxu1 %v6325_v49  ;;  %5191 = vmatprep.subr.bf16.mxu0 %v7282_v63 }
 0x5ec   :  { %5132 = vmatpush1.bf16.msra.mxu1 %v6328_v58  ;;  %5193 = vmatpush3.bf16.msra.mxu0 %v6489_v25 }
 0x5ed   :  { %5134 = vmatprep.subr.bf16.mxu1 %v6331_v61  ;;  %5194 = vmatprep.subr.bf16.mxu0 %v7282_v63 }
 0x5f0   :  { %5136 = vmatpush1.bf16.msra.mxu1 %v6334_v10  ;;  %5196 = vmatpush3.bf16.msra.mxu0 %v6493_v31 }
 0x5f1   :  { %5138 = vmatprep.subr.bf16.mxu1 %v6337_v11  ;;  %5197 = vmatprep.subr.bf16.mxu0 %v7282_v63 }
 0x5f4   :  { %5140 = vmatpush1.bf16.msra.mxu1 %v6340_v20  ;;  %5199 = vmatpush3.bf16.msra.mxu0 %v6497_v55 }
 0x5f5   :  { %5142 = vmatprep.subr.bf16.mxu1 %v7289_v18  ;;  %5200 = vmatprep.subr.bf16.mxu0 %v7282_v63 }
 0x5f8   :  { %5144 = vmatpush1.bf16.msra.mxu1 %v7292_v6  ;;  %5202 = vmatpush3.bf16.msra.mxu0 %v6501_v54 }
 0x5f9   :  { %5146 = vmatprep.subr.bf16.mxu1 %v7293_v39  ;;  %5203 = vmatprep.subr.bf16.mxu0 %v7282_v63 }
 0x5fc   :  { %5148 = vmatpush1.bf16.msra.mxu1 %v7296_v23  ;;  %5205 = vmatpush3.bf16.msra.mxu0 %v6505_v47 }
 0x5fd   :  { %5150 = vmatprep.subr.bf16.mxu1 %v6358_v41  ;;  %5206 = vmatprep.subr.bf16.mxu0 %v7282_v63 }
 0x600   :  { %5152 = vmatpush1.bf16.msra.mxu1 %v6361_v4  ;;  %5208 = vmatpush3.bf16.msra.mxu0 %v6509_v38 }
 0x601   :  { %5210 = vmatprep.subr.bf16.mxu1 %v6215_v29  ;;  %5306 = vmatprep.subr.bf16.mxu0 %v6422_v57 }
 0x603   :  { %2049 = vmatmul.mubr.f32.vlgmr.msra.gmra.mrb[8].mxu1 %v5887_v17  ;;  %4246 = vmatmul.mubr.f32.vlgmr.msra.gmra.mrb[50].mxu0 %v5887_v17  ;;  %v7398_v17 = vld [vmem:[#allocation27_spill] sm:$0xff] }
 0x604   :  { %5212 = vmatpush1.bf16.msra.mxu1 %v6218_v35  ;;  %5308 = vmatpush3.bf16.msra.mxu0 %v6425_v56 }
 0x605   :  { %5214 = vmatprep.subr.bf16.mxu1 %v6220_v36  ;;  %5310 = vmatprep.subr.bf16.mxu0 %v6428_v32 }
 0x608   :  { %5216 = vmatpush1.bf16.msra.mxu1 %v6224_v43  ;;  %5312 = vmatpush3.bf16.msra.mxu0 %v6432_v50 }
 0x609   :  { %5218 = vmatprep.subr.bf16.mxu1 %v6227_v44  ;;  %5314 = vmatprep.subr.bf16.mxu0 %v6435_v19 }
 0x60c   :  { %5220 = vmatpush1.bf16.msra.mxu1 %v6230_v52  ;;  %5316 = vmatpush3.bf16.msra.mxu0 %v6440_v5 }
 0x60d   :  { %5222 = vmatprep.subr.bf16.mxu1 %v6233_v53  ;;  %5318 = vmatprep.subr.bf16.mxu0 %v6443_v27 }
 0x610   :  { %5224 = vmatpush1.bf16.msra.mxu1 %v6236_v59  ;;  %5320 = vmatpush3.bf16.msra.mxu0 %v6448_v13 }
 0x611   :  { %5226 = vmatprep.subr.bf16.mxu1 %v6239_v60  ;;  %5322 = vmatprep.subr.bf16.mxu0 %v6451_v51 }
 0x614   :  { %5228 = vmatpush1.bf16.msra.mxu1 %v6242_v1  ;;  %5324 = vmatpush3.bf16.msra.mxu0 %v6455_v26 }
 0x615   :  { %5230 = vmatprep.subr.bf16.mxu1 %v6245_v2  ;;  %5326 = vmatprep.subr.bf16.mxu0 %v6459_v42 }
 0x618   :  { %5232 = vmatpush1.bf16.msra.mxu1 %v7383_v8  ;;  %5328 = vmatpush3.bf16.msra.mxu0 %v7384_v28  ;;  %v7410_v28 = vld [vmem:[#allocation54_spill] sm:$0xff]  ;;  %v7411_v8 = vld [vmem:[#allocation41_spill] sm:$0xff] }
 0x619   :  { %5234 = vmatprep.subr.bf16.mxu1 %v7385_v9  ;;  %5330 = vmatprep.subr.bf16.mxu0 %v7386_v15 }
 0x61c   :  { %5236 = vmatpush1.bf16.msra.mxu1 %v7387_v12  ;;  %5332 = vmatpush3.bf16.msra.mxu0 %v7388_v45  ;;  %v7404_v45 = vld [vmem:[#allocation33_spill] sm:$0xff] }
 0x61d   :  { %5238 = vmatprep.subr.bf16.mxu1 %v7389_v0  ;;  %5334 = vmatprep.subr.bf16.mxu0 %v7390_v30  ;;  %v7399_v0 = vld [vmem:[#allocation28_spill] sm:$0xff]  ;;  %v7400_v30 = vld [vmem:[#allocation29_spill] sm:$0xff] }
 0x620   :  { %5240 = vmatpush1.bf16.msra.mxu1 %v7391_v22  ;;  %5336 = vmatpush3.bf16.msra.mxu0 %v7392_v62  ;;  %v7401_v22 = vld [vmem:[#allocation30_spill] sm:$0xff]  ;;  %v7402_v62 = vld [vmem:[#allocation31_spill] sm:$0xff] }
 0x621   :  { %5242 = vmatprep.subr.bf16.mxu1 %v7393_v46  ;;  %5337 = vmatprep.subr.bf16.mxu0 %v7282_v63  ;;  %v7403_v46 = vld [vmem:[#allocation32_spill] sm:$0xff] }
 0x624   :  { %5244 = vmatpush1.bf16.msra.mxu1 %v7394_v40  ;;  %v7405_v40 = vld [vmem:[#allocation34_spill] sm:$0xff] }
 0x625   :  { %5246 = vmatprep.subr.bf16.mxu1 %v7395_v14  ;;  %v7406_v14 = vld [vmem:[#allocation35_spill] sm:$0xff] }
 0x628   :  { %5248 = vmatpush1.bf16.msra.mxu1 %v7396_v7  ;;  %v7407_v7 = vld [vmem:[#allocation36_spill] sm:$0xff] }
 0x629   :  { %5250 = vmatprep.subr.bf16.mxu1 %v7397_v16  ;;  %v7408_v16 = vld [vmem:[#allocation37_spill] sm:$0xff] }
 0x62c   :  { %5252 = vmatpush1.bf16.msra.mxu1 %v7398_v17 }
 0x62d   :  { %5254 = vmatprep.subr.bf16.mxu1 %v7399_v0 }
 0x630   :  { %5256 = vmatpush1.bf16.msra.mxu1 %v7400_v30 }
 0x631   :  { %5258 = vmatprep.subr.bf16.mxu1 %v7401_v22 }
 0x634   :  { %5260 = vmatpush1.bf16.msra.mxu1 %v7402_v62  ;;  %v7409_v62 = vld [vmem:[#allocation53_spill] sm:$0xff] }
 0x635   :  { %5262 = vmatprep.subr.bf16.mxu1 %v7403_v46 }
 0x638   :  { %5264 = vmatpush1.bf16.msra.mxu1 %v7404_v45 }
 0x639   :  { %5266 = vmatprep.subr.bf16.mxu1 %v7405_v40 }
 0x63c   :  { %5268 = vmatpush1.bf16.msra.mxu1 %v7406_v14 }
 0x63d   :  { %5270 = vmatprep.subr.bf16.mxu1 %v7407_v7 }
 0x640   :  { %5272 = vmatpush1.bf16.msra.mxu1 %v7408_v16 }
 0x641   :  { %5274 = vmatprep.subr.bf16.mxu1 %v7324_v24 }
 0x6b6   :  { %v3774_v0 = vpop.f32.mrb[48].mxu0 }
 0x6b7   :  { %v3775_v30 = vpop.f32.mrb[49].mxu0 }
 0x6b8   :  { %v3776_v17 = vadd.f32 %v3775_v30, %v3774_v0  ;;  %v7417_v0 = vld [vmem:[#allocation45_spill] sm:$0xff]  ;;  %v7418_v30 = vld [vmem:[#allocation20_spill] sm:$0xff] }
 0x6d6   :  { %v2050_v22 = vpop.f32.mrb[8].mxu1  ;;  %v2191_v12 = vpop.f32.mrb[50].mxu0 }
 0x6d7   :  { %v5810_v15 = vadd.f32 %v2050_v22, %v7409_v62  ;;  %v2192_v46 = vadd.f32 %v3776_v17, %v2191_v12  ;;  %v2052_v9 = vpop.f32.mrb[9].mxu1  ;;  %v4247_v45 = vpop.f32.mrb[51].mxu0  ;;  %v7415_v12 = vld [vmem:[#allocation44_spill] sm:$0xff]  ;;  %v7419_v22 = vld [vmem:[#allocation46_spill] sm:$0xff]  ;;  %v7420_v62 = vld [vmem:[#allocation21_spill] sm:$0xff] }
 0x6d8   :  { %v5812_v40 = vadd.f32 %v2052_v9, %v7410_v28  ;;  %v7412_v28 = vld [vmem:[#allocation17_spill] sm:$0xff]  ;;  %v7413_v9 = vld [vmem:[#allocation43_spill] sm:$0xff]  ;;  %v7426_v17 = vld [vmem:[#allocation26_spill] sm:$0xff] }
 0x6d9   :  { %v2197_v14 = vadd.f32 %v2192_v46, %v7411_v8  ;;  %v7416_v45 = vld [vmem:[#allocation19_spill] sm:$0xff] }
 0x6da   :  { %5888 = vtanh.f32 %v5812_v40  ;;  %v7421_v46 = vld [vmem:[#allocation47_spill] sm:$0xff]  ;;  %v7422_v40 = vld [vmem:[#allocation22_spill] sm:$0xff] }
 0x6db   :  { %5890 = vtanh.f32 %v5810_v15  ;;  %v7414_v15 = vld [vmem:[#allocation18_spill] sm:$0xff] }
 0x6dc   :  { %5892 = vtanh.f32 %v2197_v14  ;;  %v7423_v14 = vld [vmem:[#allocation23_spill] sm:$0xff] }
 0x6e4   :  { %v5889_v7 = vpop.eup %5888 }
 0x6e5   :  { %v5891_v16 = vpop.eup %5890  ;;  %2271 = vmatprep.mubr.f32.mxu1 %v5889_v7  ;;  %2413 = vmatprep.mubr.f32.mxu0 %v5889_v7  ;;  %v7424_v7 = vld [vmem:[#allocation24_spill] sm:$0xff] }
 0x6e6   :  { %2272 = vmatmul.mubr.f32.vlgmr.msra.gmra.mrb[10].mxu1 %v5891_v16  ;;  %2414 = vmatmul.mubr.f32.vlgmr.msra.gmra.mrb[52].mxu0 %v5891_v16  ;;  %v5893_v8 = vpop.eup %5892  ;;  %v7425_v16 = vld [vmem:[#allocation25_spill] sm:$0xff] }
 0x6e7   :  { %5276 = vmatpush1.bf16.msra.mxu1 %v6314_v34  ;;  %5339 = vmatpush3.bf16.msra.mxu0 %v6478_v33 }
 0x6e8   :  { %5278 = vmatprep.subr.bf16.mxu1 %v6317_v37  ;;  %5340 = vmatprep.subr.bf16.mxu0 %v7282_v63 }
 0x6e9   :  { %2342 = vmatprep.mubr.f32.mxu1 %v7268_v3  ;;  %4280 = vmatprep.mubr.msk.f32.mxu0 %vm6067_vm8, %v7268_v3 }
 0x6eb   :  { %5280 = vmatpush1.bf16.msra.mxu1 %v6321_v48  ;;  %5342 = vmatpush3.bf16.msra.mxu0 %v6483_v21 }
 0x6ec   :  { %5282 = vmatprep.subr.bf16.mxu1 %v6325_v49  ;;  %5343 = vmatprep.subr.bf16.mxu0 %v7282_v63 }
 0x6ef   :  { %5284 = vmatpush1.bf16.msra.mxu1 %v6328_v58  ;;  %5345 = vmatpush3.bf16.msra.mxu0 %v6489_v25 }
 0x6f0   :  { %5286 = vmatprep.subr.bf16.mxu1 %v6331_v61  ;;  %5346 = vmatprep.subr.bf16.mxu0 %v7282_v63 }
 0x6f3   :  { %5288 = vmatpush1.bf16.msra.mxu1 %v6334_v10  ;;  %5348 = vmatpush3.bf16.msra.mxu0 %v6493_v31 }
 0x6f4   :  { %5290 = vmatprep.subr.bf16.mxu1 %v6337_v11  ;;  %5349 = vmatprep.subr.bf16.mxu0 %v7282_v63 }
 0x6f7   :  { %5292 = vmatpush1.bf16.msra.mxu1 %v6340_v20  ;;  %5351 = vmatpush3.bf16.msra.mxu0 %v6497_v55 }
 0x6f8   :  { %5294 = vmatprep.subr.bf16.mxu1 %v7289_v18  ;;  %5352 = vmatprep.subr.bf16.mxu0 %v7282_v63 }
 0x6fb   :  { %5296 = vmatpush1.bf16.msra.mxu1 %v7292_v6  ;;  %5354 = vmatpush3.bf16.msra.mxu0 %v6501_v54 }
 0x6fc   :  { %5298 = vmatprep.subr.bf16.mxu1 %v7293_v39  ;;  %5355 = vmatprep.subr.bf16.mxu0 %v7282_v63 }
 0x6ff   :  { %5300 = vmatpush1.bf16.msra.mxu1 %v7296_v23  ;;  %5357 = vmatpush3.bf16.msra.mxu0 %v6505_v47 }
 0x700   :  { %5302 = vmatprep.subr.bf16.mxu1 %v6358_v41  ;;  %5358 = vmatprep.subr.bf16.mxu0 %v7282_v63 }
 0x703   :  { %5304 = vmatpush1.bf16.msra.mxu1 %v6361_v4  ;;  %5360 = vmatpush3.bf16.msra.mxu0 %v6509_v38 }
 0x704   :  { %5362 = vmatprep.subr.bf16.mxu1 %v6215_v29  ;;  %5458 = vmatprep.subr.bf16.mxu0 %v6422_v57 }
 0x706   :  { %2343 = vmatmul.mubr.f32.vlgmr.msra.gmra.mrb[10].mxu1 %v5893_v8  ;;  %4281 = vmatmul.mubr.f32.vlgmr.msra.gmra.mrb[54].mxu0 %v5893_v8  ;;  %v7427_v8 = vld [vmem:[#allocation27_spill] sm:$0xff] }
 0x707   :  { %5364 = vmatpush1.bf16.msra.mxu1 %v6218_v35  ;;  %5460 = vmatpush3.bf16.msra.mxu0 %v6425_v56 }
 0x708   :  { %5366 = vmatprep.subr.bf16.mxu1 %v6220_v36  ;;  %5462 = vmatprep.subr.bf16.mxu0 %v6428_v32 }
 0x70b   :  { %5368 = vmatpush1.bf16.msra.mxu1 %v6224_v43  ;;  %5464 = vmatpush3.bf16.msra.mxu0 %v6432_v50 }
 0x70c   :  { %5370 = vmatprep.subr.bf16.mxu1 %v6227_v44  ;;  %5466 = vmatprep.subr.bf16.mxu0 %v6435_v19 }
 0x70f   :  { %5372 = vmatpush1.bf16.msra.mxu1 %v6230_v52  ;;  %5468 = vmatpush3.bf16.msra.mxu0 %v6440_v5 }
 0x710   :  { %5374 = vmatprep.subr.bf16.mxu1 %v6233_v53  ;;  %5470 = vmatprep.subr.bf16.mxu0 %v6443_v27 }
 0x713   :  { %5376 = vmatpush1.bf16.msra.mxu1 %v6236_v59  ;;  %5472 = vmatpush3.bf16.msra.mxu0 %v6448_v13 }
 0x714   :  { %5378 = vmatprep.subr.bf16.mxu1 %v6239_v60  ;;  %5474 = vmatprep.subr.bf16.mxu0 %v6451_v51 }
 0x717   :  { %5380 = vmatpush1.bf16.msra.mxu1 %v6242_v1  ;;  %5476 = vmatpush3.bf16.msra.mxu0 %v6455_v26 }
 0x718   :  { %5382 = vmatprep.subr.bf16.mxu1 %v6245_v2  ;;  %5478 = vmatprep.subr.bf16.mxu0 %v6459_v42 }
 0x71b   :  { %5384 = vmatpush1.bf16.msra.mxu1 %v7412_v28  ;;  %5480 = vmatpush3.bf16.msra.mxu0 %v7413_v9  ;;  %v7439_v9 = vld [vmem:[#allocation56_spill] sm:$0xff] }
 0x71c   :  { %5386 = vmatprep.subr.bf16.mxu1 %v7414_v15  ;;  %5482 = vmatprep.subr.bf16.mxu0 %v7415_v12  ;;  %v7440_v28 = vld [vmem:[#allocation40_spill] sm:$0xff] }
 0x71f   :  { %5388 = vmatpush1.bf16.msra.mxu1 %v7416_v45  ;;  %5484 = vmatpush3.bf16.msra.mxu0 %v7417_v0  ;;  %v7433_v0 = vld [vmem:[#allocation33_spill] sm:$0xff] }
 0x720   :  { %5390 = vmatprep.subr.bf16.mxu1 %v7418_v30  ;;  %5486 = vmatprep.subr.bf16.mxu0 %v7419_v22  ;;  %v7428_v30 = vld [vmem:[#allocation28_spill] sm:$0xff]  ;;  %v7429_v22 = vld [vmem:[#allocation29_spill] sm:$0xff] }
 0x723   :  { %5392 = vmatpush1.bf16.msra.mxu1 %v7420_v62  ;;  %5488 = vmatpush3.bf16.msra.mxu0 %v7421_v46  ;;  %v7430_v62 = vld [vmem:[#allocation30_spill] sm:$0xff]  ;;  %v7431_v46 = vld [vmem:[#allocation31_spill] sm:$0xff] }
 0x724   :  { %5394 = vmatprep.subr.bf16.mxu1 %v7422_v40  ;;  %5489 = vmatprep.subr.bf16.mxu0 %v7282_v63  ;;  %v7432_v40 = vld [vmem:[#allocation32_spill] sm:$0xff] }
 0x727   :  { %5396 = vmatpush1.bf16.msra.mxu1 %v7423_v14  ;;  %v7434_v14 = vld [vmem:[#allocation34_spill] sm:$0xff] }
 0x728   :  { %5398 = vmatprep.subr.bf16.mxu1 %v7424_v7  ;;  %v7435_v7 = vld [vmem:[#allocation35_spill] sm:$0xff] }
 0x72b   :  { %5400 = vmatpush1.bf16.msra.mxu1 %v7425_v16  ;;  %v7436_v16 = vld [vmem:[#allocation36_spill] sm:$0xff] }
 0x72c   :  { %5402 = vmatprep.subr.bf16.mxu1 %v7426_v17  ;;  %v7437_v17 = vld [vmem:[#allocation37_spill] sm:$0xff] }
 0x72f   :  { %5404 = vmatpush1.bf16.msra.mxu1 %v7427_v8 }
 0x730   :  { %5406 = vmatprep.subr.bf16.mxu1 %v7428_v30 }
 0x733   :  { %5408 = vmatpush1.bf16.msra.mxu1 %v7429_v22 }
 0x734   :  { %5410 = vmatprep.subr.bf16.mxu1 %v7430_v62 }
 0x737   :  { %5412 = vmatpush1.bf16.msra.mxu1 %v7431_v46  ;;  %v7438_v46 = vld [vmem:[#allocation55_spill] sm:$0xff] }
 0x738   :  { %5414 = vmatprep.subr.bf16.mxu1 %v7432_v40 }
 0x73b   :  { %5416 = vmatpush1.bf16.msra.mxu1 %v7433_v0 }
 0x73c   :  { %5418 = vmatprep.subr.bf16.mxu1 %v7434_v14 }
 0x73f   :  { %5420 = vmatpush1.bf16.msra.mxu1 %v7435_v7 }
 0x740   :  { %5422 = vmatprep.subr.bf16.mxu1 %v7436_v16 }
 0x743   :  { %5424 = vmatpush1.bf16.msra.mxu1 %v7437_v17 }
 0x744   :  { %5426 = vmatprep.subr.bf16.mxu1 %v7324_v24 }
 0x7b9   :  { %v3826_v30 = vpop.f32.mrb[52].mxu0 }
 0x7ba   :  { %v3827_v22 = vpop.f32.mrb[53].mxu0 }
 0x7bb   :  { %v3828_v8 = vadd.f32 %v3827_v22, %v3826_v30 }
 0x7d9   :  { %v2344_v62 = vpop.f32.mrb[10].mxu1  ;;  %v2485_v45 = vpop.f32.mrb[54].mxu0 }
 0x7da   :  { %v5814_v12 = vadd.f32 %v2344_v62, %v7438_v46  ;;  %v2486_v40 = vadd.f32 %v3828_v8, %v2485_v45  ;;  %v2346_v15 = vpop.f32.mrb[11].mxu1  ;;  %v4282_v0 = vpop.f32.mrb[55].mxu0  ;;  %v7466_v45 = vld [vmem:[#allocation37_spill] sm:$0xff]  ;;  %v7468_v8 = vld [vmem:[#allocation58_spill] sm:$0xff] }
 0x7db   :  { %v5816_v14 = vadd.f32 %v2346_v15, %v7439_v9  ;;  %v7463_v9 = vld [vmem:[#allocation34_spill] sm:$0xff]  ;;  %v7464_v15 = vld [vmem:[#allocation35_spill] sm:$0xff] }
 0x7dc   :  { %v2491_v7 = vadd.f32 %v2486_v40, %v7440_v28  ;;  %v7467_v40 = vld [vmem:[#allocation57_spill] sm:$0xff] }
 0x7dd   :  { %5894 = vtanh.f32 %v5816_v14 }
 0x7de   :  { %5896 = vtanh.f32 %v5814_v12  ;;  %v7465_v12 = vld [vmem:[#allocation36_spill] sm:$0xff] }
 0x7df   :  { %5898 = vtanh.f32 %v2491_v7 }
 0x7e7   :  { %v5895_v16 = vpop.eup %5894 }
 0x7e8   :  { %v5897_v17 = vpop.eup %5896  ;;  %2565 = vmatprep.mubr.f32.mxu1 %v5895_v16  ;;  %2707 = vmatprep.mubr.f32.mxu0 %v5895_v16 }
 0x7e9   :  { %2566 = vmatmul.mubr.f32.vlgmr.msra.gmra.mrb[12].mxu1 %v5897_v17  ;;  %2708 = vmatmul.mubr.f32.vlgmr.msra.gmra.mrb[56].mxu0 %v5897_v17  ;;  %v5899_v28 = vpop.eup %5898 }
 0x7ea   :  { %5428 = vmatpush1.bf16.msra.mxu1 %v6314_v34  ;;  %5491 = vmatpush3.bf16.msra.mxu0 %v6478_v33 }
 0x7eb   :  { %5430 = vmatprep.subr.bf16.mxu1 %v6317_v37  ;;  %5492 = vmatprep.subr.bf16.mxu0 %v7282_v63 }
 0x7ec   :  { %2636 = vmatprep.mubr.f32.mxu1 %v7268_v3  ;;  %4315 = vmatprep.mubr.msk.f32.mxu0 %vm6067_vm8, %v7268_v3 }
 0x7ee   :  { %5432 = vmatpush1.bf16.msra.mxu1 %v6321_v48  ;;  %5494 = vmatpush3.bf16.msra.mxu0 %v6483_v21 }
 0x7ef   :  { %5434 = vmatprep.subr.bf16.mxu1 %v6325_v49  ;;  %5495 = vmatprep.subr.bf16.mxu0 %v7282_v63 }
 0x7f2   :  { %5436 = vmatpush1.bf16.msra.mxu1 %v6328_v58  ;;  %5497 = vmatpush3.bf16.msra.mxu0 %v6489_v25 }
 0x7f3   :  { %5438 = vmatprep.subr.bf16.mxu1 %v6331_v61  ;;  %5498 = vmatprep.subr.bf16.mxu0 %v7282_v63 }
 0x7f6   :  { %5440 = vmatpush1.bf16.msra.mxu1 %v6334_v10  ;;  %5500 = vmatpush3.bf16.msra.mxu0 %v6493_v31 }
 0x7f7   :  { %5442 = vmatprep.subr.bf16.mxu1 %v6337_v11  ;;  %5501 = vmatprep.subr.bf16.mxu0 %v7282_v63 }
 0x7fa   :  { %5444 = vmatpush1.bf16.msra.mxu1 %v6340_v20  ;;  %5503 = vmatpush3.bf16.msra.mxu0 %v6497_v55 }
 0x7fb   :  { %5446 = vmatprep.subr.bf16.mxu1 %v7289_v18  ;;  %5504 = vmatprep.subr.bf16.mxu0 %v7282_v63 }
 0x7fe   :  { %5448 = vmatpush1.bf16.msra.mxu1 %v7292_v6  ;;  %5506 = vmatpush3.bf16.msra.mxu0 %v6501_v54 }
 0x7ff   :  { %5450 = vmatprep.subr.bf16.mxu1 %v7293_v39  ;;  %5507 = vmatprep.subr.bf16.mxu0 %v7282_v63 }
 0x802   :  { %5452 = vmatpush1.bf16.msra.mxu1 %v7296_v23  ;;  %5509 = vmatpush3.bf16.msra.mxu0 %v6505_v47 }
 0x803   :  { %5454 = vmatprep.subr.bf16.mxu1 %v6358_v41  ;;  %5510 = vmatprep.subr.bf16.mxu0 %v7282_v63 }
 0x806   :  { %5456 = vmatpush1.bf16.msra.mxu1 %v6361_v4  ;;  %5512 = vmatpush3.bf16.msra.mxu0 %v6509_v38 }
 0x807   :  { %5514 = vmatprep.subr.bf16.mxu1 %v6215_v29  ;;  %5610 = vmatprep.subr.bf16.mxu0 %v6422_v57  ;;  %v7441_v29 = vld [vmem:[#allocation17_spill] sm:$0xff]  ;;  %v7452_v57 = vld [vmem:[#allocation23_spill] sm:$0xff] }
 0x809   :  { %2637 = vmatmul.mubr.f32.vlgmr.msra.gmra.mrb[12].mxu1 %v5899_v28  ;;  %4316 = vmatmul.mubr.f32.vlgmr.msra.gmra.mrb[58].mxu0 %v5899_v28 }
 0x80a   :  { %5516 = vmatpush1.bf16.msra.mxu1 %v6218_v35  ;;  %5612 = vmatpush3.bf16.msra.mxu0 %v6425_v56  ;;  %v7442_v35 = vld [vmem:[#allocation43_spill] sm:$0xff]  ;;  %v7453_v56 = vld [vmem:[#allocation24_spill] sm:$0xff] }
 0x80b   :  { %5518 = vmatprep.subr.bf16.mxu1 %v6220_v36  ;;  %5614 = vmatprep.subr.bf16.mxu0 %v6428_v32  ;;  %v7443_v36 = vld [vmem:[#allocation18_spill] sm:$0xff]  ;;  %v7454_v32 = vld [vmem:[#allocation25_spill] sm:$0xff] }
 0x80e   :  { %5520 = vmatpush1.bf16.msra.mxu1 %v6224_v43  ;;  %5616 = vmatpush3.bf16.msra.mxu0 %v6432_v50  ;;  %v7444_v43 = vld [vmem:[#allocation44_spill] sm:$0xff]  ;;  %v7455_v50 = vld [vmem:[#allocation26_spill] sm:$0xff] }
 0x80f   :  { %5522 = vmatprep.subr.bf16.mxu1 %v6227_v44  ;;  %5618 = vmatprep.subr.bf16.mxu0 %v6435_v19  ;;  %v7445_v44 = vld [vmem:[#allocation19_spill] sm:$0xff] }
 0x810   :  { %v7456_v19 = vld [vmem:[#allocation27_spill] sm:$0xff] }
 0x812   :  { %5524 = vmatpush1.bf16.msra.mxu1 %v6230_v52  ;;  %5620 = vmatpush3.bf16.msra.mxu0 %v6440_v5  ;;  %v7446_v52 = vld [vmem:[#allocation45_spill] sm:$0xff]  ;;  %v7457_v5 = vld [vmem:[#allocation28_spill] sm:$0xff] }
 0x813   :  { %5526 = vmatprep.subr.bf16.mxu1 %v6233_v53  ;;  %5622 = vmatprep.subr.bf16.mxu0 %v6443_v27  ;;  %v7447_v53 = vld [vmem:[#allocation20_spill] sm:$0xff]  ;;  %v7458_v27 = vld [vmem:[#allocation29_spill] sm:$0xff] }
 0x816   :  { %5528 = vmatpush1.bf16.msra.mxu1 %v6236_v59  ;;  %5624 = vmatpush3.bf16.msra.mxu0 %v6448_v13  ;;  %v7448_v59 = vld [vmem:[#allocation46_spill] sm:$0xff] }
 0x817   :  { %5530 = vmatprep.subr.bf16.mxu1 %v6239_v60  ;;  %5626 = vmatprep.subr.bf16.mxu0 %v6451_v51  ;;  %v7449_v60 = vld [vmem:[#allocation21_spill] sm:$0xff]  ;;  %v7459_v13 = vld [vmem:[#allocation30_spill] sm:$0xff]  ;;  %v7460_v51 = vld [vmem:[#allocation31_spill] sm:$0xff] }
 0x81a   :  { %5532 = vmatpush1.bf16.msra.mxu1 %v6242_v1  ;;  %5628 = vmatpush3.bf16.msra.mxu0 %v6455_v26  ;;  %v7450_v1 = vld [vmem:[#allocation47_spill] sm:$0xff]  ;;  %v7461_v26 = vld [vmem:[#allocation32_spill] sm:$0xff] }
 0x81b   :  { %5534 = vmatprep.subr.bf16.mxu1 %v6245_v2  ;;  %5630 = vmatprep.subr.bf16.mxu0 %v6459_v42  ;;  %v7451_v2 = vld [vmem:[#allocation22_spill] sm:$0xff]  ;;  %v7462_v42 = vld [vmem:[#allocation33_spill] sm:$0xff] }
 0x81e   :  { %5536 = vmatpush1.bf16.msra.mxu1 %v7441_v29  ;;  %5632 = vmatpush3.bf16.msra.mxu0 %v7442_v35  ;;  %v7469_v29 = vld [vmem:[#allocation62_spill] sm:$0xff] }
 0x81f   :  { %5538 = vmatprep.subr.bf16.mxu1 %v7443_v36  ;;  %5634 = vmatprep.subr.bf16.mxu0 %v7444_v43 }
 0x822   :  { %5540 = vmatpush1.bf16.msra.mxu1 %v7445_v44  ;;  %5636 = vmatpush3.bf16.msra.mxu0 %v7446_v52  ;;  %v3102_v44 = vld [vmem:[#allocation9 + $0x98] sm:$0xff] }
 0x823   :  { %5542 = vmatprep.subr.bf16.mxu1 %v7447_v53  ;;  %5638 = vmatprep.subr.bf16.mxu0 %v7448_v59  ;;  %v3099_v59 = vld [vmem:[#allocation9 + $0x80] sm:$0xff] }
 0x826   :  { %5544 = vmatpush1.bf16.msra.mxu1 %v7449_v60  ;;  %5640 = vmatpush3.bf16.msra.mxu0 %v7450_v1  ;;  %v3101_v60 = vld [vmem:[#allocation9 + $0x90] sm:$0xff] }
 0x827   :  { %5546 = vmatprep.subr.bf16.mxu1 %v7451_v2  ;;  %5641 = vmatprep.subr.bf16.mxu0 %v7282_v63  ;;  %v5683_v1 = vpack.c.bf16 %v3101_v60, %v3099_v59  ;;  %v3104_v2 = vld [vmem:[#allocation9 + $0xa8] sm:$0xff]  ;;  %v3146_v60 = vld [vmem:[#allocation9 + $0x1f8] sm:$0xff] }
 0x82a   :  { %5548 = vmatpush1.bf16.msra.mxu1 %v7452_v57  ;;  %v3106_v57 = vld [vmem:[#allocation9 + $0xb8] sm:$0xff] }
 0x82b   :  { %5550 = vmatprep.subr.bf16.mxu1 %v7453_v56  ;;  %v5685_v56 = vpack.c.bf16 %v3106_v57, %v3104_v2  ;;  %v3145_v2 = vld [vmem:[#allocation9 + $0x1f0] sm:$0xff] }
 0x82e   :  { %5552 = vmatpush1.bf16.msra.mxu1 %v7454_v32  ;;  %v3103_v32 = vld [vmem:[#allocation9 + $0xa0] sm:$0xff] }
 0x82f   :  { %5554 = vmatprep.subr.bf16.mxu1 %v7455_v50  ;;  %v3105_v50 = vld [vmem:[#allocation9 + $0xb0] sm:$0xff] }
 0x832   :  { %5556 = vmatpush1.bf16.msra.mxu1 %v7456_v19  ;;  %v5687_v19 = vpack.c.bf16 %v3105_v50, %v3103_v32  ;;  %v3148_v32 = vld [vmem:[#allocation9 + $0x208] sm:$0xff]  ;;  %v3150_v50 = vld [vmem:[#allocation9 + $0x218] sm:$0xff] }
 0x833   :  { %5558 = vmatprep.subr.bf16.mxu1 %v7457_v5  ;;  %v3108_v5 = vld [vmem:[#allocation9 + $0xc8] sm:$0xff] }
 0x836   :  { %5560 = vmatpush1.bf16.msra.mxu1 %v7458_v27  ;;  %v3110_v27 = vld [vmem:[#allocation9 + $0xd8] sm:$0xff] }
 0x837   :  { %5562 = vmatprep.subr.bf16.mxu1 %v7459_v13  ;;  %v3107_v13 = vld [vmem:[#allocation9 + $0xc0] sm:$0xff] }
 0x83a   :  { %5564 = vmatpush1.bf16.msra.mxu1 %v7460_v51  ;;  %v5689_v51 = vpack.c.bf16 %v3110_v27, %v3108_v5 }
 0x83b   :  { %5566 = vmatprep.subr.bf16.mxu1 %v7461_v26  ;;  %v3109_v26 = vld [vmem:[#allocation9 + $0xd0] sm:$0xff] }
 0x83e   :  { %5568 = vmatpush1.bf16.msra.mxu1 %v7462_v42  ;;  %v3112_v42 = vld [vmem:[#allocation9 + $0xe8] sm:$0xff] }
 0x83f   :  { %5570 = vmatprep.subr.bf16.mxu1 %v7463_v9  ;;  %v3114_v9 = vld [vmem:[#allocation9 + $0xf8] sm:$0xff] }
 0x842   :  { %5572 = vmatpush1.bf16.msra.mxu1 %v7464_v15  ;;  %v5691_v15 = vpack.c.bf16 %v3109_v26, %v3107_v13 }
 0x843   :  { %5574 = vmatprep.subr.bf16.mxu1 %v7465_v12  ;;  %v5693_v12 = vpack.c.bf16 %v3114_v9, %v3112_v42  ;;  %v7470_v42 = vld [vmem:[#allocation59_spill] sm:$0xff] }
 0x846   :  { %5576 = vmatpush1.bf16.msra.mxu1 %v7466_v45  ;;  %v3111_v45 = vld [vmem:[#allocation9 + $0xe0] sm:$0xff] }
 0x847   :  { %5578 = vmatprep.subr.bf16.mxu1 %v7324_v24  ;;  %v3100_v24 = vld [vmem:[#allocation9 + $0x88] sm:$0xff] }
 0x848   :  { %v5681_v53 = vpack.c.bf16 %v3102_v44, %v3100_v24  ;;  %v3139_v44 = vld [vmem:[#allocation9 + $0x1c0] sm:$0xff] }
 0x8bc   :  { %v3878_v0 = vpop.f32.mrb[56].mxu0 }
 0x8bd   :  { %v3879_v30 = vpop.f32.mrb[57].mxu0 }
 0x8be   :  { %v3880_v22 = vadd.f32 %v3879_v30, %v3878_v0  ;;  %v3113_v0 = vld [vmem:[#allocation9 + $0xf0] sm:$0xff]  ;;  %v3116_v30 = vld [vmem:[#allocation9 + $0x108] sm:$0xff] }
 0x8dc   :  { %v2638_v62 = vpop.f32.mrb[12].mxu1  ;;  %v2779_v46 = vpop.f32.mrb[58].mxu0 }
 0x8dd   :  { %v5818_v14 = vadd.f32 %v2638_v62, %v7467_v40  ;;  %v2780_v7 = vadd.f32 %v3880_v22, %v2779_v46  ;;  %v2640_v16 = vpop.f32.mrb[13].mxu1  ;;  %v4317_v17 = vpop.f32.mrb[59].mxu0  ;;  %v3118_v22 = vld [vmem:[#allocation9 + $0x118] sm:$0xff]  ;;  %v5695_v62 = vpack.c.bf16 %v3113_v0, %v3111_v45  ;;  %v3115_v40 = vld [vmem:[#allocation9 + $0x100] sm:$0xff] }
 0x8de   :  { %v5820_v28 = vadd.f32 %v2640_v16, %v7468_v8  ;;  %v5697_v46 = vpack.c.bf16 %v3118_v22, %v3116_v30  ;;  %v3122_v16 = vld [vmem:[#allocation9 + $0x138] sm:$0xff]  ;;  %v7471_v0 = vld [vmem:[#allocation60_spill] sm:$0xff]  ;;  %v7472_v22 = vld [vmem:[#allocation42_spill] sm:$0xff] }
 0x8df   :  { %v2785_v35 = vadd.f32 %v2780_v7, %v7469_v29  ;;  %v3120_v7 = vld [vmem:[#allocation9 + $0x128] sm:$0xff]  ;;  %v3121_v29 = vld [vmem:[#allocation9 + $0x130] sm:$0xff] }
 0x8e0   :  { %5900 = vtanh.f32 %v5820_v28  ;;  %v5701_v8 = vpack.c.bf16 %v3122_v16, %v3120_v7  ;;  %v3119_v28 = vld [vmem:[#allocation9 + $0x120] sm:$0xff]  ;;  %v3154_v7 = vld [vmem:[#allocation9 + $0x238] sm:$0xff] }
 0x8e1   :  { %5902 = vtanh.f32 %v5818_v14  ;;  %v3117_v14 = vld [vmem:[#allocation9 + $0x110] sm:$0xff] }
 0x8e2   :  { %5904 = vtanh.f32 %v2785_v35  ;;  %v5699_v17 = vpack.c.bf16 %v3117_v14, %v3115_v40  ;;  %v3124_v35 = vld [vmem:[#allocation9 + $0x148] sm:$0xff]  ;;  %v3149_v40 = vld [vmem:[#allocation9 + $0x210] sm:$0xff] }
 0x8e3   :  { %v3152_v14 = vld [vmem:[#allocation9 + $0x228] sm:$0xff] }
 0x8ea   :  { %v5901_v36 = vpop.eup %5900 }
 0x8eb   :  { %v5903_v43 = vpop.eup %5902  ;;  %2859 = vmatprep.mubr.f32.mxu1 %v5901_v36  ;;  %3001 = vmatprep.mubr.f32.mxu0 %v5901_v36  ;;  %v3126_v36 = vld [vmem:[#allocation9 + $0x158] sm:$0xff] }
 0x8ec   :  { %2860 = vmatmul.mubr.f32.vlgmr.msra.gmra.mrb[14].mxu1 %v5903_v43  ;;  %3002 = vmatmul.mubr.f32.vlgmr.msra.gmra.mrb[60].mxu0 %v5903_v43  ;;  %v5703_v43 = vpack.c.bf16 %v3121_v29, %v3119_v28  ;;  %v3151_v28 = vld [vmem:[#allocation9 + $0x220] sm:$0xff]  ;;  %v3153_v29 = vld [vmem:[#allocation9 + $0x230] sm:$0xff] }
 0x8ed   :  { %5580 = vmatpush1.bf16.msra.mxu1 %v6314_v34  ;;  %5643 = vmatpush3.bf16.msra.mxu0 %v6478_v33  ;;  %v3084_v34 = vld [vmem:[#allocation9 + $0x8] sm:$0xff]  ;;  %v5905_v33 = vpop.eup %5904 }
 0x8ee   :  { %5582 = vmatprep.subr.bf16.mxu1 %v6317_v37  ;;  %5644 = vmatprep.subr.bf16.mxu0 %v7282_v63  ;;  %v3086_v37 = vld [vmem:[#allocation9 + $0x18] sm:$0xff] }
 0x8ef   :  { %2930 = vmatprep.mubr.f32.mxu1 %v7268_v3  ;;  %4350 = vmatprep.mubr.msk.f32.mxu0 %vm6067_vm8, %v7268_v3 }
 0x8f1   :  { %5584 = vmatpush1.bf16.msra.mxu1 %v6321_v48  ;;  %5646 = vmatpush3.bf16.msra.mxu0 %v6483_v21  ;;  %v3083_v48 = vld [vmem:[#allocation9] sm:$0xff]  ;;  %v3094_v21 = vld [vmem:[#allocation9 + $0x58] sm:$0xff] }
 0x8f2   :  { %5586 = vmatprep.subr.bf16.mxu1 %v6325_v49  ;;  %5647 = vmatprep.subr.bf16.mxu0 %v7282_v63  ;;  %v3085_v49 = vld [vmem:[#allocation9 + $0x10] sm:$0xff] }
 0x8f5   :  { %5588 = vmatpush1.bf16.msra.mxu1 %v6328_v58  ;;  %5649 = vmatpush3.bf16.msra.mxu0 %v6489_v25  ;;  %v3088_v58 = vld [vmem:[#allocation9 + $0x28] sm:$0xff] }
 0x8f6   :  { %5590 = vmatprep.subr.bf16.mxu1 %v6331_v61  ;;  %5650 = vmatprep.subr.bf16.mxu0 %v7282_v63  ;;  %v3090_v61 = vld [vmem:[#allocation9 + $0x38] sm:$0xff] }
 0x8f9   :  { %5592 = vmatpush1.bf16.msra.mxu1 %v6334_v10  ;;  %5652 = vmatpush3.bf16.msra.mxu0 %v6493_v31  ;;  %v5669_v10 = vpack.c.bf16 %v3090_v61, %v3088_v58  ;;  %v3091_v31 = vld [vmem:[#allocation9 + $0x40] sm:$0xff] }
 0x8fa   :  { %5594 = vmatprep.subr.bf16.mxu1 %v6337_v11  ;;  %5653 = vmatprep.subr.bf16.mxu0 %v7282_v63  ;;  %v3087_v11 = vld [vmem:[#allocation9 + $0x20] sm:$0xff] }
 0x8fd   :  { %5596 = vmatpush1.bf16.msra.mxu1 %v6340_v20  ;;  %5655 = vmatpush3.bf16.msra.mxu0 %v6497_v55  ;;  %v5665_v55 = vpack.c.bf16 %v3086_v37, %v3084_v34  ;;  %v3089_v20 = vld [vmem:[#allocation9 + $0x30] sm:$0xff]  ;;  %v5705_v34 = vpack.c.bf16 %v3126_v36, %v3124_v35  ;;  %v3123_v37 = vld [vmem:[#allocation9 + $0x140] sm:$0xff]  ;;  %v3156_v36 = vld [vmem:[#allocation9 + $0x248] sm:$0xff] }
 0x8fe   :  { %5598 = vmatprep.subr.bf16.mxu1 %v7289_v18  ;;  %5656 = vmatprep.subr.bf16.mxu0 %v7282_v63  ;;  %v3095_v18 = vld [vmem:[#allocation9 + $0x60] sm:$0xff] }
 0x901   :  { %5600 = vmatpush1.bf16.msra.mxu1 %v7292_v6  ;;  %5658 = vmatpush3.bf16.msra.mxu0 %v6501_v54  ;;  %v5667_v54 = vpack.c.bf16 %v3085_v49, %v3083_v48  ;;  %v3097_v6 = vld [vmem:[#allocation9 + $0x70] sm:$0xff]  ;;  %v3128_v48 = vld [vmem:[#allocation9 + $0x168] sm:$0xff]  ;;  %v3130_v49 = vld [vmem:[#allocation9 + $0x178] sm:$0xff] }
 0x902   :  { %5602 = vmatprep.subr.bf16.mxu1 %v7293_v39  ;;  %5659 = vmatprep.subr.bf16.mxu0 %v7282_v63  ;;  %v5679_v52 = vpack.c.bf16 %v3097_v6, %v3095_v18  ;;  %v5709_v61 = vpack.c.bf16 %v3130_v49, %v3128_v48  ;;  %v3140_v18 = vld [vmem:[#allocation9 + $0x1c8] sm:$0xff]  ;;  %v3142_v6 = vld [vmem:[#allocation9 + $0x1d8] sm:$0xff]  ;;  %v3157_v48 = vld [vmem:[#allocation9 + $0x250] sm:$0xff] }
 0x903   :  { %v5721_v24 = vpack.c.bf16 %v3142_v6, %v3140_v18  ;;  %v3160_v49 = vld [vmem:[#allocation9 + $0x268] sm:$0xff]  ;;  %v3174_v18 = vld [vmem:[#allocation9 + $0x2d8] sm:$0xff] }
 0x905   :  { %5604 = vmatpush1.bf16.msra.mxu1 %v7296_v23  ;;  %5661 = vmatpush3.bf16.msra.mxu0 %v6505_v47  ;;  %v3092_v47 = vld [vmem:[#allocation9 + $0x48] sm:$0xff]  ;;  %v3093_v23 = vld [vmem:[#allocation9 + $0x50] sm:$0xff] }
 0x906   :  { %5606 = vmatprep.subr.bf16.mxu1 %v6358_v41  ;;  %5662 = vmatprep.subr.bf16.mxu0 %v7282_v63  ;;  %v5671_v41 = vpack.c.bf16 %v3089_v20, %v3087_v11  ;;  %v5673_v25 = vpack.c.bf16 %v3094_v21, %v3092_v47  ;;  %v3096_v63 = vld [vmem:[#allocation9 + $0x68] sm:$0xff]  ;;  %v3134_v20 = vld [vmem:[#allocation9 + $0x198] sm:$0xff]  ;;  %v3131_v21 = vld [vmem:[#allocation9 + $0x180] sm:$0xff] }
 0x907   :  { %v3132_v11 = vld [vmem:[#allocation9 + $0x188] sm:$0xff] }
 0x908   :  { %v5713_v47 = vpack.c.bf16 %v3134_v20, %v3132_v11  ;;  %v3161_v11 = vld [vmem:[#allocation9 + $0x270] sm:$0xff]  ;;  %v3164_v20 = vld [vmem:[#allocation9 + $0x288] sm:$0xff] }
 0x909   :  { %5608 = vmatpush1.bf16.msra.mxu1 %v6361_v4  ;;  %5664 = vmatpush3.bf16.msra.mxu0 %v6509_v38  ;;  %v3098_v4 = vld [vmem:[#allocation9 + $0x78] sm:$0xff]  ;;  %v5675_v38 = vpack.c.bf16 %v3093_v23, %v3091_v31  ;;  %v3136_v31 = vld [vmem:[#allocation9 + $0x1a8] sm:$0xff] }
 0x90a   :  { %5666 = vmatprep.subr.bf16.mxu0 %v5665_v55  ;;  %v5677_v39 = vpack.c.bf16 %v3098_v4, %v3096_v63  ;;  %v3125_v55 = vld [vmem:[#allocation9 + $0x150] sm:$0xff]  ;;  %v3138_v23 = vld [vmem:[#allocation9 + $0x1b8] sm:$0xff]  ;;  %v3135_v4 = vld [vmem:[#allocation9 + $0x1a0] sm:$0xff] }
 0x90b   :  { %v5707_v58 = vpack.c.bf16 %v3125_v55, %v3123_v37  ;;  %v5717_v63 = vpack.c.bf16 %v3138_v23, %v3136_v31  ;;  %v3155_v55 = vld [vmem:[#allocation9 + $0x240] sm:$0xff]  ;;  %v3170_v31 = vld [vmem:[#allocation9 + $0x2b8] sm:$0xff] }
 0x90c   :  { %2931 = vmatmul.mubr.f32.vlgmr.msra.gmra.mrb[14].mxu1 %v5905_v33  ;;  %4351 = vmatmul.mubr.f32.vlgmr.msra.gmra.mrb[62].mxu0 %v5905_v33 }
 0x90d   :  { %5668 = vmatpush1.bf16.msra.mxu0 %v5667_v54  ;;  %v3127_v54 = vld [vmem:[#allocation9 + $0x160] sm:$0xff] }
 0x90e   :  { %5670 = vmatprep.subr.bf16.mxu0 %v5669_v10  ;;  %v3129_v10 = vld [vmem:[#allocation9 + $0x170] sm:$0xff] }
 0x90f   :  { %v5711_v33 = vpack.c.bf16 %v3129_v10, %v3127_v54  ;;  %v3159_v10 = vld [vmem:[#allocation9 + $0x260] sm:$0xff] }
 0x911   :  { %5672 = vmatpush1.bf16.msra.mxu0 %v5671_v41  ;;  %v3133_v41 = vld [vmem:[#allocation9 + $0x190] sm:$0xff] }
 0x912   :  { %5674 = vmatprep.subr.bf16.mxu0 %v5673_v25  ;;  %v5715_v25 = vpack.c.bf16 %v3133_v41, %v3131_v21  ;;  %v3163_v41 = vld [vmem:[#allocation9 + $0x280] sm:$0xff] }
 0x915   :  { %5676 = vmatpush1.bf16.msra.mxu0 %v5675_v38  ;;  %v3137_v38 = vld [vmem:[#allocation9 + $0x1b0] sm:$0xff] }
 0x916   :  { %5678 = vmatprep.subr.bf16.mxu0 %v5677_v39  ;;  %v5719_v39 = vpack.c.bf16 %v3137_v38, %v3135_v4  ;;  %v3167_v4 = vld [vmem:[#allocation9 + $0x2a0] sm:$0xff]  ;;  %v3169_v38 = vld [vmem:[#allocation9 + $0x2b0] sm:$0xff] }
 0x917   :  { %v5751_v6 = vpack.c.bf16 %v3169_v38, %v3167_v4  ;;  %v3179_v4 = vld [vmem:[%s7167_s6] sm:$0x3]  ;;  %v7473_v38 = vld [vmem:[#allocation48_spill] sm:$0xff]  ;;  %s6068_s6 = smov [#allocation12]  }
 0x918   :  { %s3451_s28 = sshll.u32 %s6068_s6, 4  ;;  %s3452_s28 = int_to_ptr.vmem [resolvable:$true] %s3451_s28 }
 0x919   :  { %5680 = vmatpush1.bf16.msra.mxu0 %v5679_v52  ;;  %v3141_v52 = vld [vmem:[#allocation9 + $0x1d0] sm:$0xff]  ;;  %s6022_s29 = scalar_lea.vmem %s3452_s28, 128  ;;  %p6027_p13 = scmp.lt.s32.totalorder %s3452_s28, %s3452_s28 }
 0x91a   :  { %5682 = vmatprep.subr.bf16.mxu0 %v5681_v53  ;;  %v3144_v53 = vld [vmem:[#allocation9 + $0x1e8] sm:$0xff]  ;;  %v5723_v59 = vpack.c.bf16 %v3141_v52, %v3139_v44  ;;  %v3171_v44 = vld [vmem:[#allocation9 + $0x2c0] sm:$0xff]  ;;  %v3173_v52 = vld [vmem:[#allocation9 + $0x2d0] sm:$0xff]  ;;  %p6023_p12 = scmp.ne.s32.totalorder %s3452_s28, %s6022_s29  ;;  %p6028_p0 = scmp.lt.s32.totalorder %s6022_s29, %s6022_s29 }
 0x91b   :  { %v5725_v57 = vpack.c.bf16 %v3146_v60, %v3144_v53  ;;  %v3176_v53 = vld [vmem:[#allocation9 + $0x2e8] sm:$0xff]  ;;  %v5755_v60 = vpack.c.bf16 %v3173_v52, %v3171_v44 }
 0x91c   :  { %p6029_p1 = por %p6028_p0, %p6027_p13 }
 0x91d   :  { %5684 = vmatpush1.bf16.msra.mxu0 %v5683_v1  ;;  %v3143_v1 = vld [vmem:[#allocation9 + $0x1e0] sm:$0xff] }
 0x91e   :  { %5686 = vmatprep.subr.bf16.mxu0 %v5685_v56  ;;  %v5727_v56 = vpack.c.bf16 %v3145_v2, %v3143_v1  ;;  %v3175_v2 = vld [vmem:[#allocation9 + $0x2e0] sm:$0xff]  ;;  %p6030_p2 = pnand %p6029_p1, %p6023_p12 }
 0x921   :  { %5688 = vmatpush1.bf16.msra.mxu0 %v5687_v19  ;;  %v5729_v19 = vpack.c.bf16 %v3150_v50, %v3148_v32  ;;  %v3352_v32 = vld [vmem:[#allocation11 + $0x88] sm:$0xff] }
 0x922   :  { %5690 = vmatprep.subr.bf16.mxu0 %v5689_v51 }
 0x925   :  { %5692 = vmatpush1.bf16.msra.mxu0 %v5691_v15 }
 0x926   :  { %5694 = vmatprep.subr.bf16.mxu0 %v5693_v12 }
 0x929   :  { %5696 = vmatpush1.bf16.msra.mxu0 %v5695_v62 }
 0x92a   :  { %5698 = vmatprep.subr.bf16.mxu0 %v5697_v46  ;;  %v3147_v46 = vld [vmem:[#allocation9 + $0x200] sm:$0xff] }
 0x92b   :  { %v5731_v16 = vpack.c.bf16 %v3149_v40, %v3147_v46  ;;  %v3340_v46 = vld [vmem:[#allocation11 + $0x28] sm:$0xff]  ;;  %v3357_v40 = vld [vmem:[#allocation11 + $0xb0] sm:$0xff] }
 0x92d   :  { %5700 = vmatpush1.bf16.msra.mxu0 %v5699_v17 }
 0x92e   :  { %5702 = vmatprep.subr.bf16.mxu0 %v5701_v8  ;;  %v5733_v8 = vpack.c.bf16 %v3154_v7, %v3152_v14  ;;  %v3358_v14 = vld [vmem:[#allocation11 + $0xb8] sm:$0xff] }
 0x931   :  { %5704 = vmatpush1.bf16.msra.mxu0 %v5703_v43  ;;  %v3158_v43 = vld [vmem:[#allocation9 + $0x258] sm:$0xff] }
 0x932   :  { %5706 = vmatprep.subr.bf16.mxu0 %v5705_v34  ;;  %v5735_v34 = vpack.c.bf16 %v3153_v29, %v3151_v28  ;;  %v5737_v37 = vpack.c.bf16 %v3158_v43, %v3156_v36  ;;  %v3359_v28 = vld [vmem:[#allocation11 + $0xc0] sm:$0xff]  ;;  %v3360_v29 = vld [vmem:[#allocation11 + $0xc8] sm:$0xff] }
 0x933   :  { %v5777_v36 = vpack.c.bf16 %v3360_v29, %v3359_v28  ;;  %v3343_v43 = vld [vmem:[#allocation11 + $0x40] sm:$0xff] }
 0x935   :  { %5708 = vmatpush1.bf16.msra.mxu0 %v5707_v58  ;;  %v3162_v58 = vld [vmem:[#allocation9 + $0x278] sm:$0xff] }
 0x936   :  { %5710 = vmatprep.subr.bf16.mxu0 %v5709_v61  ;;  %v5739_v61 = vpack.c.bf16 %v3157_v48, %v3155_v55  ;;  %v5741_v54 = vpack.c.bf16 %v3162_v58, %v3160_v49  ;;  %v3362_v55 = vld [vmem:[#allocation11 + $0xd8] sm:$0xff]  ;;  %v3345_v58 = vld [vmem:[#allocation11 + $0x50] sm:$0xff] }
 0x939   :  { %5712 = vmatpush1.bf16.msra.mxu0 %v5711_v33  ;;  %v3166_v33 = vld [vmem:[#allocation9 + $0x298] sm:$0xff] }
 0x93a   :  { %5714 = vmatprep.subr.bf16.mxu0 %v5713_v47  ;;  %v5743_v47 = vpack.c.bf16 %v3161_v11, %v3159_v10  ;;  %v5745_v21 = vpack.c.bf16 %v3166_v33, %v3164_v20  ;;  %v3364_v10 = vld [vmem:[#allocation11 + $0xe8] sm:$0xff]  ;;  %v3347_v33 = vld [vmem:[#allocation11 + $0x60] sm:$0xff] }
 0x93d   :  { %5716 = vmatpush1.bf16.msra.mxu0 %v5715_v25  ;;  %v3168_v25 = vld [vmem:[#allocation9 + $0x2a8] sm:$0xff] }
 0x93e   :  { %5718 = vmatprep.subr.bf16.mxu0 %v5717_v63  ;;  %v5749_v63 = vpack.c.bf16 %v3170_v31, %v3168_v25  ;;  %v3349_v31 = vld [vmem:[#allocation11 + $0x70] sm:$0xff] }
 0x941   :  { %5720 = vmatpush1.bf16.msra.mxu0 %v5719_v39  ;;  %v3172_v39 = vld [vmem:[#allocation9 + $0x2c8] sm:$0xff] }
 0x942   :  { %5722 = vmatprep.subr.bf16.mxu0 %v5721_v24  ;;  %v5753_v24 = vpack.c.bf16 %v3174_v18, %v3172_v39  ;;  %v7474_v39 = vsub.s32 0, %v7473_v38 }
 0x944   :  { %v3184_v18 = vrot.slane %v3179_v4, %v7474_v39 }
 0x945   :  { %5724 = vmatpush1.bf16.msra.mxu0 %v5723_v59  ;;  %v3178_v59 = vld [vmem:[#allocation9 + $0x2f8] sm:$0xff] }
 0x946   :  { %5726 = vmatprep.subr.bf16.mxu0 %v5725_v57  ;;  %v5757_v1 = vpack.c.bf16 %v3178_v59, %v3176_v53  ;;  %v3177_v57 = vld [vmem:[#allocation9 + $0x2f0] sm:$0xff] }
 0x947   :  { %v5759_v50 = vpack.c.bf16 %v3177_v57, %v3175_v2  ;;  %v3485_v57 = vld [vmem:[%s7169_s8] ss:$0 sm:$0xff] }
 0x949   :  { %5728 = vmatpush1.bf16.msra.mxu0 %v5727_v56  ;;  %v3351_v56 = vld [vmem:[#allocation11 + $0x80] sm:$0xff] }
 0x94a   :  { %5730 = vmatprep.subr.bf16.mxu0 %v5729_v19  ;;  %v5761_v19 = vpack.c.bf16 %v3352_v32, %v3351_v56 }
 0x9bf   :  { %v3930_v5 = vpop.f32.mrb[60].mxu0 }
 0x9c0   :  { %v3931_v27 = vpop.f32.mrb[61].mxu0 }
 0x9c1   :  { %v3932_v13 = vadd.f32 %v3931_v27, %v3930_v5  ;;  %v3335_v5 = vld [vmem:[#allocation11] sm:$0xff]  ;;  %v3336_v27 = vld [vmem:[#allocation11 + $0x8] sm:$0xff] }
 0x9df   :  { %v2932_v51 = vpop.f32.mrb[14].mxu1  ;;  %v3073_v26 = vpop.f32.mrb[62].mxu0 }
 0x9e0   :  { %v5822_v9 = vadd.f32 %v2932_v51, %v7470_v42  ;;  %v3074_v15 = vadd.f32 %v3932_v13, %v3073_v26  ;;  %v2934_v12 = vpop.f32.mrb[15].mxu1  ;;  %v4352_v45 = vpop.f32.mrb[63].mxu0  ;;  %v3353_v13 = vld [vmem:[#allocation11 + $0x90] sm:$0xff]  ;;  %v3354_v51 = vld [vmem:[#allocation11 + $0x98] sm:$0xff]  ;;  %v5763_v26 = vpack.c.bf16 %v3336_v27, %v3335_v5 }
 0x9e1   :  { %v5824_v30 = vadd.f32 %v2934_v12, %v7471_v0  ;;  %v5765_v42 = vpack.c.bf16 %v3354_v51, %v3353_v13  ;;  %v3355_v45 = vld [vmem:[#allocation11 + $0xa0] sm:$0xff]  ;;  %v3356_v0 = vld [vmem:[#allocation11 + $0xa8] sm:$0xff] }
 0x9e2   :  { %v3079_v62 = vadd.f32 %v3074_v15, %v7472_v22  ;;  %v3338_v15 = vld [vmem:[#allocation11 + $0x18] sm:$0xff]  ;;  %v5769_v22 = vpack.c.bf16 %v3356_v0, %v3355_v45 }
 0x9e3   :  { %5906 = vtanh.f32 %v5824_v30 }
 0x9e4   :  { %5908 = vtanh.f32 %v5822_v9  ;;  %v3337_v9 = vld [vmem:[#allocation11 + $0x10] sm:$0xff] }
 0x9e5   :  { %5910 = vtanh.f32 %v3079_v62  ;;  %v5767_v30 = vpack.c.bf16 %v3338_v15, %v3337_v9  ;;  %v3339_v62 = vld [vmem:[#allocation11 + $0x20] sm:$0xff] }
 0x9e6   :  { %v5771_v7 = vpack.c.bf16 %v3340_v46, %v3339_v62 }
 0x9ed   :  { %v5907_v17 = vpop.eup %5906 }
 0x9ee   :  { %v5909_v35 = vpop.eup %5908  ;;  %3255 = vmatprep.mubr.f32.mxu0 %v5907_v17  ;;  %v3341_v17 = vld [vmem:[#allocation11 + $0x30] sm:$0xff] }
 0x9ef   :  { %3256 = vmatmul.mubr.f32.vlgmr.msra.gmra.mrb[64].mxu0 %v5909_v35  ;;  %v5911_v12 = vpop.eup %5910 }
 0x9f0   :  { %5732 = vmatpush1.bf16.msra.mxu0 %v5731_v16  ;;  %3326 = vmatprep.mubr.f32.mxu0 %v7268_v3  ;;  %v3165_v3 = vld [vmem:[#allocation9 + $0x290] sm:$0xff]  ;;  %v5773_v16 = vpack.c.bf16 %v3358_v14, %v3357_v40 }
 0x9f1   :  { %5734 = vmatprep.subr.bf16.mxu0 %v5733_v8  ;;  %v5747_v23 = vpack.c.bf16 %v3165_v3, %v3163_v41  ;;  %v3342_v8 = vld [vmem:[#allocation11 + $0x38] sm:$0xff]  ;;  %v3365_v41 = vld [vmem:[#allocation11 + $0xf0] sm:$0xff] }
 0x9f2   :  { %v5775_v35 = vpack.c.bf16 %v3342_v8, %v3341_v17  ;;  %v3366_v3 = vld [vmem:[#allocation11 + $0xf8] sm:$0xff] }
 0x9f3   :  { %v5789_v25 = vpack.c.bf16 %v3366_v3, %v3365_v41 }
 0x9f4   :  { %5736 = vmatpush1.bf16.msra.mxu0 %v5735_v34  ;;  %v3344_v34 = vld [vmem:[#allocation11 + $0x48] sm:$0xff] }
 0x9f5   :  { %5738 = vmatprep.subr.bf16.mxu0 %v5737_v37  ;;  %v3361_v37 = vld [vmem:[#allocation11 + $0xd0] sm:$0xff]  ;;  %v5779_v48 = vpack.c.bf16 %v3344_v34, %v3343_v43 }
 0x9f6   :  { %v5781_v49 = vpack.c.bf16 %v3362_v55, %v3361_v37 }
 0x9f8   :  { %5740 = vmatpush1.bf16.msra.mxu0 %v5739_v61  ;;  %v3346_v61 = vld [vmem:[#allocation11 + $0x58] sm:$0xff] }
 0x9f9   :  { %5742 = vmatprep.subr.bf16.mxu0 %v5741_v54  ;;  %v3363_v54 = vld [vmem:[#allocation11 + $0xe0] sm:$0xff]  ;;  %v5783_v11 = vpack.c.bf16 %v3346_v61, %v3345_v58 }
 0x9fa   :  { %v5785_v20 = vpack.c.bf16 %v3364_v10, %v3363_v54 }
 0x9fc   :  { %5744 = vmatpush1.bf16.msra.mxu0 %v5743_v47  ;;  %v3348_v47 = vld [vmem:[#allocation11 + $0x68] sm:$0xff] }
 0x9fd   :  { %5746 = vmatprep.subr.bf16.mxu0 %v5745_v21  ;;  %v5787_v21 = vpack.c.bf16 %v3348_v47, %v3347_v33 }
 0xa00   :  { %5748 = vmatpush1.bf16.msra.mxu0 %v5747_v23  ;;  %v3350_v23 = vld [vmem:[#allocation11 + $0x78] sm:$0xff] }
 0xa01   :  { %5750 = vmatprep.subr.bf16.mxu0 %v5749_v63  ;;  %v5791_v63 = vpack.c.bf16 %v3350_v23, %v3349_v31 }
 0xa04   :  { %5752 = vmatpush1.bf16.msra.mxu0 %v5751_v6  ;;  %v7475_v6 = vsub.s32 1, %v7473_v38 }
 0xa05   :  { %5754 = vmatprep.subr.bf16.mxu0 %v5753_v24 }
 0xa06   :  { %v3188_v24 = vrot.slane %v3179_v4, %v7475_v6 }
 0xa08   :  { %5756 = vmatpush1.bf16.msra.mxu0 %v5755_v60 }
 0xa09   :  { %5758 = vmatprep.subr.bf16.mxu0 %v5757_v1 }
 0xa0c   :  { %5760 = vmatpush1.bf16.msra.mxu0 %v5759_v50 }
 0xa0d   :  { %5762 = vmatprep.subr.bf16.mxu0 %v5761_v19 }
 0xa0f   :  { %3327 = vmatmul.mubr.f32.vlgmr.msra.gmra.mrb[64].mxu0 %v5911_v12 }
 0xa10   :  { %5764 = vmatpush3.bf16.msra.mxu0 %v5763_v26 }
 0xa11   :  { %5766 = vmatprep.subr.bf16.mxu0 %v5765_v42 }
 0xa14   :  { %5768 = vmatpush3.bf16.msra.mxu0 %v5767_v30 }
 0xa15   :  { %5770 = vmatprep.subr.bf16.mxu0 %v5769_v22 }
 0xa18   :  { %5772 = vmatpush3.bf16.msra.mxu0 %v5771_v7 }
 0xa19   :  { %5774 = vmatprep.subr.bf16.mxu0 %v5773_v16 }
 0xa1c   :  { %5776 = vmatpush3.bf16.msra.mxu0 %v5775_v35 }
 0xa1d   :  { %5778 = vmatprep.subr.bf16.mxu0 %v5777_v36 }
 0xa20   :  { %5780 = vmatpush3.bf16.msra.mxu0 %v5779_v48 }
 0xa21   :  { %5782 = vmatprep.subr.bf16.mxu0 %v5781_v49 }
 0xa24   :  { %5784 = vmatpush3.bf16.msra.mxu0 %v5783_v11 }
 0xa25   :  { %5786 = vmatprep.subr.bf16.mxu0 %v5785_v20 }
 0xa28   :  { %5788 = vmatpush3.bf16.msra.mxu0 %v5787_v21 }
 0xa29   :  { %5790 = vmatprep.subr.bf16.mxu0 %v5789_v25 }
 0xa2c   :  { %5792 = vmatpush3.bf16.msra.mxu0 %v5791_v63 }
 0xae2   :  { %v3328_v44 = vpop.f32.mrb[64].mxu0 }
 0xae3   :  { %v5825_v52 = vadd.f32 %v3328_v44, %v3184_v18  ;;  %v3330_v53 = vpop.f32.mrb[65].mxu0 }
 0xae4   :  { %v5826_v59 = vadd.f32 %v3330_v53, %v3188_v24 }
 0xae5   :  { %v3333_v1 = vmax.f32 %v5825_v52, 0.0 }
 0xae6   :  { %v3334_v60 = vmax.f32 %v5826_v59, 0.0 }
 0xae8   :  { %3438 = vmatprep.mubr.f32.mxu0 %v3334_v60 }
 0xae9   :  { %3439 = vmatmul.mubr.f32.vlgmr.msra.gmra.mrb[66].mxu0 %v3333_v1 }
 0xbbc   :  { %v3982_v2 = vpop.f32.mrb[66].mxu0 }
 0xbbd   :  { %v3983_v56 = vpop.f32.mrb[67].mxu0 }
 0xbbe   :  { %v3984_v32 = vadd.f32 %v3983_v56, %v3982_v2 }
 0xbc0   :  { %v3441_v50 = vadd.f32 %v3984_v32, %v3485_v57 }
 0xbc2   :  { %3444 = vst [vmem:[#allocation12] sm:$0xff] %v3441_v50 }
 0xbc3   :  { %6033 = shalt.err (!%p6030_p2)
}
 0xbc4   :  { %s6034_s3 = scalar_lea.hbm %s7170_s9, 128 }
 0xbc5   :  { %p6035_p3 = scmp.ne.s32.totalorder %s7170_s9, %s6034_s3  ;;  %p6038_p4 = scmp.lt.u32.totalorder %s6034_s3, %s7170_s9 }
 0xbc7   :  { %p6040_p5 = pnand %p6038_p4, %p6035_p3 }
 0xbc9   :  { %6043 = shalt.err (!%p6040_p5)
}
 0xbca   :  { %3454 = dma.vmem_to_hbm [thread:$0]  %s3452_s28, 128, %s7170_s9, [#allocation5]  }
 0xbcb   :  { %6050 = dma.done.wait [#allocation5], 128  }
 0xbcc   :  { %6051 = vsyncadd [#allocation5], 4294967168 }
 0xbcd   :  { %3458 = vsyncpa [#allocation4], 1 }
 0xbce   :  { %3459 = vsyncpa [#allocation7], 1 }
 0xbcf   :  { %3460 = vsyncpa [#allocation10], 1 }
 0xbd0   :  { %3461 = vsyncpa [#allocation5], 1 }

</bundles_post_ra>
